<compile_context>
chip_gen: v7x
topology: tpu7x:2x2x1
jax: 0.10.0
libtpu: 0.0.40
codegen_flags: <defaults>
</compile_context>

<pallas_src>
import jax
import jax.numpy as jnp
from jax import lax
from jax.experimental import pallas as pl
from jax.experimental.pallas import tpu as pltpu

EPS = 1e-5


def _vmem_budget_bytes():
    """~75% of physical VMEM (96 MiB on v5e/v6e, 48 MiB on v7x); v7x-safe fallback."""
    cap = None
    try:
        cap = getattr(pltpu.get_tpu_info(), "vmem_capacity_bytes", None)
    except Exception:
        cap = None
    if not cap or int(cap) <= 0:
        cap = 64 * 1024 * 1024
    return max(32 * 1024 * 1024, (int(cap) * 3) // 4)


def _pick_row_tile(h, w, c_in, c_out, cd_bytes, budget_bytes):
    """Largest divisor of H whose per-step working set (double-buffered I/O
    blocks + the in-kernel ky-stack / shifted copies + f32 accumulator) stays
    within ~half the scoped-VMEM budget."""
    per_row = w * (2 * c_in * 4                  # input tile, double buffered
                   + 5 * 3 * c_in * cd_bytes     # ky-stack + left/right copies
                   + 2 * c_out * cd_bytes        # y block, double buffered
                   + 3 * c_out * 4)              # f32 acc + partial-sum temps
    cap = max(1, (budget_bytes // 2) // max(per_row, 1))
    best = 1
    for t in range(1, h + 1):
        if h % t == 0 and t <= cap:
            best = t
    return best


def _make_conv_kernel(th, w, c_in, c_out, apply_act, compute_dtype, rpc, nr_total):
    """3x3 same-conv over one row tile as three accumulating K=3*Cin matmuls,
    with optional fused BN+ReLU applied to the *input* tile, plus per-(batch,
    chunk) sum / sum-of-squares of the conv output (exact two-stage BN)."""
    k3 = 3 * c_in

    def kernel(*refs):
        if apply_act:
            (xm_ref, xt_ref, xb_ref, w_ref, b_ref, sc_ref, sh_ref,
             y_ref, s_ref, q_ref) = refs
        else:
            (xm_ref, xt_ref, xb_ref, w_ref, b_ref,
             y_ref, s_ref, q_ref) = refs

        chunk = pl.program_id(1)          # "parallel" row-chunk axis
        ri = pl.program_id(2)             # "arbitrary" (sequential) rows-in-chunk
        r = chunk * rpc + ri              # global row-tile index

        def act(v):  # BN(prev)+ReLU in f32, then cast once to the MXU operand dtype
            v = v.astype(jnp.float32)
            if apply_act:
                v = jnp.maximum(v * sc_ref[...].reshape(1, 1, c_in)
                                + sh_ref[...].reshape(1, 1, c_in), 0.0)
            return v.astype(compute_dtype)

        # Row tile + 1-row halos (clamped 1-row BlockSpecs, zero-masked at the
        # image borders -> zero padding of the *activated* input).
        mid = act(xm_ref[0])                                            # (TH, W, Cin)
        top = act(xt_ref[0]) * jnp.where(r == 0, 0.0, 1.0).astype(compute_dtype)
        bot = act(xb_ref[0]) * jnp.where(r == nr_total - 1, 0.0, 1.0).astype(compute_dtype)

        xh = jnp.concatenate([top, mid, bot], axis=0)                   # (TH+2, W, Cin)

        # ky-stack: channel-concat of three contiguous row slices -> K = 3*Cin.
        hs = jnp.concatenate([xh[0:th], xh[1:th + 1], xh[2:th + 2]], axis=-1)  # (TH,W,3Cin)

        # kx = -1 / +1 shifts along W via one zero column each (no W+2 intermediate).
        zc = jnp.zeros((th, 1, k3), compute_dtype)
        lft = jnp.concatenate([zc, hs[:, :w - 1, :]], axis=1)           # x[.., w-1, ..]
        rgt = jnp.concatenate([hs[:, 1:, :], zc], axis=1)               # x[.., w+1, ..]

        def tap(v, kx):
            return jnp.dot(v.reshape(th * w, k3), w_ref[kx],
                           preferred_element_type=jnp.float32)

        acc = tap(lft, 0) + tap(hs, 1) + tap(rgt, 2) + b_ref[...]       # (TH*W, Cout) f32
        y_ref[0] = acc.reshape(th, w, c_out).astype(y_ref.dtype)

        # Per-(batch, chunk) BN partial statistics, accumulated across the
        # sequential ("arbitrary") inner row axis only.
        @pl.when(ri == 0)
        def _init():
            s_ref[...] = jnp.zeros_like(s_ref)
            q_ref[...] = jnp.zeros_like(q_ref)

        s_ref[...] += jnp.sum(acc, axis=0).reshape(1, 1, 1, c_out)
        q_ref[...] += jnp.sum(acc * acc, axis=0).reshape(1, 1, 1, c_out)

    return kernel


def _conv_bn_stats_pass(src, w_stack, bias, scale, shift, *, th, n_chunks,
                        compute_dtype, vmem_limit):
    """src: (N, H, W, Cin).  Returns
       y    : (N, H, W, Cout) compute_dtype   conv(+bias) output, pre-BN
       s, q : (N, n_chunks, 1, Cout) f32      per-(batch, chunk) sum / sum-sq."""
    n, h, w, c_in = src.shape
    c_out = w_stack.shape[-1]
    apply_act = scale is not None
    nr = h // th
    rpc = nr // n_chunks

    kernel = _make_conv_kernel(th, w, c_in, c_out, apply_act, compute_dtype,
                               rpc, nr)

    def row(ck, ri):
        return ck * rpc + ri

    in_specs = [
        # row tile
        pl.BlockSpec((1, th, w, c_in), lambda b, ck, ri: (b, row(ck, ri), 0, 0)),
        # 1-row top/bottom halos (clamped element-row index; masked in-kernel)
        pl.BlockSpec((1, 1, w, c_in),
                     lambda b, ck, ri: (b, jnp.maximum(row(ck, ri) * th - 1, 0), 0, 0)),
        pl.BlockSpec((1, 1, w, c_in),
                     lambda b, ck, ri: (b, jnp.minimum(row(ck, ri) * th + th, h - 1), 0, 0)),
        # per-kx (3*Cin, Cout) weight stack + bias: resident, constant block index
        pl.BlockSpec((3, 3 * c_in, c_out), lambda b, ck, ri: (0, 0, 0)),
        pl.BlockSpec((1, c_out), lambda b, ck, ri: (0, 0)),
    ]
    args = [src, src, src, w_stack, bias.reshape(1, c_out).astype(jnp.float32)]
    if apply_act:
        in_specs += [pl.BlockSpec((1, c_in), lambda b, ck, ri: (0, 0))] * 2
        args += [scale.reshape(1, c_in).astype(jnp.float32),
                 shift.reshape(1, c_in).astype(jnp.float32)]

    out_shape = (
        jax.ShapeDtypeStruct((n, h, w, c_out), compute_dtype),
        jax.ShapeDtypeStruct((n, n_chunks, 1, c_out), jnp.float32),
        jax.ShapeDtypeStruct((n, n_chunks, 1, c_out), jnp.float32),
    )
    out_specs = (
        pl.BlockSpec((1, th, w, c_out), lambda b, ck, ri: (b, row(ck, ri), 0, 0)),
        pl.BlockSpec((1, 1, 1, c_out), lambda b, ck, ri: (b, ck, 0, 0)),  # revisit over ri
        pl.BlockSpec((1, 1, 1, c_out), lambda b, ck, ri: (b, ck, 0, 0)),  # revisit over ri
    )

    in_bytes = src.dtype.itemsize
    cd_bytes = jnp.dtype(compute_dtype).itemsize
    flops = 2 * n * h * w * 9 * c_in * c_out
    bytes_accessed = int(
        n * h * w * c_in * in_bytes                 # row tiles
        + n * nr * 2 * w * c_in * in_bytes          # halo re-reads
        + n * h * w * c_out * cd_bytes              # y write
        + 2 * n * n_chunks * c_out * 4              # s / q
        + w_stack.size * w_stack.dtype.itemsize + c_out * 4)

    return pl.pallas_call(
        kernel,
        grid=(n, n_chunks, rpc),
        in_specs=in_specs,
        out_specs=out_specs,
        out_shape=out_shape,
        compiler_params=pltpu.CompilerParams(
            dimension_semantics=("parallel", "parallel", "arbitrary"),
            vmem_limit_bytes=vmem_limit),
        cost_estimate=pl.CostEstimate(flops=flops, transcendentals=0,
                                      bytes_accessed=bytes_accessed),
    )(*args)


def _bn_scale_shift(s, q, gamma, beta, count):
    """Finalize the two-stage BN reduction (tiny per-channel math, f32)."""
    s = jnp.sum(s, axis=(0, 1, 2))
    q = jnp.sum(q, axis=(0, 1, 2))
    mean = s / count
    # TODO(synk): E[x^2]-E[x]^2 can cancel for large-mean activations; switch to a
    # centered second pass if tighter agreement with PyTorch is ever needed.
    var = jnp.maximum(q / count - mean * mean, 0.0)   # biased var (PyTorch train fwd)
    scale = gamma * lax.rsqrt(var + EPS)
    shift = beta - mean * scale
    return scale, shift


def _bn_relu_kernel(y_ref, sc_ref, sh_ref, o_ref):
    y = y_ref[...].astype(jnp.float32)
    o_ref[...] = jnp.maximum(y * sc_ref[...] + sh_ref[...], 0.0)


def _bn_relu_pass(y, scale, shift, *, vmem_limit):
    """BN+ReLU on a lane-dense (N*H, W*C) view: full-width unmasked stores and
    multi-row blocks instead of (1, th, W, C<128) tiles."""
    n, h, w, c = y.shape
    m, lc = n * h, w * c
    y_flat = y.reshape(m, lc)
    sc_row = jnp.tile(scale.astype(jnp.float32), w).reshape(1, lc)
    sh_row = jnp.tile(shift.astype(jnp.float32), w).reshape(1, lc)

    per_row = lc * (y.dtype.itemsize + 4) * 2         # in + out, double buffered
    cap = max(1, (vmem_limit // 2) // max(per_row, 1))
    rb = 1
    for t in range(1, m + 1):
        if m % t == 0 and t <= cap and (t % 8 == 0 or t == m):
            rb = t
    if rb == 1:
        rb = m                                         # full-extent fallback

    out = pl.pallas_call(
        _bn_relu_kernel,
        grid=(m // rb,),
        in_specs=[pl.BlockSpec((rb, lc), lambda i: (i, 0)),
                  pl.BlockSpec((1, lc), lambda i: (0, 0)),
                  pl.BlockSpec((1, lc), lambda i: (0, 0))],
        out_specs=pl.BlockSpec((rb, lc), lambda i: (i, 0)),
        out_shape=jax.ShapeDtypeStruct((m, lc), jnp.float32),
        compiler_params=pltpu.CompilerParams(
            dimension_semantics=("parallel",),
            vmem_limit_bytes=vmem_limit),
    )(y_flat, sc_row, sh_row)
    return out.reshape(n, h, w, c)


def double_conv(x_nchw, params, *, compute_dtype=jnp.bfloat16,
                row_tile=None, row_chunks=None):
    """x_nchw: (N, Cin, H, W) f32 -> (N, Cout, H, W) f32 (train-mode BN)."""
    w1, b1, g1, be1, w2, b2, g2, be2 = params
    n, c_in, h, w = x_nchw.shape
    c_mid = w1.shape[0]
    c_out = w2.shape[0]
    cd_bytes = jnp.dtype(compute_dtype).itemsize
    vmem_limit = _vmem_budget_bytes()

    th = row_tile if row_tile is not None else _pick_row_tile(
        h, w, max(c_in, c_mid), max(c_mid, c_out), cd_bytes, vmem_limit)
    assert h % th == 0
    nr = h // th
    if row_chunks is None:
        row_chunks = 2 if (nr >= 2 and nr % 2 == 0) else 1   # v7x: 2nd TC even at N=1
    assert nr % row_chunks == 0

    # Interface glue: NCHW -> NHWC (channels on lanes).
    x = jnp.transpose(x_nchw, (0, 2, 3, 1)).astype(jnp.float32)

    # (Cout, Cin, 3, 3) -> (kx, ky, Cin, Cout) -> (3, 3*Cin, Cout): per-kx weights
    # for the three accumulating K=3*Cin matmuls.
    w1k = jnp.transpose(w1, (3, 2, 1, 0)).reshape(3, 3 * c_in, c_mid).astype(compute_dtype)
    w2k = jnp.transpose(w2, (3, 2, 1, 0)).reshape(3, 3 * c_mid, c_out).astype(compute_dtype)

    count = n * h * w

    # Pass 1: conv1(+bias) and per-(batch, chunk) BN1 partial sums.
    y1, s1, q1 = _conv_bn_stats_pass(x, w1k, b1, None, None, th=th,
                                     n_chunks=row_chunks,
                                     compute_dtype=compute_dtype,
                                     vmem_limit=vmem_limit)
    sc1, sh1 = _bn_scale_shift(s1, q1, g1, be1, count)

    # Pass 2: BN1+ReLU fused into conv2's input read, conv2(+bias), BN2 partials.
    y2, s2, q2 = _conv_bn_stats_pass(y1, w2k, b2, sc1, sh1, th=th,
                                     n_chunks=row_chunks,
                                     compute_dtype=compute_dtype,
                                     vmem_limit=vmem_limit)
    sc2, sh2 = _bn_scale_shift(s2, q2, g2, be2, count)

    # Pass 3: BN2 + ReLU on the lane-dense flattened view.
    out = _bn_relu_pass(y2, sc2, sh2, vmem_limit=vmem_limit)

    return jnp.transpose(out, (0, 3, 1, 2))


def _reference(x, params):
    """Plain-JAX reference matching the PyTorch forward (train-mode BN)."""
    w1, b1, g1, be1, w2, b2, g2, be2 = params

    def conv(x, w, b):
        y = lax.conv_general_dilated(
            x, w, window_strides=(1, 1), padding=((1, 1), (1, 1)),
            dimension_numbers=('NCHW', 'OIHW', 'NCHW'))
        return y + b[None, :, None, None]

    def bn_relu(y, g, be):
        m = jnp.mean(y, axis=(0, 2, 3), keepdims=True)
        v = jnp.mean((y - m) ** 2, axis=(0, 2, 3), keepdims=True)
        z = (y - m) * lax.rsqrt(v + EPS) * g[None, :, None, None] + be[None, :, None, None]
        return jnp.maximum(z, 0.0)

    h = bn_relu(conv(x, w1, b1), g1, be1)
    return bn_relu(conv(h, w2, b2), g2, be2)


if __name__ == "__main__":
    key = jax.random.PRNGKey(0)
    n, c_in, h, w = 2, 4, 16, 16
    c_mid = c_out = 8  # mid_channels defaults to out_channels

    k0, k1, k2, k3, k4 = jax.random.split(key, 5)
    x = jax.random.normal(k0, (n, c_in, h, w), jnp.float32)
    w1 = jax.random.normal(k1, (c_mid, c_in, 3, 3), jnp.float32) * 0.1
    b1 = jax.random.normal(k2, (c_mid,), jnp.float32) * 0.1
    w2 = jax.random.normal(k3, (c_out, c_mid, 3, 3), jnp.float32) * 0.1
    b2 = jax.random.normal(k4, (c_out,), jnp.float32) * 0.1
    # BatchNorm2d default affine init: gamma = 1, beta = 0
    g1 = jnp.ones((c_mid,), jnp.float32)
    be1 = jnp.zeros((c_mid,), jnp.float32)
    g2 = jnp.ones((c_out,), jnp.float32)
    be2 = jnp.zeros((c_out,), jnp.float32)

    params = (w1, b1, g1, be1, w2, b2, g2, be2)

    fwd = jax.jit(double_conv,
                  static_argnames=("compute_dtype", "row_tile", "row_chunks"))

    y_ref = _reference(x, params)

    # f32 MXU operands / f32 intermediates: tight agreement with the reference.
    y32 = fwd(x, params, compute_dtype=jnp.float32)
    jax.block_until_ready(y32)
    assert y32.shape == (n, c_out, h, w)
    err32 = float(jnp.max(jnp.abs(y32 - y_ref)))
    assert err32 < 2e-3, f"f32 max abs err {err32}"

    # Default path: bf16 MXU operands + bf16 inter-pass intermediates
    # (f32 accumulation, f32 BN statistics) -- recommended for v6e/v7x.
    ybf = fwd(x, params)
    jax.block_until_ready(ybf)
    errbf = float(jnp.max(jnp.abs(ybf - y_ref)))
    assert errbf < 2.5e-1, f"bf16 max abs err {errbf}"

    print("KERNEL_OK")
</pallas_src>

<mosaic_0001>
module attributes {stable_mosaic.version = 11 : i64} {
  func.func @kernel(%arg0: i32, %arg1: i32, %arg2: i32, %arg3: memref<1x16x16x4xf32, #tpu.memory_space<vmem>>, %arg4: memref<1x1x16x4xf32, #tpu.memory_space<vmem>>, %arg5: memref<1x1x16x4xf32, #tpu.memory_space<vmem>>, %arg6: memref<3x12x8xf32, #tpu.memory_space<vmem>>, %arg7: memref<1x8xf32, #tpu.memory_space<vmem>>, %arg8: memref<1x16x16x8xf32, #tpu.memory_space<vmem>>, %arg9: memref<1x1x1x8xf32, #tpu.memory_space<vmem>>, %arg10: memref<1x1x1x8xf32, #tpu.memory_space<vmem>>) attributes {dimension_semantics = [#tpu.dimension_semantics<parallel>, #tpu.dimension_semantics<parallel>, #tpu.dimension_semantics<arbitrary>], iteration_bounds = array<i64: 2, 1, 1>, scalar_prefetch = 0 : i64, scratch_operands = 0 : i64, tpu.core_type = #tpu.core_type<tc>, window_params = [{transform_indices = @transform_0, window_bounds = array<i64: 1, 16, 16, 4>}, {transform_indices = @transform_1, window_bounds = array<i64: 1, 1, 16, 4>}, {transform_indices = @transform_2, window_bounds = array<i64: 1, 1, 16, 4>}, {pipeline_mode = #tpu.pipeline_mode<synchronous>, transform_indices = @transform_3, window_bounds = array<i64: 3, 12, 8>}, {pipeline_mode = #tpu.pipeline_mode<synchronous>, transform_indices = @transform_4, window_bounds = array<i64: 1, 8>}, {transform_indices = @transform_5, window_bounds = array<i64: 1, 16, 16, 8>}, {transform_indices = @transform_6, window_bounds = array<i64: 1, 1, 1, 8>}, {transform_indices = @transform_7, window_bounds = array<i64: 1, 1, 1, 8>}]} {
    %c1_i32 = arith.constant 1 : i32
    %0 = arith.muli %arg1, %c1_i32 : i32
    %1 = arith.addi %0, %arg2 : i32
    %c0 = arith.constant 0 : index
    %c0_0 = arith.constant 0 : index
    %c0_1 = arith.constant 0 : index
    %c0_2 = arith.constant 0 : index
    %2 = vector.load %arg3[%c0, %c0_0, %c0_1, %c0_2] : memref<1x16x16x4xf32, #tpu.memory_space<vmem>>, vector<1x16x16x4xf32>
    %3 = vector.shape_cast %2 : vector<1x16x16x4xf32> to vector<16x16x4xf32>
    %c0_3 = arith.constant 0 : index
    %c0_4 = arith.constant 0 : index
    %c0_5 = arith.constant 0 : index
    %c0_6 = arith.constant 0 : index
    %4 = vector.load %arg4[%c0_3, %c0_4, %c0_5, %c0_6] : memref<1x1x16x4xf32, #tpu.memory_space<vmem>>, vector<1x1x16x4xf32>
    %5 = vector.shape_cast %4 : vector<1x1x16x4xf32> to vector<1x16x4xf32>
    %c0_i32 = arith.constant 0 : i32
    %6 = arith.cmpi eq, %1, %c0_i32 : i32
    %cst = arith.constant 0.000000e+00 : f32
    %cst_7 = arith.constant 1.000000e+00 : f32
    %7 = arith.select %6, %cst, %cst_7 : f32
    %8 = vector.broadcast %7 : f32 to vector<1x16x4xf32>
    %9 = arith.mulf %5, %8 : vector<1x16x4xf32>
    %c0_8 = arith.constant 0 : index
    %c0_9 = arith.constant 0 : index
    %c0_10 = arith.constant 0 : index
    %c0_11 = arith.constant 0 : index
    %10 = vector.load %arg5[%c0_8, %c0_9, %c0_10, %c0_11] : memref<1x1x16x4xf32, #tpu.memory_space<vmem>>, vector<1x1x16x4xf32>
    %11 = vector.shape_cast %10 : vector<1x1x16x4xf32> to vector<1x16x4xf32>
    %c0_i32_12 = arith.constant 0 : i32
    %12 = arith.cmpi eq, %1, %c0_i32_12 : i32
    %cst_13 = arith.constant 0.000000e+00 : f32
    %cst_14 = arith.constant 1.000000e+00 : f32
    %13 = arith.select %12, %cst_13, %cst_14 : f32
    %14 = vector.broadcast %13 : f32 to vector<1x16x4xf32>
    %15 = arith.mulf %11, %14 : vector<1x16x4xf32>
    %16 = tpu.concatenate %9, %3, %15 in 0 : vector<1x16x4xf32>, vector<16x16x4xf32>, vector<1x16x4xf32> -> vector<18x16x4xf32>
    %17 = vector.extract_strided_slice %16 {offsets = [0, 0, 0], sizes = [16, 16, 4], strides = [1, 1, 1]} : vector<18x16x4xf32> to vector<16x16x4xf32>
    %18 = vector.extract_strided_slice %16 {offsets = [1, 0, 0], sizes = [16, 16, 4], strides = [1, 1, 1]} : vector<18x16x4xf32> to vector<16x16x4xf32>
    %19 = vector.extract_strided_slice %16 {offsets = [2, 0, 0], sizes = [16, 16, 4], strides = [1, 1, 1]} : vector<18x16x4xf32> to vector<16x16x4xf32>
    %20 = tpu.concatenate %17, %18, %19 in 2 : vector<16x16x4xf32>, vector<16x16x4xf32>, vector<16x16x4xf32> -> vector<16x16x12xf32>
    %cst_15 = arith.constant 0.000000e+00 : f32
    %21 = vector.broadcast %cst_15 : f32 to vector<16x1x12xf32>
    %22 = vector.extract_strided_slice %20 {offsets = [0, 0, 0], sizes = [16, 15, 12], strides = [1, 1, 1]} : vector<16x16x12xf32> to vector<16x15x12xf32>
    %23 = tpu.concatenate %21, %22 in 1 : vector<16x1x12xf32>, vector<16x15x12xf32> -> vector<16x16x12xf32>
    %24 = vector.extract_strided_slice %20 {offsets = [0, 1, 0], sizes = [16, 15, 12], strides = [1, 1, 1]} : vector<16x16x12xf32> to vector<16x15x12xf32>
    %25 = tpu.concatenate %24, %21 in 1 : vector<16x15x12xf32>, vector<16x1x12xf32> -> vector<16x16x12xf32>
    %26 = vector.shape_cast %23 : vector<16x16x12xf32> to vector<256x12xf32>
    %c0_16 = arith.constant 0 : index
    %c0_17 = arith.constant 0 : index
    %c0_18 = arith.constant 0 : index
    %27 = vector.load %arg6[%c0_16, %c0_17, %c0_18] : memref<3x12x8xf32, #tpu.memory_space<vmem>>, vector<1x12x8xf32>
    %28 = vector.shape_cast %27 : vector<1x12x8xf32> to vector<12x8xf32>
    %cst_19 = arith.constant dense<0.000000e+00> : vector<256x8xf32>
    %29 = tpu.matmul %26, %28, %cst_19 {dimension_numbers = #tpu.dot_dimension_numbers<[1], [0], [0], [1], [0, 0, 1, 1], [], []>} : vector<256x12xf32>, vector<12x8xf32>, vector<256x8xf32> -> vector<256x8xf32>
    %30 = vector.shape_cast %20 : vector<16x16x12xf32> to vector<256x12xf32>
    %c1 = arith.constant 1 : index
    %c0_20 = arith.constant 0 : index
    %c0_21 = arith.constant 0 : index
    %31 = vector.load %arg6[%c1, %c0_20, %c0_21] : memref<3x12x8xf32, #tpu.memory_space<vmem>>, vector<1x12x8xf32>
    %32 = vector.shape_cast %31 : vector<1x12x8xf32> to vector<12x8xf32>
    %cst_22 = arith.constant dense<0.000000e+00> : vector<256x8xf32>
    %33 = tpu.matmul %30, %32, %cst_22 {dimension_numbers = #tpu.dot_dimension_numbers<[1], [0], [0], [1], [0, 0, 1, 1], [], []>} : vector<256x12xf32>, vector<12x8xf32>, vector<256x8xf32> -> vector<256x8xf32>
    %34 = arith.addf %29, %33 : vector<256x8xf32>
    %35 = vector.shape_cast %25 : vector<16x16x12xf32> to vector<256x12xf32>
    %c2 = arith.constant 2 : index
    %c0_23 = arith.constant 0 : index
    %c0_24 = arith.constant 0 : index
    %36 = vector.load %arg6[%c2, %c0_23, %c0_24] : memref<3x12x8xf32, #tpu.memory_space<vmem>>, vector<1x12x8xf32>
    %37 = vector.shape_cast %36 : vector<1x12x8xf32> to vector<12x8xf32>
    %cst_25 = arith.constant dense<0.000000e+00> : vector<256x8xf32>
    %38 = tpu.matmul %35, %37, %cst_25 {dimension_numbers = #tpu.dot_dimension_numbers<[1], [0], [0], [1], [0, 0, 1, 1], [], []>} : vector<256x12xf32>, vector<12x8xf32>, vector<256x8xf32> -> vector<256x8xf32>
    %39 = arith.addf %34, %38 : vector<256x8xf32>
    %c0_26 = arith.constant 0 : index
    %c0_27 = arith.constant 0 : index
    %40 = vector.load %arg7[%c0_26, %c0_27] : memref<1x8xf32, #tpu.memory_space<vmem>>, vector<1x8xf32>
    %41 = vector.broadcast %40 : vector<1x8xf32> to vector<256x8xf32>
    %42 = arith.addf %39, %41 : vector<256x8xf32>
    %43 = vector.shape_cast %42 : vector<256x8xf32> to vector<16x16x8xf32>
    %c0_28 = arith.constant 0 : index
    %c0_29 = arith.constant 0 : index
    %c0_30 = arith.constant 0 : index
    %c0_31 = arith.constant 0 : index
    %44 = vector.load %arg8[%c0_28, %c0_29, %c0_30, %c0_31] : memref<1x16x16x8xf32, #tpu.memory_space<vmem>>, vector<1x16x16x8xf32>
    %45 = vector.shape_cast %44 : vector<1x16x16x8xf32> to vector<16x16x8xf32>
    %46 = vector.shape_cast %43 : vector<16x16x8xf32> to vector<1x16x16x8xf32>
    tpu.vector_store %arg8[%c0_28, %c0_29, %c0_30, %c0_31], %46 {strides = array<i32>} : memref<1x16x16x8xf32, #tpu.memory_space<vmem>>, vector<1x16x16x8xf32>,
    %c0_i32_32 = arith.constant 0 : i32
    %47 = arith.cmpi eq, %arg2, %c0_i32_32 : i32
    %48 = arith.extui %47 : i1 to i32
    %c0_i32_33 = arith.constant 0 : i32
    %49 = arith.cmpi ne, %48, %c0_i32_33 : i32
    scf.if %49 {
      %cst_52 = arith.constant 0.000000e+00 : f32
      %61 = vector.broadcast %cst_52 : f32 to vector<1x1x1x8xf32>
      %c0_53 = arith.constant 0 : index
      %c0_54 = arith.constant 0 : index
      %c0_55 = arith.constant 0 : index
      %c0_56 = arith.constant 0 : index
      %62 = vector.load %arg9[%c0_53, %c0_54, %c0_55, %c0_56] : memref<1x1x1x8xf32, #tpu.memory_space<vmem>>, vector<1x1x1x8xf32>
      tpu.vector_store %arg9[%c0_53, %c0_54, %c0_55, %c0_56], %61 {strides = array<i32>} : memref<1x1x1x8xf32, #tpu.memory_space<vmem>>, vector<1x1x1x8xf32>,
      %cst_57 = arith.constant 0.000000e+00 : f32
      %63 = vector.broadcast %cst_57 : f32 to vector<1x1x1x8xf32>
      %c0_58 = arith.constant 0 : index
      %c0_59 = arith.constant 0 : index
      %c0_60 = arith.constant 0 : index
      %c0_61 = arith.constant 0 : index
      %64 = vector.load %arg10[%c0_58, %c0_59, %c0_60, %c0_61] : memref<1x1x1x8xf32, #tpu.memory_space<vmem>>, vector<1x1x1x8xf32>
      tpu.vector_store %arg10[%c0_58, %c0_59, %c0_60, %c0_61], %63 {strides = array<i32>} : memref<1x1x1x8xf32, #tpu.memory_space<vmem>>, vector<1x1x1x8xf32>,
    } else {
    }
    %c0_34 = arith.constant 0 : index
    %c0_35 = arith.constant 0 : index
    %c0_36 = arith.constant 0 : index
    %c0_37 = arith.constant 0 : index
    %50 = vector.load %arg9[%c0_34, %c0_35, %c0_36, %c0_37] : memref<1x1x1x8xf32, #tpu.memory_space<vmem>>, vector<1x1x1x8xf32>
    %cst_38 = arith.constant dense<0.000000e+00> : vector<8xf32>
    %51 = vector.multi_reduction <add>, %42, %cst_38 [0] : vector<256x8xf32> to vector<8xf32>
    %52 = vector.shape_cast %51 : vector<8xf32> to vector<1x1x1x8xf32>
    %53 = arith.addf %50, %52 : vector<1x1x1x8xf32>
    %c0_39 = arith.constant 0 : index
    %c0_40 = arith.constant 0 : index
    %c0_41 = arith.constant 0 : index
    %c0_42 = arith.constant 0 : index
    %54 = vector.load %arg9[%c0_39, %c0_40, %c0_41, %c0_42] : memref<1x1x1x8xf32, #tpu.memory_space<vmem>>, vector<1x1x1x8xf32>
    tpu.vector_store %arg9[%c0_39, %c0_40, %c0_41, %c0_42], %53 {strides = array<i32>} : memref<1x1x1x8xf32, #tpu.memory_space<vmem>>, vector<1x1x1x8xf32>,
    %c0_43 = arith.constant 0 : index
    %c0_44 = arith.constant 0 : index
    %c0_45 = arith.constant 0 : index
    %c0_46 = arith.constant 0 : index
    %55 = vector.load %arg10[%c0_43, %c0_44, %c0_45, %c0_46] : memref<1x1x1x8xf32, #tpu.memory_space<vmem>>, vector<1x1x1x8xf32>
    %56 = arith.mulf %42, %42 : vector<256x8xf32>
    %cst_47 = arith.constant dense<0.000000e+00> : vector<8xf32>
    %57 = vector.multi_reduction <add>, %56, %cst_47 [0] : vector<256x8xf32> to vector<8xf32>
    %58 = vector.shape_cast %57 : vector<8xf32> to vector<1x1x1x8xf32>
    %59 = arith.addf %55, %58 : vector<1x1x1x8xf32>
    %c0_48 = arith.constant 0 : index
    %c0_49 = arith.constant 0 : index
    %c0_50 = arith.constant 0 : index
    %c0_51 = arith.constant 0 : index
    %60 = vector.load %arg10[%c0_48, %c0_49, %c0_50, %c0_51] : memref<1x1x1x8xf32, #tpu.memory_space<vmem>>, vector<1x1x1x8xf32>
    tpu.vector_store %arg10[%c0_48, %c0_49, %c0_50, %c0_51], %59 {strides = array<i32>} : memref<1x1x1x8xf32, #tpu.memory_space<vmem>>, vector<1x1x1x8xf32>,
    return
  }
  func.func @transform_0(%arg0: i32, %arg1: i32, %arg2: i32) -> (i32, i32, i32, i32) {
    %c1_i32 = arith.constant 1 : i32
    %0 = arith.muli %arg1, %c1_i32 : i32
    %1 = arith.addi %0, %arg2 : i32
    %c0_i32 = arith.constant 0 : i32
    %c0_i32_0 = arith.constant 0 : i32
    %c0_i32_1 = arith.constant 0 : i32
    return %arg0, %1, %c0_i32, %c0_i32_0 : i32, i32, i32, i32
  }
  func.func @transform_1(%arg0: i32, %arg1: i32, %arg2: i32) -> (i32, i32, i32, i32) {
    %c1_i32 = arith.constant 1 : i32
    %0 = arith.muli %arg1, %c1_i32 : i32
    %1 = arith.addi %0, %arg2 : i32
    %c16_i32 = arith.constant 16 : i32
    %2 = arith.muli %1, %c16_i32 : i32
    %c1_i32_0 = arith.constant 1 : i32
    %3 = arith.subi %2, %c1_i32_0 : i32
    %c0_i32 = arith.constant 0 : i32
    %4 = arith.maxsi %3, %c0_i32 : i32
    %c0_i32_1 = arith.constant 0 : i32
    %c0_i32_2 = arith.constant 0 : i32
    %c0_i32_3 = arith.constant 0 : i32
    return %arg0, %4, %c0_i32_1, %c0_i32_2 : i32, i32, i32, i32
  }
  func.func @transform_2(%arg0: i32, %arg1: i32, %arg2: i32) -> (i32, i32, i32, i32) {
    %c1_i32 = arith.constant 1 : i32
    %0 = arith.muli %arg1, %c1_i32 : i32
    %1 = arith.addi %0, %arg2 : i32
    %c16_i32 = arith.constant 16 : i32
    %2 = arith.muli %1, %c16_i32 : i32
    %c16_i32_0 = arith.constant 16 : i32
    %3 = arith.addi %2, %c16_i32_0 : i32
    %c15_i32 = arith.constant 15 : i32
    %4 = arith.minsi %3, %c15_i32 : i32
    %c0_i32 = arith.constant 0 : i32
    %c0_i32_1 = arith.constant 0 : i32
    %c0_i32_2 = arith.constant 0 : i32
    return %arg0, %4, %c0_i32, %c0_i32_1 : i32, i32, i32, i32
  }
  func.func @transform_3(%arg0: i32, %arg1: i32, %arg2: i32) -> (i32, i32, i32) {
    %c0_i32 = arith.constant 0 : i32
    %c0_i32_0 = arith.constant 0 : i32
    %c0_i32_1 = arith.constant 0 : i32
    %c0_i32_2 = arith.constant 0 : i32
    return %c0_i32, %c0_i32_0, %c0_i32_1 : i32, i32, i32
  }
  func.func @transform_4(%arg0: i32, %arg1: i32, %arg2: i32) -> (i32, i32) {
    %c0_i32 = arith.constant 0 : i32
    %c0_i32_0 = arith.constant 0 : i32
    %c0_i32_1 = arith.constant 0 : i32
    return %c0_i32, %c0_i32_0 : i32, i32
  }
  func.func @transform_5(%arg0: i32, %arg1: i32, %arg2: i32) -> (i32, i32, i32, i32) {
    %c1_i32 = arith.constant 1 : i32
    %0 = arith.muli %arg1, %c1_i32 : i32
    %1 = arith.addi %0, %arg2 : i32
    %c0_i32 = arith.constant 0 : i32
    %c0_i32_0 = arith.constant 0 : i32
    %c0_i32_1 = arith.constant 0 : i32
    return %arg0, %1, %c0_i32, %c0_i32_0 : i32, i32, i32, i32
  }
  func.func @transform_6(%arg0: i32, %arg1: i32, %arg2: i32) -> (i32, i32, i32, i32) {
    %c0_i32 = arith.constant 0 : i32
    %c0_i32_0 = arith.constant 0 : i32
    %c0_i32_1 = arith.constant 0 : i32
    return %arg0, %arg1, %c0_i32, %c0_i32_0 : i32, i32, i32, i32
  }
  func.func @transform_7(%arg0: i32, %arg1: i32, %arg2: i32) -> (i32, i32, i32, i32) {
    %c0_i32 = arith.constant 0 : i32
    %c0_i32_0 = arith.constant 0 : i32
    %c0_i32_1 = arith.constant 0 : i32
    return %arg0, %arg1, %c0_i32, %c0_i32_0 : i32, i32, i32, i32
  }
}

module attributes {stable_mosaic.version = 11 : i64} {
  func.func @kernel(%arg0: i32, %arg1: i32, %arg2: i32, %arg3: memref<1x16x16x8xf32, #tpu.memory_space<vmem>>, %arg4: memref<1x1x16x8xf32, #tpu.memory_space<vmem>>, %arg5: memref<1x1x16x8xf32, #tpu.memory_space<vmem>>, %arg6: memref<3x24x8xf32, #tpu.memory_space<vmem>>, %arg7: memref<1x8xf32, #tpu.memory_space<vmem>>, %arg8: memref<1x8xf32, #tpu.memory_space<vmem>>, %arg9: memref<1x8xf32, #tpu.memory_space<vmem>>, %arg10: memref<1x16x16x8xf32, #tpu.memory_space<vmem>>, %arg11: memref<1x1x1x8xf32, #tpu.memory_space<vmem>>, %arg12: memref<1x1x1x8xf32, #tpu.memory_space<vmem>>) attributes {dimension_semantics = [#tpu.dimension_semantics<parallel>, #tpu.dimension_semantics<parallel>, #tpu.dimension_semantics<arbitrary>], iteration_bounds = array<i64: 2, 1, 1>, scalar_prefetch = 0 : i64, scratch_operands = 0 : i64, tpu.core_type = #tpu.core_type<tc>, window_params = [{transform_indices = @transform_0, window_bounds = array<i64: 1, 16, 16, 8>}, {transform_indices = @transform_1, window_bounds = array<i64: 1, 1, 16, 8>}, {transform_indices = @transform_2, window_bounds = array<i64: 1, 1, 16, 8>}, {pipeline_mode = #tpu.pipeline_mode<synchronous>, transform_indices = @transform_3, window_bounds = array<i64: 3, 24, 8>}, {pipeline_mode = #tpu.pipeline_mode<synchronous>, transform_indices = @transform_4, window_bounds = array<i64: 1, 8>}, {pipeline_mode = #tpu.pipeline_mode<synchronous>, transform_indices = @transform_5, window_bounds = array<i64: 1, 8>}, {pipeline_mode = #tpu.pipeline_mode<synchronous>, transform_indices = @transform_6, window_bounds = array<i64: 1, 8>}, {transform_indices = @transform_7, window_bounds = array<i64: 1, 16, 16, 8>}, {transform_indices = @transform_8, window_bounds = array<i64: 1, 1, 1, 8>}, {transform_indices = @transform_9, window_bounds = array<i64: 1, 1, 1, 8>}]} {
    %c1_i32 = arith.constant 1 : i32
    %0 = arith.muli %arg1, %c1_i32 : i32
    %1 = arith.addi %0, %arg2 : i32
    %c0 = arith.constant 0 : index
    %c0_0 = arith.constant 0 : index
    %c0_1 = arith.constant 0 : index
    %c0_2 = arith.constant 0 : index
    %2 = vector.load %arg3[%c0, %c0_0, %c0_1, %c0_2] : memref<1x16x16x8xf32, #tpu.memory_space<vmem>>, vector<1x16x16x8xf32>
    %3 = vector.shape_cast %2 : vector<1x16x16x8xf32> to vector<16x16x8xf32>
    %c0_3 = arith.constant 0 : index
    %c0_4 = arith.constant 0 : index
    %4 = vector.load %arg8[%c0_3, %c0_4] : memref<1x8xf32, #tpu.memory_space<vmem>>, vector<1x8xf32>
    %5 = vector.shape_cast %4 : vector<1x8xf32> to vector<1x1x8xf32>
    %6 = vector.broadcast %5 : vector<1x1x8xf32> to vector<16x16x8xf32>
    %7 = arith.mulf %3, %6 : vector<16x16x8xf32>
    %c0_5 = arith.constant 0 : index
    %c0_6 = arith.constant 0 : index
    %8 = vector.load %arg9[%c0_5, %c0_6] : memref<1x8xf32, #tpu.memory_space<vmem>>, vector<1x8xf32>
    %9 = vector.shape_cast %8 : vector<1x8xf32> to vector<1x1x8xf32>
    %10 = vector.broadcast %9 : vector<1x1x8xf32> to vector<16x16x8xf32>
    %11 = arith.addf %7, %10 : vector<16x16x8xf32>
    %cst = arith.constant 0.000000e+00 : f32
    %12 = vector.broadcast %cst : f32 to vector<16x16x8xf32>
    %13 = arith.maximumf %11, %12 : vector<16x16x8xf32>
    %c0_7 = arith.constant 0 : index
    %c0_8 = arith.constant 0 : index
    %c0_9 = arith.constant 0 : index
    %c0_10 = arith.constant 0 : index
    %14 = vector.load %arg4[%c0_7, %c0_8, %c0_9, %c0_10] : memref<1x1x16x8xf32, #tpu.memory_space<vmem>>, vector<1x1x16x8xf32>
    %15 = vector.shape_cast %14 : vector<1x1x16x8xf32> to vector<1x16x8xf32>
    %c0_11 = arith.constant 0 : index
    %c0_12 = arith.constant 0 : index
    %16 = vector.load %arg8[%c0_11, %c0_12] : memref<1x8xf32, #tpu.memory_space<vmem>>, vector<1x8xf32>
    %17 = vector.shape_cast %16 : vector<1x8xf32> to vector<1x1x8xf32>
    %18 = vector.broadcast %17 : vector<1x1x8xf32> to vector<1x16x8xf32>
    %19 = arith.mulf %15, %18 : vector<1x16x8xf32>
    %c0_13 = arith.constant 0 : index
    %c0_14 = arith.constant 0 : index
    %20 = vector.load %arg9[%c0_13, %c0_14] : memref<1x8xf32, #tpu.memory_space<vmem>>, vector<1x8xf32>
    %21 = vector.shape_cast %20 : vector<1x8xf32> to vector<1x1x8xf32>
    %22 = vector.broadcast %21 : vector<1x1x8xf32> to vector<1x16x8xf32>
    %23 = arith.addf %19, %22 : vector<1x16x8xf32>
    %cst_15 = arith.constant 0.000000e+00 : f32
    %24 = vector.broadcast %cst_15 : f32 to vector<1x16x8xf32>
    %25 = arith.maximumf %23, %24 : vector<1x16x8xf32>
    %c0_i32 = arith.constant 0 : i32
    %26 = arith.cmpi eq, %1, %c0_i32 : i32
    %cst_16 = arith.constant 0.000000e+00 : f32
    %cst_17 = arith.constant 1.000000e+00 : f32
    %27 = arith.select %26, %cst_16, %cst_17 : f32
    %28 = vector.broadcast %27 : f32 to vector<1x16x8xf32>
    %29 = arith.mulf %25, %28 : vector<1x16x8xf32>
    %c0_18 = arith.constant 0 : index
    %c0_19 = arith.constant 0 : index
    %c0_20 = arith.constant 0 : index
    %c0_21 = arith.constant 0 : index
    %30 = vector.load %arg5[%c0_18, %c0_19, %c0_20, %c0_21] : memref<1x1x16x8xf32, #tpu.memory_space<vmem>>, vector<1x1x16x8xf32>
    %31 = vector.shape_cast %30 : vector<1x1x16x8xf32> to vector<1x16x8xf32>
    %c0_22 = arith.constant 0 : index
    %c0_23 = arith.constant 0 : index
    %32 = vector.load %arg8[%c0_22, %c0_23] : memref<1x8xf32, #tpu.memory_space<vmem>>, vector<1x8xf32>
    %33 = vector.shape_cast %32 : vector<1x8xf32> to vector<1x1x8xf32>
    %34 = vector.broadcast %33 : vector<1x1x8xf32> to vector<1x16x8xf32>
    %35 = arith.mulf %31, %34 : vector<1x16x8xf32>
    %c0_24 = arith.constant 0 : index
    %c0_25 = arith.constant 0 : index
    %36 = vector.load %arg9[%c0_24, %c0_25] : memref<1x8xf32, #tpu.memory_space<vmem>>, vector<1x8xf32>
    %37 = vector.shape_cast %36 : vector<1x8xf32> to vector<1x1x8xf32>
    %38 = vector.broadcast %37 : vector<1x1x8xf32> to vector<1x16x8xf32>
    %39 = arith.addf %35, %38 : vector<1x16x8xf32>
    %cst_26 = arith.constant 0.000000e+00 : f32
    %40 = vector.broadcast %cst_26 : f32 to vector<1x16x8xf32>
    %41 = arith.maximumf %39, %40 : vector<1x16x8xf32>
    %c0_i32_27 = arith.constant 0 : i32
    %42 = arith.cmpi eq, %1, %c0_i32_27 : i32
    %cst_28 = arith.constant 0.000000e+00 : f32
    %cst_29 = arith.constant 1.000000e+00 : f32
    %43 = arith.select %42, %cst_28, %cst_29 : f32
    %44 = vector.broadcast %43 : f32 to vector<1x16x8xf32>
    %45 = arith.mulf %41, %44 : vector<1x16x8xf32>
    %46 = tpu.concatenate %29, %13, %45 in 0 : vector<1x16x8xf32>, vector<16x16x8xf32>, vector<1x16x8xf32> -> vector<18x16x8xf32>
    %47 = vector.extract_strided_slice %46 {offsets = [0, 0, 0], sizes = [16, 16, 8], strides = [1, 1, 1]} : vector<18x16x8xf32> to vector<16x16x8xf32>
    %48 = vector.extract_strided_slice %46 {offsets = [1, 0, 0], sizes = [16, 16, 8], strides = [1, 1, 1]} : vector<18x16x8xf32> to vector<16x16x8xf32>
    %49 = vector.extract_strided_slice %46 {offsets = [2, 0, 0], sizes = [16, 16, 8], strides = [1, 1, 1]} : vector<18x16x8xf32> to vector<16x16x8xf32>
    %50 = tpu.concatenate %47, %48, %49 in 2 : vector<16x16x8xf32>, vector<16x16x8xf32>, vector<16x16x8xf32> -> vector<16x16x24xf32>
    %cst_30 = arith.constant 0.000000e+00 : f32
    %51 = vector.broadcast %cst_30 : f32 to vector<16x1x24xf32>
    %52 = vector.extract_strided_slice %50 {offsets = [0, 0, 0], sizes = [16, 15, 24], strides = [1, 1, 1]} : vector<16x16x24xf32> to vector<16x15x24xf32>
    %53 = tpu.concatenate %51, %52 in 1 : vector<16x1x24xf32>, vector<16x15x24xf32> -> vector<16x16x24xf32>
    %54 = vector.extract_strided_slice %50 {offsets = [0, 1, 0], sizes = [16, 15, 24], strides = [1, 1, 1]} : vector<16x16x24xf32> to vector<16x15x24xf32>
    %55 = tpu.concatenate %54, %51 in 1 : vector<16x15x24xf32>, vector<16x1x24xf32> -> vector<16x16x24xf32>
    %56 = vector.shape_cast %53 : vector<16x16x24xf32> to vector<256x24xf32>
    %c0_31 = arith.constant 0 : index
    %c0_32 = arith.constant 0 : index
    %c0_33 = arith.constant 0 : index
    %57 = vector.load %arg6[%c0_31, %c0_32, %c0_33] : memref<3x24x8xf32, #tpu.memory_space<vmem>>, vector<1x24x8xf32>
    %58 = vector.shape_cast %57 : vector<1x24x8xf32> to vector<24x8xf32>
    %cst_34 = arith.constant dense<0.000000e+00> : vector<256x8xf32>
    %59 = tpu.matmul %56, %58, %cst_34 {dimension_numbers = #tpu.dot_dimension_numbers<[1], [0], [0], [1], [0, 0, 1, 1], [], []>} : vector<256x24xf32>, vector<24x8xf32>, vector<256x8xf32> -> vector<256x8xf32>
    %60 = vector.shape_cast %50 : vector<16x16x24xf32> to vector<256x24xf32>
    %c1 = arith.constant 1 : index
    %c0_35 = arith.constant 0 : index
    %c0_36 = arith.constant 0 : index
    %61 = vector.load %arg6[%c1, %c0_35, %c0_36] : memref<3x24x8xf32, #tpu.memory_space<vmem>>, vector<1x24x8xf32>
    %62 = vector.shape_cast %61 : vector<1x24x8xf32> to vector<24x8xf32>
    %cst_37 = arith.constant dense<0.000000e+00> : vector<256x8xf32>
    %63 = tpu.matmul %60, %62, %cst_37 {dimension_numbers = #tpu.dot_dimension_numbers<[1], [0], [0], [1], [0, 0, 1, 1], [], []>} : vector<256x24xf32>, vector<24x8xf32>, vector<256x8xf32> -> vector<256x8xf32>
    %64 = arith.addf %59, %63 : vector<256x8xf32>
    %65 = vector.shape_cast %55 : vector<16x16x24xf32> to vector<256x24xf32>
    %c2 = arith.constant 2 : index
    %c0_38 = arith.constant 0 : index
    %c0_39 = arith.constant 0 : index
    %66 = vector.load %arg6[%c2, %c0_38, %c0_39] : memref<3x24x8xf32, #tpu.memory_space<vmem>>, vector<1x24x8xf32>
    %67 = vector.shape_cast %66 : vector<1x24x8xf32> to vector<24x8xf32>
    %cst_40 = arith.constant dense<0.000000e+00> : vector<256x8xf32>
    %68 = tpu.matmul %65, %67, %cst_40 {dimension_numbers = #tpu.dot_dimension_numbers<[1], [0], [0], [1], [0, 0, 1, 1], [], []>} : vector<256x24xf32>, vector<24x8xf32>, vector<256x8xf32> -> vector<256x8xf32>
    %69 = arith.addf %64, %68 : vector<256x8xf32>
    %c0_41 = arith.constant 0 : index
    %c0_42 = arith.constant 0 : index
    %70 = vector.load %arg7[%c0_41, %c0_42] : memref<1x8xf32, #tpu.memory_space<vmem>>, vector<1x8xf32>
    %71 = vector.broadcast %70 : vector<1x8xf32> to vector<256x8xf32>
    %72 = arith.addf %69, %71 : vector<256x8xf32>
    %73 = vector.shape_cast %72 : vector<256x8xf32> to vector<16x16x8xf32>
    %c0_43 = arith.constant 0 : index
    %c0_44 = arith.constant 0 : index
    %c0_45 = arith.constant 0 : index
    %c0_46 = arith.constant 0 : index
    %74 = vector.load %arg10[%c0_43, %c0_44, %c0_45, %c0_46] : memref<1x16x16x8xf32, #tpu.memory_space<vmem>>, vector<1x16x16x8xf32>
    %75 = vector.shape_cast %74 : vector<1x16x16x8xf32> to vector<16x16x8xf32>
    %76 = vector.shape_cast %73 : vector<16x16x8xf32> to vector<1x16x16x8xf32>
    tpu.vector_store %arg10[%c0_43, %c0_44, %c0_45, %c0_46], %76 {strides = array<i32>} : memref<1x16x16x8xf32, #tpu.memory_space<vmem>>, vector<1x16x16x8xf32>,
    %c0_i32_47 = arith.constant 0 : i32
    %77 = arith.cmpi eq, %arg2, %c0_i32_47 : i32
    %78 = arith.extui %77 : i1 to i32
    %c0_i32_48 = arith.constant 0 : i32
    %79 = arith.cmpi ne, %78, %c0_i32_48 : i32
    scf.if %79 {
      %cst_67 = arith.constant 0.000000e+00 : f32
      %91 = vector.broadcast %cst_67 : f32 to vector<1x1x1x8xf32>
      %c0_68 = arith.constant 0 : index
      %c0_69 = arith.constant 0 : index
      %c0_70 = arith.constant 0 : index
      %c0_71 = arith.constant 0 : index
      %92 = vector.load %arg11[%c0_68, %c0_69, %c0_70, %c0_71] : memref<1x1x1x8xf32, #tpu.memory_space<vmem>>, vector<1x1x1x8xf32>
      tpu.vector_store %arg11[%c0_68, %c0_69, %c0_70, %c0_71], %91 {strides = array<i32>} : memref<1x1x1x8xf32, #tpu.memory_space<vmem>>, vector<1x1x1x8xf32>,
      %cst_72 = arith.constant 0.000000e+00 : f32
      %93 = vector.broadcast %cst_72 : f32 to vector<1x1x1x8xf32>
      %c0_73 = arith.constant 0 : index
      %c0_74 = arith.constant 0 : index
      %c0_75 = arith.constant 0 : index
      %c0_76 = arith.constant 0 : index
      %94 = vector.load %arg12[%c0_73, %c0_74, %c0_75, %c0_76] : memref<1x1x1x8xf32, #tpu.memory_space<vmem>>, vector<1x1x1x8xf32>
      tpu.vector_store %arg12[%c0_73, %c0_74, %c0_75, %c0_76], %93 {strides = array<i32>} : memref<1x1x1x8xf32, #tpu.memory_space<vmem>>, vector<1x1x1x8xf32>,
    } else {
    }
    %c0_49 = arith.constant 0 : index
    %c0_50 = arith.constant 0 : index
    %c0_51 = arith.constant 0 : index
    %c0_52 = arith.constant 0 : index
    %80 = vector.load %arg11[%c0_49, %c0_50, %c0_51, %c0_52] : memref<1x1x1x8xf32, #tpu.memory_space<vmem>>, vector<1x1x1x8xf32>
    %cst_53 = arith.constant dense<0.000000e+00> : vector<8xf32>
    %81 = vector.multi_reduction <add>, %72, %cst_53 [0] : vector<256x8xf32> to vector<8xf32>
    %82 = vector.shape_cast %81 : vector<8xf32> to vector<1x1x1x8xf32>
    %83 = arith.addf %80, %82 : vector<1x1x1x8xf32>
    %c0_54 = arith.constant 0 : index
    %c0_55 = arith.constant 0 : index
    %c0_56 = arith.constant 0 : index
    %c0_57 = arith.constant 0 : index
    %84 = vector.load %arg11[%c0_54, %c0_55, %c0_56, %c0_57] : memref<1x1x1x8xf32, #tpu.memory_space<vmem>>, vector<1x1x1x8xf32>
    tpu.vector_store %arg11[%c0_54, %c0_55, %c0_56, %c0_57], %83 {strides = array<i32>} : memref<1x1x1x8xf32, #tpu.memory_space<vmem>>, vector<1x1x1x8xf32>,
    %c0_58 = arith.constant 0 : index
    %c0_59 = arith.constant 0 : index
    %c0_60 = arith.constant 0 : index
    %c0_61 = arith.constant 0 : index
    %85 = vector.load %arg12[%c0_58, %c0_59, %c0_60, %c0_61] : memref<1x1x1x8xf32, #tpu.memory_space<vmem>>, vector<1x1x1x8xf32>
    %86 = arith.mulf %72, %72 : vector<256x8xf32>
    %cst_62 = arith.constant dense<0.000000e+00> : vector<8xf32>
    %87 = vector.multi_reduction <add>, %86, %cst_62 [0] : vector<256x8xf32> to vector<8xf32>
    %88 = vector.shape_cast %87 : vector<8xf32> to vector<1x1x1x8xf32>
    %89 = arith.addf %85, %88 : vector<1x1x1x8xf32>
    %c0_63 = arith.constant 0 : index
    %c0_64 = arith.constant 0 : index
    %c0_65 = arith.constant 0 : index
    %c0_66 = arith.constant 0 : index
    %90 = vector.load %arg12[%c0_63, %c0_64, %c0_65, %c0_66] : memref<1x1x1x8xf32, #tpu.memory_space<vmem>>, vector<1x1x1x8xf32>
    tpu.vector_store %arg12[%c0_63, %c0_64, %c0_65, %c0_66], %89 {strides = array<i32>} : memref<1x1x1x8xf32, #tpu.memory_space<vmem>>, vector<1x1x1x8xf32>,
    return
  }
  func.func @transform_0(%arg0: i32, %arg1: i32, %arg2: i32) -> (i32, i32, i32, i32) {
    %c1_i32 = arith.constant 1 : i32
    %0 = arith.muli %arg1, %c1_i32 : i32
    %1 = arith.addi %0, %arg2 : i32
    %c0_i32 = arith.constant 0 : i32
    %c0_i32_0 = arith.constant 0 : i32
    %c0_i32_1 = arith.constant 0 : i32
    return %arg0, %1, %c0_i32, %c0_i32_0 : i32, i32, i32, i32
  }
  func.func @transform_1(%arg0: i32, %arg1: i32, %arg2: i32) -> (i32, i32, i32, i32) {
    %c1_i32 = arith.constant 1 : i32
    %0 = arith.muli %arg1, %c1_i32 : i32
    %1 = arith.addi %0, %arg2 : i32
    %c16_i32 = arith.constant 16 : i32
    %2 = arith.muli %1, %c16_i32 : i32
    %c1_i32_0 = arith.constant 1 : i32
    %3 = arith.subi %2, %c1_i32_0 : i32
    %c0_i32 = arith.constant 0 : i32
    %4 = arith.maxsi %3, %c0_i32 : i32
    %c0_i32_1 = arith.constant 0 : i32
    %c0_i32_2 = arith.constant 0 : i32
    %c0_i32_3 = arith.constant 0 : i32
    return %arg0, %4, %c0_i32_1, %c0_i32_2 : i32, i32, i32, i32
  }
  func.func @transform_2(%arg0: i32, %arg1: i32, %arg2: i32) -> (i32, i32, i32, i32) {
    %c1_i32 = arith.constant 1 : i32
    %0 = arith.muli %arg1, %c1_i32 : i32
    %1 = arith.addi %0, %arg2 : i32
    %c16_i32 = arith.constant 16 : i32
    %2 = arith.muli %1, %c16_i32 : i32
    %c16_i32_0 = arith.constant 16 : i32
    %3 = arith.addi %2, %c16_i32_0 : i32
    %c15_i32 = arith.constant 15 : i32
    %4 = arith.minsi %3, %c15_i32 : i32
    %c0_i32 = arith.constant 0 : i32
    %c0_i32_1 = arith.constant 0 : i32
    %c0_i32_2 = arith.constant 0 : i32
    return %arg0, %4, %c0_i32, %c0_i32_1 : i32, i32, i32, i32
  }
  func.func @transform_3(%arg0: i32, %arg1: i32, %arg2: i32) -> (i32, i32, i32) {
    %c0_i32 = arith.constant 0 : i32
    %c0_i32_0 = arith.constant 0 : i32
    %c0_i32_1 = arith.constant 0 : i32
    %c0_i32_2 = arith.constant 0 : i32
    return %c0_i32, %c0_i32_0, %c0_i32_1 : i32, i32, i32
  }
  func.func @transform_4(%arg0: i32, %arg1: i32, %arg2: i32) -> (i32, i32) {
    %c0_i32 = arith.constant 0 : i32
    %c0_i32_0 = arith.constant 0 : i32
    %c0_i32_1 = arith.constant 0 : i32
    return %c0_i32, %c0_i32_0 : i32, i32
  }
  func.func @transform_5(%arg0: i32, %arg1: i32, %arg2: i32) -> (i32, i32) {
    %c0_i32 = arith.constant 0 : i32
    %c0_i32_0 = arith.constant 0 : i32
    %c0_i32_1 = arith.constant 0 : i32
    return %c0_i32, %c0_i32_0 : i32, i32
  }
  func.func @transform_6(%arg0: i32, %arg1: i32, %arg2: i32) -> (i32, i32) {
    %c0_i32 = arith.constant 0 : i32
    %c0_i32_0 = arith.constant 0 : i32
    %c0_i32_1 = arith.constant 0 : i32
    return %c0_i32, %c0_i32_0 : i32, i32
  }
  func.func @transform_7(%arg0: i32, %arg1: i32, %arg2: i32) -> (i32, i32, i32, i32) {
    %c1_i32 = arith.constant 1 : i32
    %0 = arith.muli %arg1, %c1_i32 : i32
    %1 = arith.addi %0, %arg2 : i32
    %c0_i32 = arith.constant 0 : i32
    %c0_i32_0 = arith.constant 0 : i32
    %c0_i32_1 = arith.constant 0 : i32
    return %arg0, %1, %c0_i32, %c0_i32_0 : i32, i32, i32, i32
  }
  func.func @transform_8(%arg0: i32, %arg1: i32, %arg2: i32) -> (i32, i32, i32, i32) {
    %c0_i32 = arith.constant 0 : i32
    %c0_i32_0 = arith.constant 0 : i32
    %c0_i32_1 = arith.constant 0 : i32
    return %arg0, %arg1, %c0_i32, %c0_i32_0 : i32, i32, i32, i32
  }
  func.func @transform_9(%arg0: i32, %arg1: i32, %arg2: i32) -> (i32, i32, i32, i32) {
    %c0_i32 = arith.constant 0 : i32
    %c0_i32_0 = arith.constant 0 : i32
    %c0_i32_1 = arith.constant 0 : i32
    return %arg0, %arg1, %c0_i32, %c0_i32_0 : i32, i32, i32, i32
  }
}

module attributes {stable_mosaic.version = 11 : i64} {
  func.func @_bn_relu_kernel(%arg0: i32, %arg1: memref<32x128xf32, #tpu.memory_space<vmem>>, %arg2: memref<1x128xf32, #tpu.memory_space<vmem>>, %arg3: memref<1x128xf32, #tpu.memory_space<vmem>>, %arg4: memref<32x128xf32, #tpu.memory_space<vmem>>) attributes {dimension_semantics = [#tpu.dimension_semantics<parallel>], iteration_bounds = array<i64: 1>, scalar_prefetch = 0 : i64, scratch_operands = 0 : i64, tpu.core_type = #tpu.core_type<tc>, window_params = [{transform_indices = @transform_0, window_bounds = array<i64: 32, 128>}, {pipeline_mode = #tpu.pipeline_mode<synchronous>, transform_indices = @transform_1, window_bounds = array<i64: 1, 128>}, {pipeline_mode = #tpu.pipeline_mode<synchronous>, transform_indices = @transform_2, window_bounds = array<i64: 1, 128>}, {transform_indices = @transform_3, window_bounds = array<i64: 32, 128>}]} {
    %c0 = arith.constant 0 : index
    %c0_0 = arith.constant 0 : index
    %0 = vector.load %arg1[%c0, %c0_0] : memref<32x128xf32, #tpu.memory_space<vmem>>, vector<32x128xf32>
    %c0_1 = arith.constant 0 : index
    %c0_2 = arith.constant 0 : index
    %1 = vector.load %arg2[%c0_1, %c0_2] : memref<1x128xf32, #tpu.memory_space<vmem>>, vector<1x128xf32>
    %2 = vector.broadcast %1 : vector<1x128xf32> to vector<32x128xf32>
    %3 = arith.mulf %0, %2 : vector<32x128xf32>
    %c0_3 = arith.constant 0 : index
    %c0_4 = arith.constant 0 : index
    %4 = vector.load %arg3[%c0_3, %c0_4] : memref<1x128xf32, #tpu.memory_space<vmem>>, vector<1x128xf32>
    %5 = vector.broadcast %4 : vector<1x128xf32> to vector<32x128xf32>
    %6 = arith.addf %3, %5 : vector<32x128xf32>
    %cst = arith.constant 0.000000e+00 : f32
    %7 = vector.broadcast %cst : f32 to vector<32x128xf32>
    %8 = arith.maximumf %6, %7 : vector<32x128xf32>
    %c0_5 = arith.constant 0 : index
    %c0_6 = arith.constant 0 : index
    %9 = vector.load %arg4[%c0_5, %c0_6] : memref<32x128xf32, #tpu.memory_space<vmem>>, vector<32x128xf32>
    tpu.vector_store %arg4[%c0_5, %c0_6], %8 {strides = array<i32>} : memref<32x128xf32, #tpu.memory_space<vmem>>, vector<32x128xf32>,
    return
  }
  func.func @transform_0(%arg0: i32) -> (i32, i32) {
    %c0_i32 = arith.constant 0 : i32
    %c0_i32_0 = arith.constant 0 : i32
    return %arg0, %c0_i32 : i32, i32
  }
  func.func @transform_1(%arg0: i32) -> (i32, i32) {
    %c0_i32 = arith.constant 0 : i32
    %c0_i32_0 = arith.constant 0 : i32
    %c0_i32_1 = arith.constant 0 : i32
    return %c0_i32, %c0_i32_0 : i32, i32
  }
  func.func @transform_2(%arg0: i32) -> (i32, i32) {
    %c0_i32 = arith.constant 0 : i32
    %c0_i32_0 = arith.constant 0 : i32
    %c0_i32_1 = arith.constant 0 : i32
    return %c0_i32, %c0_i32_0 : i32, i32
  }
  func.func @transform_3(%arg0: i32) -> (i32, i32) {
    %c0_i32 = arith.constant 0 : i32
    %c0_i32_0 = arith.constant 0 : i32
    return %arg0, %c0_i32 : i32, i32
  }
}

</mosaic_0001>

<bundles_post_ra>
// kernel: tile.13
= control target key start
LH: loop header
LB: loop body
LE: loop exit
PB: predicated region body
PF: predicated region fallthrough
CT: control target
= control target key end

     0   :  { %s28_s0 = inlined_call_operand.vmem [shape: f32[8], index: 0, kind: input, shape index: {}]   ;;  %s29_s1 = inlined_call_operand.vmem [shape: f32[16,8], index: 1, kind: output, shape index: {}]  }
   0x1   :  { %v4_v0 = vld [vmem:[%s28_s0] ss:$0 sm:$0xff] }
   0x2   :  { %5 = vst [vmem:[%s29_s1] sm:$0xff] %v4_v0  ;;  %8 = vst [vmem:[%s29_s1 + $0x8] sm:$0xff] %v4_v0 }

// kernel: tile.14
= control target key start
LH: loop header
LB: loop body
LE: loop exit
PB: predicated region body
PF: predicated region fallthrough
CT: control target
= control target key end

     0   :  { %s131_s10 = smov 120   ;;  %s132_s11 = smov 104   ;;  %vm3_vm0 = vcmask 64512   ;;  %vm9_vm1 = vcmask 1048512   ;;  %vm15_vm2 = vcmask 982912   ;;  %vm21_vm3 = vcmask 917312   ;;  %s207_s0 = inlined_call_operand.vmem [shape: f32[16,8], index: 0, kind: input, shape index: {}]   ;;  %s208_s1 = inlined_call_operand.vmem [shape: f32[1,128], index: 1, kind: output, shape index: {}]  }
   0x1   :  { %v101_v0 = vld [vmem:[%s207_s0 + $0xf] sm:$0x1]   ;;  %v103_v1 = vld [vmem:[%s207_s0 + $0xd] sm:$0x1]   ;;  %v102_v2 = vld [vmem:[%s207_s0 + $0xe] sm:$0x1]  }
   0x2   :  { %7 = vrot.lane.b32.xlu0 %v101_v0, %s131_s10  ;;  %19 = vrot.lane.b32.xlu1 %v103_v1, %s132_s11  ;;  %v104_v3 = vld [vmem:[%s207_s0 + $0xc] sm:$0x1]   ;;  %s133_s16 = smov 112   ;;  %s134_s17 = smov 96   ;;  %v105_v4 = vld [vmem:[%s207_s0 + $0xb] sm:$0x1]  }
   0x3   :  { %v106_v5 = vld [vmem:[%s207_s0 + $0xa] sm:$0x1]   ;;  %v2_v6 = vld [vmem:[%s207_s0] sm:$0x1]   ;;  %s135_s24 = smov 88   ;;  %s136_s25 = smov 80  }
   0x4   :  { %4 = vst.msk [vmem:[#allocation0] sm:$0x1] %vm3_vm0, %v2_v6   ;;  %v107_v7 = vld [vmem:[%s207_s0 + $0x9] sm:$0x1]   ;;  %v108_v8 = vld [vmem:[%s207_s0 + $0x8] sm:$0x1]  }
   0x5   :  { %s137_s30 = smov 72   ;;  %s138_s2 = smov 64   ;;  %v109_v9 = vld [vmem:[%s207_s0 + $0x7] sm:$0x1]   ;;  %v110_v10 = vld [vmem:[%s207_s0 + $0x6] sm:$0x1]  }
   0x6   :  { %13 = vrot.lane.b32.xlu0 %v102_v2, %s133_s16  ;;  %25 = vrot.lane.b32.xlu1 %v104_v3, %s134_s17  ;;  %s139_s7 = smov 56   ;;  %s140_s8 = smov 48   ;;  %v111_v11 = vld [vmem:[%s207_s0 + $0x5] sm:$0x1]   ;;  %v112_v12 = vld [vmem:[%s207_s0 + $0x4] sm:$0x1]  }
   0x7   :  { %s141_s13 = smov 40   ;;  %s142_s14 = smov 32   ;;  %v113_v13 = vld [vmem:[%s207_s0 + $0x3] sm:$0x1]   ;;  %v114_v14 = vld [vmem:[%s207_s0 + $0x2] sm:$0x1]  }
   0x8   :  { %s143_s19 = smov 24   ;;  %s144_s20 = smov 16   ;;  %v115_v15 = vld [vmem:[%s207_s0 + $0x1] sm:$0x1]   ;;  %vm27_vm4 = vcmask 851712   ;;  %vm33_vm5 = vcmask 786112  }
   0x9   :  { %s145_s0 = smov 8   ;;  %vm39_vm6 = vcmask 720512   ;;  %vm45_vm7 = vcmask 654912   ;;  %vm51_vm8 = vcmask 589312   ;;  %vm57_vm9 = vcmask 523712  }
   0xa   :  { %31 = vrot.lane.b32.xlu0 %v105_v4, %s135_s24  ;;  %37 = vrot.lane.b32.xlu1 %v106_v5, %s136_s25  ;;  %vm63_vm10 = vcmask 458112   ;;  %vm69_vm11 = vcmask 392512   ;;  %vm75_vm12 = vcmask 326912   ;;  %vm81_vm13 = vcmask 261312  }
   0xb   :  { %vm87_vm14 = vcmask 195712   ;;  %vm93_vm15 = vcmask 130112  }
   0xe   :  { %43 = vrot.lane.b32.xlu0 %v107_v7, %s137_s30  ;;  %49 = vrot.lane.b32.xlu1 %v108_v8, %s138_s2 }
  0x12   :  { %55 = vrot.lane.b32.xlu0 %v109_v9, %s139_s7  ;;  %61 = vrot.lane.b32.xlu1 %v110_v10, %s140_s8 }
  0x16   :  { %67 = vrot.lane.b32.xlu0 %v111_v11, %s141_s13  ;;  %73 = vrot.lane.b32.xlu1 %v112_v12, %s142_s14 }
  0x1a   :  { %79 = vrot.lane.b32.xlu0 %v113_v13, %s143_s19  ;;  %85 = vrot.lane.b32.xlu1 %v114_v14, %s144_s20 }
  0x1e   :  { %91 = vrot.lane.b32.xlu0 %v115_v15, %s145_s0 }
  0x74   :  { %v8_v16 = vpop.permute.xlu0 %7   ;;  %v20_v17 = vpop.permute.xlu1 %19  }
  0x75   :  { %10 = vst.msk [vmem:[#allocation0] sm:$0x1] %vm9_vm1, %v8_v16  }
  0x78   :  { %v14_v18 = vpop.permute.xlu0 %13   ;;  %v26_v19 = vpop.permute.xlu1 %25  }
  0x79   :  { %16 = vst.msk [vmem:[#allocation0] sm:$0x1] %vm15_vm2, %v14_v18  }
  0x7a   :  { %22 = vst.msk [vmem:[#allocation0] sm:$0x1] %vm21_vm3, %v20_v17  }
  0x7b   :  { %28 = vst.msk [vmem:[#allocation0] sm:$0x1] %vm27_vm4, %v26_v19  }
  0x7c   :  { %v32_v20 = vpop.permute.xlu0 %31   ;;  %v38_v21 = vpop.permute.xlu1 %37  }
  0x7d   :  { %34 = vst.msk [vmem:[#allocation0] sm:$0x1] %vm33_vm5, %v32_v20  }
  0x7e   :  { %40 = vst.msk [vmem:[#allocation0] sm:$0x1] %vm39_vm6, %v38_v21  }
  0x80   :  { %v44_v22 = vpop.permute.xlu0 %43   ;;  %v50_v23 = vpop.permute.xlu1 %49  }
  0x81   :  { %46 = vst.msk [vmem:[#allocation0] sm:$0x1] %vm45_vm7, %v44_v22  }
  0x82   :  { %52 = vst.msk [vmem:[#allocation0] sm:$0x1] %vm51_vm8, %v50_v23  }
  0x84   :  { %v56_v24 = vpop.permute.xlu0 %55   ;;  %v62_v25 = vpop.permute.xlu1 %61  }
  0x85   :  { %58 = vst.msk [vmem:[#allocation0] sm:$0x1] %vm57_vm9, %v56_v24  }
  0x86   :  { %64 = vst.msk [vmem:[#allocation0] sm:$0x1] %vm63_vm10, %v62_v25  }
  0x88   :  { %v68_v26 = vpop.permute.xlu0 %67   ;;  %v74_v27 = vpop.permute.xlu1 %73  }
  0x89   :  { %70 = vst.msk [vmem:[#allocation0] sm:$0x1] %vm69_vm11, %v68_v26  }
  0x8a   :  { %76 = vst.msk [vmem:[#allocation0] sm:$0x1] %vm75_vm12, %v74_v27  }
  0x8c   :  { %v80_v28 = vpop.permute.xlu0 %79   ;;  %v86_v29 = vpop.permute.xlu1 %85  }
  0x8d   :  { %82 = vst.msk [vmem:[#allocation0] sm:$0x1] %vm81_vm13, %v80_v28  }
  0x8e   :  { %88 = vst.msk [vmem:[#allocation0] sm:$0x1] %vm87_vm14, %v86_v29  }
  0x90   :  { %v92_v30 = vpop.permute.xlu0 %91  }
  0x91   :  { %94 = vst.msk [vmem:[#allocation0] sm:$0x1] %vm93_vm15, %v92_v30  }
  0x98   :  { %v98_v31 = vld [vmem:[#allocation0] sm:$0x1] }
  0x99   :  { %100 = vst [vmem:[%s208_s1] sm:$0x1] %v98_v31 }

// kernel: double_conv.5
= control target key start
LH: loop header
LB: loop body
LE: loop exit
PB: predicated region body
PF: predicated region fallthrough
CT: control target
= control target key end

     0   :  { %s104_s0 = inlined_call_operand.vmem [shape: f32[32,128], index: 0, kind: input, shape index: {}]   ;;  %s105_s1 = inlined_call_operand.vmem [shape: f32[1,128], index: 1, kind: input, shape index: {}]   ;;  %s106_s2 = inlined_call_operand.vmem [shape: f32[1,128], index: 2, kind: input, shape index: {}]   ;;  %s107_s3 = inlined_call_operand.vmem [shape: f32[32,128], index: 3, kind: output, shape index: {}]  }
   0x1   :  { %v14_v0 = vld [vmem:[%s104_s0] sm:$0xff]  ;;  %v15_v4 = vld [vmem:[%s104_s0 + $0x8] sm:$0xff]  ;;  %v16_v5 = vld [vmem:[%s104_s0 + $0x10] sm:$0xff] }
   0x2   :  { %v52_v1 = vld [vmem:[%s105_s1] ss:$0 sm:$0xff]  ;;  %v17_v6 = vld [vmem:[%s104_s0 + $0x18] sm:$0xff] }
   0x3   :  { %v53_v2 = vld [vmem:[%s106_s2] ss:$0 sm:$0xff]  ;;  %v25_v3 = vmul.f32 %v52_v1, %v14_v0  ;;  %v26_v7 = vmul.f32 %v52_v1, %v15_v4  ;;  %v27_v8 = vmul.f32 %v52_v1, %v16_v5  ;;  %v28_v9 = vmul.f32 %v52_v1, %v17_v6 }
   0x5   :  { %v36_v10 = vadd.f32 %v53_v2, %v25_v3  ;;  %v37_v11 = vadd.f32 %v53_v2, %v26_v7  ;;  %v38_v12 = vadd.f32 %v53_v2, %v27_v8  ;;  %v39_v13 = vadd.f32 %v53_v2, %v28_v9 }
   0x7   :  { %v40_v14 = vmax.f32 %v36_v10, 0.0  ;;  %v41_v15 = vmax.f32 %v37_v11, 0.0  ;;  %v42_v16 = vmax.f32 %v38_v12, 0.0  ;;  %v43_v17 = vmax.f32 %v39_v13, 0.0 }
   0x9   :  { %44 = vst [vmem:[%s107_s3] sm:$0xff] %v40_v14  ;;  %45 = vst [vmem:[%s107_s3 + $0x8] sm:$0xff] %v41_v15 }
   0xa   :  { %46 = vst [vmem:[%s107_s3 + $0x10] sm:$0xff] %v42_v16  ;;  %47 = vst [vmem:[%s107_s3 + $0x18] sm:$0xff] %v43_v17 }

// kernel: double_conv.3
= control target key start
LH: loop header
LB: loop body
LE: loop exit
PB: predicated region body
PF: predicated region fallthrough
CT: control target
= control target key end

     0   :  { %s3025_s24 = smov 0   ;;  %s3027_s25 = smov 0   ;;  %s3984_s0 = inlined_call_operand.vmem [shape: f32[2,16,16,4], index: 0, kind: input, shape index: {}, may-alias: {0,1,2}]   ;;  %s3985_s1 = inlined_call_operand.vmem [shape: f32[2,16,16,4], index: 1, kind: input, shape index: {}, may-alias: {0,1,2}]   ;;  %s3986_s2 = inlined_call_operand.vmem [shape: f32[2,16,16,4], index: 2, kind: input, shape index: {}, may-alias: {0,1,2}]   ;;  %s3987_s3 = inlined_call_operand.vmem [shape: f32[3,12,8], index: 3, kind: input, shape index: {}]   ;;  %s3988_s4 = inlined_call_operand.vmem [shape: f32[1,8], index: 4, kind: input, shape index: {}]   ;;  %s3989_s5 = inlined_call_operand.vmem [shape: f32[2,16,16,8], index: 5, kind: output, shape index: {0}]   ;;  %s3990_s6 = inlined_call_operand.vmem [shape: f32[2,1,1,8], index: 6, kind: output, shape index: {1}]   ;;  %s3991_s7 = inlined_call_operand.vmem [shape: f32[2,1,1,8], index: 7, kind: output, shape index: {2}]  }
   0x1   :  { %s3029_s26 = smov 0  }
   0x2 LB: > { %s37_s27 = sadd.s32 1, %s2975_s25  ;;  %p2466_p0 = scmp.ge.s32.totalorder %s2979_s26, 1  ;;  %s2979_s26 = sphi %s3029_s26, %s18_s26   ;;  %s2975_s25 = sphi %s3027_s25, %s3995_s25   ;;  %s2971_s24 = sphi %s3025_s24, %s3994_s24  }
   0x3   : > { %p39_p1 = scmp.ge.s32.totalorder %s37_s27, 2  ;;  %p353_p2 = scmp.lt.s32.totalorder %s2979_s26, 3 }
   0x5   : > { %s3997_s27 = smov (%p39_p1, %s37_s27), 0  ;;  %p354_p3 = pnand %p2466_p0, %p353_p2 }
   0x6   : > { %p439_p4 = scmp.lt.s32.totalorder (!%p354_p3), %s2971_s24, 1  ;;  %v2475_v0 = vld [vmem:[%s3987_s3 + $0x10] sm:$0xff] (!%p354_p3)  ;;  %v2476_v1 = vld [vmem:[%s3987_s3 + $0x18] sm:$0xf] (!%p354_p3)  ;;  %vm1113_vm0 = vcmask (!%p354_p3), 1043456   ;;  %v1043_v3 = vld [vmem:[%s3987_s3] sm:$0xff] (!%p354_p3) }
   0x7   : > { %357 = sbr.rel (%p354_p3) target bundleno = 530 (0x212), region = 40  ;;  %v2845_v2 = vpack.c.bf16 (!%p354_p3), %v2476_v1, %v2475_v0  ;;  %vm2981_vm1 = vmmov (!%p354_p3), 1   ;;  %v1044_v5 = vld [vmem:[%s3987_s3 + $0x8] sm:$0xf] (!%p354_p3)  ;;  %s2982_s17 = smov (!%p354_p3), 8   ;;  %v2543_v23 = vld [vmem:[%s3987_s3 + $0x20] sm:$0xff] (!%p354_p3) }
   0x8   : > { %vm3054_vm2 = vmpackc.low (!%p354_p3), %vm1113_vm0, %vm2981_vm1  ;;  %v3063_v6 = vpack.c.bf16 (!%p354_p3), %v1044_v5, %v1043_v3  ;;  %s2983_s18 = smov (!%p354_p3), 4   ;;  %v2544_v24 = vld [vmem:[%s3987_s3 + $0x28] sm:$0xf] (!%p354_p3)  ;;  %vm783_vm3 = vcmask (!%p354_p3), 31744   ;;  %vm816_vm4 = vcmask (!%p354_p3), 64512   ;;  %vm1048_vm5 = vcmask (!%p354_p3), 97280  }
   0x9   : > { %2847 = vmatprep.subr.msk.bf16.mxu1 (!%p354_p3), %vm3054_vm2, %v2845_v2  ;;  %v3191_v25 = vpack.c.bf16 (!%p354_p3), %v2544_v24, %v2543_v23  ;;  %vm881_vm6 = vcmask (!%p354_p3), 1040384   ;;  %vm962_vm7 = vcmask (!%p354_p3), 1046528   ;;  %vm2068_vm8 = vcmask (!%p354_p3), 57344  }
   0xa   : > { %2850 = vmatpush3.bf16.msk.msra.mxu1 (!%p354_p3), %vm3054_vm2, %v2845_v2  ;;  %2853 = vmatprep.subr.msk.bf16.mxu0 (!%p354_p3), %vm3054_vm2, %v3063_v6 }
   0xb   : > { %2863 = vmatprep.subr.msk.bf16.mxu1 (!%p354_p3), %vm3054_vm2, %v3063_v6  ;;  %2856 = vmatpush3.bf16.msk.msra.mxu0 (!%p354_p3), %vm3054_vm2, %v3063_v6 }
   0xc   : > { %2859 = vmatprep.subr.msk.bf16.mxu0 (!%p354_p3), %vm3054_vm2, %v3191_v25 }
   0xe   : > { %s3999_s24 = smov (!%p439_p4, %s2971_s24), 1 }
   0xf   : > { %s3066_s13 = sshll.u32 %s3999_s24, 8  ;;  %s3736_s14 = scalar_lea.vmem %s3990_s6, %s3999_s24 }
  0x10   : > { %s3074_s16 = scalar_lea.vmem %s3984_s0, %s3066_s13  ;;  %s463_s29 = scalar_lea.vmem %s3985_s1, %s3066_s13 }
  0x11   : > { %v3083_v7 = vld [vmem:[%s3074_s16 + $0x10] sm:$0xff]  ;;  %v3086_v8 = vld [vmem:[%s3074_s16] sm:$0xff]  ;;  %v3096_v9 = vld [vmem:[%s3074_s16 + $0x18] sm:$0xff]  ;;  %s2584_s30 = sadd.s32 240, %s3066_s13  ;;  %s3773_s21 = scalar_lea.vmem %s3989_s5, %s3066_s13 }
  0x12   : > { %687 = vrot.lane.b32.xlu1 %v3083_v7, %s2982_s17  ;;  %589 = vrot.lane.b32.xlu0 %v3086_v8, %s2983_s18  ;;  %v3099_v10 = vld [vmem:[%s3074_s16 + $0x8] sm:$0xff]  ;;  %v3113_v12 = vld [vmem:[%s3074_s16 + $0x20] sm:$0xff]  ;;  %s482_s10 = scalar_lea.vmem %s3986_s2, %s2584_s30 }
  0x13   : > { %v3110_v11 = vld [vmem:[%s3074_s16 + $0x28] sm:$0xff]  ;;  %v3124_v13 = vld [vmem:[%s3074_s16 + $0x38] sm:$0xff]  ;;  %v3127_v14 = vld [vmem:[%s3074_s16 + $0x30] sm:$0xff] }
  0x14   : > { %v3138_v15 = vld [vmem:[%s3074_s16 + $0x48] sm:$0xff]  ;;  %v3141_v16 = vld [vmem:[%s3074_s16 + $0x40] sm:$0xff]  ;;  %v3152_v17 = vld [vmem:[%s3074_s16 + $0x58] sm:$0xff] }
  0x15   : > { %v3155_v18 = vld [vmem:[%s3074_s16 + $0x50] sm:$0xff]  ;;  %v3166_v19 = vld [vmem:[%s3074_s16 + $0x68] sm:$0xff]  ;;  %v3169_v20 = vld [vmem:[%s3074_s16 + $0x60] sm:$0xff] }
  0x16   : > { %689 = vrot.lane.b32.xlu1 %v3096_v9, %s2982_s17  ;;  %591 = vrot.lane.b32.xlu0 %v3099_v10, %s2983_s18  ;;  %v3180_v21 = vld [vmem:[%s3074_s16 + $0x78] sm:$0xff]  ;;  %v3183_v22 = vld [vmem:[%s3074_s16 + $0x70] sm:$0xff] }
  0x17   : > { %v3205_v26 = vld [vmem:[%s3074_s16 + $0x88] sm:$0xff]  ;;  %v3208_v27 = vld [vmem:[%s3074_s16 + $0x80] sm:$0xff]  ;;  %v3219_v28 = vld [vmem:[%s3074_s16 + $0x98] sm:$0xff] }
  0x18   : > { %v3222_v29 = vld [vmem:[%s3074_s16 + $0x90] sm:$0xff]  ;;  %v3233_v30 = vld [vmem:[%s3074_s16 + $0xa8] sm:$0xff]  ;;  %v3236_v31 = vld [vmem:[%s3074_s16 + $0xa0] sm:$0xff] }
  0x19   : > { %v3247_v32 = vld [vmem:[%s3074_s16 + $0xb8] sm:$0xff]  ;;  %v3250_v33 = vld [vmem:[%s3074_s16 + $0xb0] sm:$0xff]  ;;  %v3261_v34 = vld [vmem:[%s3074_s16 + $0xc8] sm:$0xff] }
  0x1a   : > { %595 = vrot.lane.b32.xlu1 %v3096_v9, %s2983_s18  ;;  %593 = vrot.lane.b32.xlu0 %v3083_v7, %s2983_s18  ;;  %v3264_v35 = vld [vmem:[%s3074_s16 + $0xc0] sm:$0xff]  ;;  %v3275_v36 = vld [vmem:[%s3074_s16 + $0xd8] sm:$0xff] }
  0x1b   : > { %v3278_v37 = vld [vmem:[%s3074_s16 + $0xd0] sm:$0xff]  ;;  %v3289_v38 = vld [vmem:[%s3074_s16 + $0xe8] sm:$0xff]  ;;  %v3292_v39 = vld [vmem:[%s3074_s16 + $0xe0] sm:$0xff] }
  0x1c   : > { %v546_v40 = vld [vmem:[%s463_s29] sm:$0xff]  ;;  %v547_v42 = vld [vmem:[%s463_s29 + $0x8] sm:$0xff]  ;;  %v545_v43 = vld [vmem:[%s3074_s16 + $0xf8] sm:$0xff] }
  0x1d   : > { %v551_v41 = vmul.f32 0.0, %v546_v40  ;;  %v544_v44 = vld [vmem:[%s3074_s16 + $0xf0] sm:$0xff]  ;;  %v552_v48 = vmul.f32 0.0, %v547_v42  ;;  %v554_v51 = vld [vmem:[%s482_s10 + $0x8] sm:$0xff]  ;;  %v553_v52 = vld [vmem:[%s482_s10] sm:$0xff] }
  0x1e   : > { %693 = vrot.lane.b32.xlu1 %v3110_v11, %s2982_s17  ;;  %691 = vrot.lane.b32.xlu0 %v3113_v12, %s2982_s17  ;;  %v556_v58 = vmul.f32 0.0, %v554_v51  ;;  %v555_v59 = vmul.f32 0.0, %v553_v52 }
  0x22   : > { %599 = vrot.lane.b32.xlu1 %v3110_v11, %s2983_s18  ;;  %597 = vrot.lane.b32.xlu0 %v3113_v12, %s2983_s18 }
  0x26   : > { %697 = vrot.lane.b32.xlu1 %v3124_v13, %s2982_s17  ;;  %695 = vrot.lane.b32.xlu0 %v3127_v14, %s2982_s17 }
  0x2a   : > { %603 = vrot.lane.b32.xlu1 %v3124_v13, %s2983_s18  ;;  %601 = vrot.lane.b32.xlu0 %v3127_v14, %s2983_s18 }
  0x2e   : > { %701 = vrot.lane.b32.xlu1 %v3138_v15, %s2982_s17  ;;  %699 = vrot.lane.b32.xlu0 %v3141_v16, %s2982_s17 }
  0x32   : > { %607 = vrot.lane.b32.xlu1 %v3138_v15, %s2983_s18  ;;  %605 = vrot.lane.b32.xlu0 %v3141_v16, %s2983_s18 }
  0x36   : > { %705 = vrot.lane.b32.xlu1 %v3152_v17, %s2982_s17  ;;  %703 = vrot.lane.b32.xlu0 %v3155_v18, %s2982_s17 }
  0x3a   : > { %611 = vrot.lane.b32.xlu1 %v3152_v17, %s2983_s18  ;;  %609 = vrot.lane.b32.xlu0 %v3155_v18, %s2983_s18 }
  0x3e   : > { %709 = vrot.lane.b32.xlu1 %v3166_v19, %s2982_s17  ;;  %707 = vrot.lane.b32.xlu0 %v3169_v20, %s2982_s17 }
  0x42   : > { %615 = vrot.lane.b32.xlu1 %v3166_v19, %s2983_s18  ;;  %613 = vrot.lane.b32.xlu0 %v3169_v20, %s2983_s18 }
  0x46   : > { %713 = vrot.lane.b32.xlu1 %v3180_v21, %s2982_s17  ;;  %711 = vrot.lane.b32.xlu0 %v3183_v22, %s2982_s17 }
  0x4a   : > { %619 = vrot.lane.b32.xlu1 %v3180_v21, %s2983_s18  ;;  %617 = vrot.lane.b32.xlu0 %v3183_v22, %s2983_s18 }
  0x4e   : > { %717 = vrot.lane.b32.xlu1 %v3205_v26, %s2982_s17  ;;  %715 = vrot.lane.b32.xlu0 %v3208_v27, %s2982_s17 }
  0x52   : > { %623 = vrot.lane.b32.xlu1 %v3205_v26, %s2983_s18  ;;  %621 = vrot.lane.b32.xlu0 %v3208_v27, %s2983_s18 }
  0x56   : > { %721 = vrot.lane.b32.xlu1 %v3219_v28, %s2982_s17  ;;  %719 = vrot.lane.b32.xlu0 %v3222_v29, %s2982_s17 }
  0x5a   : > { %627 = vrot.lane.b32.xlu1 %v3219_v28, %s2983_s18  ;;  %625 = vrot.lane.b32.xlu0 %v3222_v29, %s2983_s18 }
  0x5e   : > { %725 = vrot.lane.b32.xlu1 %v3233_v30, %s2982_s17  ;;  %723 = vrot.lane.b32.xlu0 %v3236_v31, %s2982_s17 }
  0x62   : > { %631 = vrot.lane.b32.xlu1 %v3233_v30, %s2983_s18  ;;  %629 = vrot.lane.b32.xlu0 %v3236_v31, %s2983_s18 }
  0x66   : > { %729 = vrot.lane.b32.xlu1 %v3247_v32, %s2982_s17  ;;  %727 = vrot.lane.b32.xlu0 %v3250_v33, %s2982_s17 }
  0x6a   : > { %635 = vrot.lane.b32.xlu1 %v3247_v32, %s2983_s18  ;;  %633 = vrot.lane.b32.xlu0 %v3250_v33, %s2983_s18 }
  0x6e   : > { %733 = vrot.lane.b32.xlu1 %v3261_v34, %s2982_s17  ;;  %731 = vrot.lane.b32.xlu0 %v3264_v35, %s2982_s17 }
  0x72   : > { %639 = vrot.lane.b32.xlu1 %v3261_v34, %s2983_s18  ;;  %637 = vrot.lane.b32.xlu0 %v3264_v35, %s2983_s18 }
  0x76   : > { %737 = vrot.lane.b32.xlu1 %v3275_v36, %s2982_s17  ;;  %735 = vrot.lane.b32.xlu0 %v3278_v37, %s2982_s17 }
  0x7a   : > { %643 = vrot.lane.b32.xlu1 %v3275_v36, %s2983_s18  ;;  %641 = vrot.lane.b32.xlu0 %v3278_v37, %s2983_s18 }
  0x7e   : > { %741 = vrot.lane.b32.xlu1 %v3289_v38, %s2982_s17  ;;  %739 = vrot.lane.b32.xlu0 %v3292_v39, %s2982_s17 }
  0x82   : > { %647 = vrot.lane.b32.xlu1 %v3289_v38, %s2983_s18  ;;  %645 = vrot.lane.b32.xlu0 %v3292_v39, %s2983_s18 }
  0x84   : > { %v688_v45 = vpop.permute.xlu1 %687  ;;  %v590_v46 = vpop.permute.xlu0 %589 }
  0x85   : > { %v784_v47 = vsel %vm783_vm3, %v551_v41, %v590_v46 }
  0x86   : > { %745 = vrot.lane.b32.xlu1 %v545_v43, %s2982_s17  ;;  %743 = vrot.lane.b32.xlu0 %v544_v44, %s2982_s17  ;;  %v3316_v49 = vsel %vm816_vm4, %v784_v47, %v688_v45 }
  0x87   : > { %2693 = vmatprep.mubr.msk.f32.mxu1 %vm1048_vm5, %v3316_v49  ;;  %v882_v50 = vrot.slane %v3316_v49, 7 }
  0x88   : > { %v690_v53 = vpop.permute.xlu1 %689  ;;  %v592_v54 = vpop.permute.xlu0 %591 }
  0x89   : > { %v785_v55 = vsel %vm783_vm3, %v552_v48, %v592_v54  ;;  %v946_v56 = vsel %vm881_vm6, 0.0, %v882_v50 }
  0x8a   : > { %651 = vrot.lane.b32.xlu1 %v545_v43, %s2983_s18  ;;  %649 = vrot.lane.b32.xlu0 %v544_v44, %s2983_s18  ;;  %v3326_v57 = vsel %vm816_vm4, %v785_v55, %v690_v53 }
  0x8b   : > { %2745 = vmatprep.mubr.msk.f32.mxu0 %vm1048_vm5, %v946_v56  ;;  %v883_v60 = vrot.slane %v3326_v57, 7  ;;  %2694 = vmatmul.mubr.msk.f32.vlgmr.msra.gmra.mrb[0].mxu1 %vm1048_vm5, %v3326_v57 }
  0x8c   : > { %v596_v61 = vpop.permute.xlu1 %595  ;;  %v594_v62 = vpop.permute.xlu0 %593  ;;  %2864 = vmatpush3.bf16.msk.msra.mxu1 %vm3054_vm2, %v3063_v6 }
  0x8d   : > { %v884_v63 = vsel %vm881_vm6, %v882_v50, %v883_v60  ;;  %v787_v0 = vsel %vm783_vm3, %v3099_v10, %v596_v61  ;;  %v786_v1 = vsel %vm783_vm3, %v3086_v8, %v594_v62 }
  0x8e   : > { %749 = vrot.lane.b32.xlu1 %v556_v58, %s2982_s17  ;;  %747 = vrot.lane.b32.xlu0 %v555_v59, %s2982_s17  ;;  %s3742_s17 = scalar_lea.vmem %s3991_s7, %s3999_s24 }
  0x8f   : > { %2746 = vmatmul.mubr.msk.f32.vlgmr.msra.gmra.mrb[0].mxu0 %vm1048_vm5, %v884_v63 }
  0x90   : > { %v694_v2 = vpop.permute.xlu1 %693  ;;  %v692_v3 = vpop.permute.xlu0 %691  ;;  %2862 = vmatpush3.bf16.msk.msra.mxu0 %vm3054_vm2, %v3191_v25 }
  0x91   : > { %v3347_v5 = vsel %vm816_vm4, %v787_v0, %v694_v2  ;;  %v3350_v6 = vsel %vm816_vm4, %v786_v1, %v692_v3 }
  0x92   : > { %v886_v23 = vrot.slane %v3347_v5, 7  ;;  %v885_v24 = vrot.slane %v3350_v6, 7  ;;  %2696 = vmatprep.mubr.msk.f32.mxu1 %vm1048_vm5, %v3350_v6 }
  0x93   : > { %2697 = vmatmul.mubr.msk.f32.gmra.mrb[2].mxu1 %vm1048_vm5, %v3347_v5 }
  0x94   : > { %v600_v8 = vpop.permute.xlu1 %599  ;;  %v598_v10 = vpop.permute.xlu0 %597  ;;  %v947_v4 = vsel %vm881_vm6, 0.0, %v885_v24  ;;  %v887_v25 = vsel %vm881_vm6, %v885_v24, %v886_v23 }
  0x95   : > { %2748 = vmatprep.mubr.msk.f32.mxu0 %vm1048_vm5, %v947_v4  ;;  %v789_v40 = vsel %vm783_vm3, %v3096_v9, %v600_v8  ;;  %v788_v41 = vsel %vm783_vm3, %v3083_v7, %v598_v10 }
  0x96   : > { %2749 = vmatmul.mubr.msk.f32.gmra.mrb[2].mxu0 %vm1048_vm5, %v887_v25 }
  0x98   : > { %v698_v42 = vpop.permute.xlu1 %697  ;;  %v696_v43 = vpop.permute.xlu0 %695 }
  0x99   : > { %v3367_v44 = vsel %vm816_vm4, %v789_v40, %v698_v42  ;;  %v3370_v45 = vsel %vm816_vm4, %v788_v41, %v696_v43 }
  0x9a   : > { %v889_v46 = vrot.slane %v3367_v44, 7  ;;  %v888_v47 = vrot.slane %v3370_v45, 7  ;;  %2699 = vmatprep.mubr.msk.f32.mxu1 %vm1048_vm5, %v3370_v45 }
  0x9b   : > { %2700 = vmatmul.mubr.msk.f32.gmra.mrb[4].mxu1 %vm1048_vm5, %v3367_v44 }
  0x9c   : > { %v604_v9 = vpop.permute.xlu1 %603  ;;  %v602_v7 = vpop.permute.xlu0 %601  ;;  %v948_v48 = vsel %vm881_vm6, 0.0, %v888_v47  ;;  %v890_v50 = vsel %vm881_vm6, %v888_v47, %v889_v46 }
  0x9d   : > { %2751 = vmatprep.mubr.msk.f32.mxu0 %vm1048_vm5, %v948_v48  ;;  %v791_v51 = vsel %vm783_vm3, %v3110_v11, %v604_v9  ;;  %v790_v52 = vsel %vm783_vm3, %v3113_v12, %v602_v7 }
  0x9e   : > { %2752 = vmatmul.mubr.msk.f32.gmra.mrb[4].mxu0 %vm1048_vm5, %v890_v50 }
  0xa0   : > { %v702_v53 = vpop.permute.xlu1 %701  ;;  %v700_v54 = vpop.permute.xlu0 %699 }
  0xa1   : > { %v3387_v55 = vsel %vm816_vm4, %v791_v51, %v702_v53  ;;  %v3390_v56 = vsel %vm816_vm4, %v790_v52, %v700_v54 }
  0xa2   : > { %v892_v58 = vrot.slane %v3387_v55, 7  ;;  %v891_v59 = vrot.slane %v3390_v56, 7  ;;  %2702 = vmatprep.mubr.msk.f32.mxu1 %vm1048_vm5, %v3390_v56 }
  0xa3   : > { %2703 = vmatmul.mubr.msk.f32.gmra.mrb[6].mxu1 %vm1048_vm5, %v3387_v55 }
  0xa4   : > { %v608_v11 = vpop.permute.xlu1 %607  ;;  %v606_v12 = vpop.permute.xlu0 %605  ;;  %v949_v60 = vsel %vm881_vm6, 0.0, %v891_v59  ;;  %v893_v61 = vsel %vm881_vm6, %v891_v59, %v892_v58 }
  0xa5   : > { %2754 = vmatprep.mubr.msk.f32.mxu0 %vm1048_vm5, %v949_v60  ;;  %v793_v62 = vsel %vm783_vm3, %v3124_v13, %v608_v11  ;;  %v792_v63 = vsel %vm783_vm3, %v3127_v14, %v606_v12 }
  0xa6   : > { %2755 = vmatmul.mubr.msk.f32.gmra.mrb[6].mxu0 %vm1048_vm5, %v893_v61 }
  0xa8   : > { %v706_v0 = vpop.permute.xlu1 %705  ;;  %v704_v1 = vpop.permute.xlu0 %703 }
  0xa9   : > { %v3407_v2 = vsel %vm816_vm4, %v793_v62, %v706_v0  ;;  %v3410_v3 = vsel %vm816_vm4, %v792_v63, %v704_v1 }
  0xaa   : > { %v895_v23 = vrot.slane %v3407_v2, 7  ;;  %v894_v24 = vrot.slane %v3410_v3, 7  ;;  %2705 = vmatprep.mubr.msk.f32.mxu1 %vm1048_vm5, %v3410_v3 }
  0xab   : > { %2706 = vmatmul.mubr.msk.f32.gmra.mrb[8].mxu1 %vm1048_vm5, %v3407_v2 }
  0xac   : > { %v612_v13 = vpop.permute.xlu1 %611  ;;  %v610_v14 = vpop.permute.xlu0 %609  ;;  %v950_v8 = vsel %vm881_vm6, 0.0, %v894_v24  ;;  %v896_v10 = vsel %vm881_vm6, %v894_v24, %v895_v23  ;;  %v964_v23 = vrot.slane %v3326_v57, 1  ;;  %v967_v57 = vrot.slane %v3347_v5, 1 }
  0xad   : > { %2757 = vmatprep.mubr.msk.f32.mxu0 %vm1048_vm5, %v950_v8  ;;  %v795_v4 = vsel %vm783_vm3, %v3138_v15, %v612_v13  ;;  %v794_v25 = vsel %vm783_vm3, %v3141_v16, %v610_v14 }
  0xae   : > { %2758 = vmatmul.mubr.msk.f32.gmra.mrb[8].mxu0 %vm1048_vm5, %v896_v10 }
  0xb0   : > { %v710_v40 = vpop.permute.xlu1 %709  ;;  %v708_v41 = vpop.permute.xlu0 %707 }
  0xb1   : > { %v3427_v42 = vsel %vm816_vm4, %v795_v4, %v710_v40  ;;  %v3430_v43 = vsel %vm816_vm4, %v794_v25, %v708_v41  ;;  %v966_v4 = vrot.slane %v3350_v6, 1 }
  0xb2   : > { %v898_v46 = vrot.slane %v3427_v42, 7  ;;  %v897_v47 = vrot.slane %v3430_v43, 7  ;;  %2708 = vmatprep.mubr.msk.f32.mxu1 %vm1048_vm5, %v3430_v43 }
  0xb3   : > { %2709 = vmatmul.mubr.msk.f32.gmra.mrb[10].mxu1 %vm1048_vm5, %v3427_v42 }
  0xb4   : > { %v616_v15 = vpop.permute.xlu1 %615  ;;  %v614_v16 = vpop.permute.xlu0 %613  ;;  %v951_v9 = vsel %vm881_vm6, 0.0, %v897_v47  ;;  %v899_v7 = vsel %vm881_vm6, %v897_v47, %v898_v46  ;;  %v1027_v47 = vsel %vm962_vm7, %v964_v23, 0.0 }
  0xb5   : > { %2760 = vmatprep.mubr.msk.f32.mxu0 %vm1048_vm5, %v951_v9  ;;  %v797_v48 = vsel %vm783_vm3, %v3152_v17, %v616_v15  ;;  %v796_v50 = vsel %vm783_vm3, %v3155_v18, %v614_v16  ;;  %v970_v15 = vrot.slane %v3367_v44, 1  ;;  %v969_v16 = vrot.slane %v3370_v45, 1 }
  0xb6   : > { %2761 = vmatmul.mubr.msk.f32.gmra.mrb[10].mxu0 %vm1048_vm5, %v899_v7  ;;  %v1028_v7 = vsel %vm962_vm7, %v967_v57, 0.0  ;;  %v973_v44 = vrot.slane %v3387_v55, 1  ;;  %v972_v45 = vrot.slane %v3390_v56, 1 }
  0xb7   : > { %v1029_v56 = vsel %vm962_vm7, %v970_v15, 0.0 }
  0xb8   : > { %v714_v51 = vpop.permute.xlu1 %713  ;;  %v712_v52 = vpop.permute.xlu0 %711 }
  0xb9   : > { %v3447_v53 = vsel %vm816_vm4, %v797_v48, %v714_v51  ;;  %v3450_v54 = vsel %vm816_vm4, %v796_v50, %v712_v52  ;;  %v971_v48 = vsel %vm962_vm7, %v969_v16, %v970_v15 }
  0xba   : > { %v901_v58 = vrot.slane %v3447_v53, 7  ;;  %v900_v59 = vrot.slane %v3450_v54, 7  ;;  %2711 = vmatprep.mubr.msk.f32.mxu1 %vm1048_vm5, %v3450_v54 }
  0xbb   : > { %2712 = vmatmul.mubr.msk.f32.gmra.mrb[12].mxu1 %vm1048_vm5, %v3447_v53 }
  0xbc   : > { %v620_v17 = vpop.permute.xlu1 %619  ;;  %v618_v18 = vpop.permute.xlu0 %617  ;;  %v952_v11 = vsel %vm881_vm6, 0.0, %v900_v59  ;;  %v902_v12 = vsel %vm881_vm6, %v900_v59, %v901_v58 }
  0xbd   : > { %2763 = vmatprep.mubr.msk.f32.mxu0 %vm1048_vm5, %v952_v11  ;;  %v799_v60 = vsel %vm783_vm3, %v3166_v19, %v620_v17  ;;  %v798_v61 = vsel %vm783_vm3, %v3169_v20, %v618_v18  ;;  %v963_v19 = vrot.slane %v3316_v49, 1  ;;  %v976_v17 = vrot.slane %v3407_v2, 1 }
  0xbe   : > { %2764 = vmatmul.mubr.msk.f32.gmra.mrb[12].mxu0 %vm1048_vm5, %v902_v12  ;;  %v975_v18 = vrot.slane %v3410_v3, 1  ;;  %v1030_v12 = vsel %vm962_vm7, %v973_v44, 0.0  ;;  %v979_v2 = vrot.slane %v3427_v42, 1  ;;  %v978_v3 = vrot.slane %v3430_v43, 1 }
  0xbf   : > { %v965_v25 = vsel %vm962_vm7, %v963_v19, %v964_v23  ;;  %v1031_v43 = vsel %vm962_vm7, %v976_v17, 0.0  ;;  %v981_v19 = vrot.slane %v3450_v54, 1 }
  0xc0   : > { %v718_v62 = vpop.permute.xlu1 %717  ;;  %v716_v63 = vpop.permute.xlu0 %715 }
  0xc1   : > { %v3467_v0 = vsel %vm816_vm4, %v799_v60, %v718_v62  ;;  %v3470_v1 = vsel %vm816_vm4, %v798_v61, %v716_v63  ;;  %v977_v60 = vsel %vm962_vm7, %v975_v18, %v976_v17 }
  0xc2   : > { %v904_v24 = vrot.slane %v3467_v0, 7  ;;  %v903_v13 = vrot.slane %v3470_v1, 7  ;;  %2714 = vmatprep.mubr.msk.f32.mxu1 %vm1048_vm5, %v3470_v1  ;;  %v984_v54 = vrot.slane %v3470_v1, 1 }
  0xc3   : > { %2715 = vmatmul.mubr.msk.f32.gmra.mrb[14].mxu1 %vm1048_vm5, %v3467_v0 }
  0xc4   : > { %v624_v20 = vpop.permute.xlu1 %623  ;;  %v622_v14 = vpop.permute.xlu0 %621  ;;  %v953_v8 = vsel %vm881_vm6, 0.0, %v903_v13  ;;  %v905_v10 = vsel %vm881_vm6, %v903_v13, %v904_v24  ;;  %v982_v13 = vrot.slane %v3447_v53, 1  ;;  %v985_v53 = vrot.slane %v3467_v0, 1 }
  0xc5   : > { %2766 = vmatprep.mubr.msk.f32.mxu0 %vm1048_vm5, %v953_v8  ;;  %v801_v49 = vsel %vm783_vm3, %v3180_v21, %v624_v20  ;;  %v800_v40 = vsel %vm783_vm3, %v3183_v22, %v622_v14  ;;  %v968_v21 = vsel %vm962_vm7, %v966_v4, %v967_v57  ;;  %v1032_v14 = vsel %vm962_vm7, %v979_v2, 0.0 }
  0xc6   : > { %2767 = vmatmul.mubr.msk.f32.gmra.mrb[14].mxu0 %vm1048_vm5, %v905_v10  ;;  %v983_v8 = vsel %vm962_vm7, %v981_v19, %v982_v13  ;;  %v1033_v1 = vsel %vm962_vm7, %v982_v13, 0.0 }
  0xc7   : > { %2797 = vmatprep.mubr.msk.f32.mxu0 %vm1048_vm5, %v965_v25 }
  0xc8   : > { %v722_v41 = vpop.permute.xlu1 %721  ;;  %v720_v46 = vpop.permute.xlu0 %719 }
  0xc9   : > { %v3494_v5 = vsel %vm816_vm4, %v801_v49, %v722_v41  ;;  %v3497_v6 = vsel %vm816_vm4, %v800_v40, %v720_v46 }
  0xca   : > { %2717 = vmatprep.mubr.msk.f32.mxu1 %vm1048_vm5, %v3497_v6  ;;  %2798 = vmatmul.mubr.msk.f32.vlgmr.msra.gmra.mrb[0].mxu0 %vm1048_vm5, %v1027_v47  ;;  %v988_v40 = vrot.slane %v3494_v5, 1  ;;  %v987_v41 = vrot.slane %v3497_v6, 1  ;;  %v1034_v47 = vsel %vm962_vm7, %v985_v53, 0.0 }
  0xcb   : > { %2718 = vmatmul.mubr.msk.f32.gmra.mrb[16].mxu1 %vm1048_vm5, %v3494_v5  ;;  %2800 = vmatprep.mubr.msk.f32.mxu0 %vm1048_vm5, %v968_v21 }
  0xcc   : > { %v628_v22 = vpop.permute.xlu1 %627  ;;  %v626_v9 = vpop.permute.xlu0 %625  ;;  %v989_v21 = vsel %vm962_vm7, %v987_v41, %v988_v40  ;;  %v906_v41 = vrot.slane %v3497_v6, 7 }
  0xcd   : > { %v803_v50 = vsel %vm783_vm3, %v3205_v26, %v628_v22  ;;  %v802_v51 = vsel %vm783_vm3, %v3208_v27, %v626_v9  ;;  %v974_v26 = vsel %vm962_vm7, %v972_v45, %v973_v44 }
  0xce   : > { %2801 = vmatmul.mubr.msk.f32.gmra.mrb[2].mxu0 %vm1048_vm5, %v1028_v7 }
  0xcf   : > { %2803 = vmatprep.mubr.msk.f32.mxu0 %vm1048_vm5, %v971_v48 }
  0xd0   : > { %v726_v52 = vpop.permute.xlu1 %725  ;;  %v724_v58 = vpop.permute.xlu0 %723 }
  0xd1   : > { %v3519_v59 = vsel %vm816_vm4, %v803_v50, %v726_v52  ;;  %v3522_v55 = vsel %vm816_vm4, %v802_v51, %v724_v58  ;;  %v1035_v50 = vsel %vm962_vm7, %v988_v40, 0.0 }
  0xd2   : > { %2720 = vmatprep.mubr.msk.f32.mxu1 %vm1048_vm5, %v3522_v55  ;;  %2804 = vmatmul.mubr.msk.f32.gmra.mrb[4].mxu0 %vm1048_vm5, %v1029_v56  ;;  %v991_v15 = vrot.slane %v3519_v59, 1  ;;  %v990_v16 = vrot.slane %v3522_v55, 1 }
  0xd3   : > { %2721 = vmatmul.mubr.msk.f32.gmra.mrb[18].mxu1 %vm1048_vm5, %v3519_v59  ;;  %2806 = vmatprep.mubr.msk.f32.mxu0 %vm1048_vm5, %v974_v26 }
  0xd4   : > { %v632_v27 = vpop.permute.xlu1 %631  ;;  %v630_v11 = vpop.permute.xlu0 %629  ;;  %v1036_v56 = vsel %vm962_vm7, %v991_v15, 0.0 }
  0xd5   : > { %v805_v61 = vsel %vm783_vm3, %v3219_v28, %v632_v27  ;;  %v804_v62 = vsel %vm783_vm3, %v3222_v29, %v630_v11  ;;  %v980_v28 = vsel %vm962_vm7, %v978_v3, %v979_v2 }
  0xd6   : > { %2807 = vmatmul.mubr.msk.f32.gmra.mrb[6].mxu0 %vm1048_vm5, %v1030_v12 }
  0xd7   : > { %2809 = vmatprep.mubr.msk.f32.mxu0 %vm1048_vm5, %v977_v60 }
  0xd8   : > { %v730_v63 = vpop.permute.xlu1 %729  ;;  %v728_v23 = vpop.permute.xlu0 %727 }
  0xd9   : > { %v3545_v24 = vsel %vm816_vm4, %v805_v61, %v730_v63  ;;  %v3548_v42 = vsel %vm816_vm4, %v804_v62, %v728_v23 }
  0xda   : > { %2723 = vmatprep.mubr.msk.f32.mxu1 %vm1048_vm5, %v3548_v42  ;;  %2810 = vmatmul.mubr.msk.f32.gmra.mrb[8].mxu0 %vm1048_vm5, %v1031_v43  ;;  %v994_v51 = vrot.slane %v3545_v24, 1  ;;  %v993_v52 = vrot.slane %v3548_v42, 1 }
  0xdb   : > { %2724 = vmatmul.mubr.msk.f32.gmra.mrb[20].mxu1 %vm1048_vm5, %v3545_v24  ;;  %2812 = vmatprep.mubr.msk.f32.mxu0 %vm1048_vm5, %v980_v28 }
  0xdc   : > { %v636_v29 = vpop.permute.xlu1 %635  ;;  %v634_v20 = vpop.permute.xlu0 %633  ;;  %v995_v26 = vsel %vm962_vm7, %v993_v52, %v994_v51  ;;  %v1037_v61 = vsel %vm962_vm7, %v994_v51, 0.0  ;;  %v913_v52 = vrot.slane %v3545_v24, 7 }
  0xdd   : > { %v807_v10 = vsel %vm783_vm3, %v3233_v30, %v636_v29  ;;  %v806_v57 = vsel %vm783_vm3, %v3236_v31, %v634_v20  ;;  %v986_v30 = vsel %vm962_vm7, %v984_v54, %v985_v53 }
  0xde   : > { %2813 = vmatmul.mubr.msk.f32.gmra.mrb[10].mxu0 %vm1048_vm5, %v1032_v14 }
  0xdf   : > { %2815 = vmatprep.mubr.msk.f32.mxu0 %vm1048_vm5, %v983_v8 }
  0xe0   : > { %v734_v4 = vpop.permute.xlu1 %733  ;;  %v732_v25 = vpop.permute.xlu0 %731 }
  0xe1   : > { %v3571_v49 = vsel %vm816_vm4, %v807_v10, %v734_v4  ;;  %v3574_v0 = vsel %vm816_vm4, %v806_v57, %v732_v25 }
  0xe2   : > { %2726 = vmatprep.mubr.msk.f32.mxu1 %vm1048_vm5, %v3574_v0  ;;  %2816 = vmatmul.mubr.msk.f32.gmra.mrb[12].mxu0 %vm1048_vm5, %v1033_v1  ;;  %v997_v17 = vrot.slane %v3571_v49, 1  ;;  %v996_v18 = vrot.slane %v3574_v0, 1 }
  0xe3   : > { %2727 = vmatmul.mubr.msk.f32.gmra.mrb[22].mxu1 %vm1048_vm5, %v3571_v49  ;;  %2818 = vmatprep.mubr.msk.f32.mxu0 %vm1048_vm5, %v986_v30 }
  0xe4   : > { %v640_v31 = vpop.permute.xlu1 %639  ;;  %v638_v46 = vpop.permute.xlu0 %637  ;;  %v1038_v43 = vsel %vm962_vm7, %v997_v17, 0.0 }
  0xe5   : > { %v809_v22 = vsel %vm783_vm3, %v3247_v32, %v640_v31  ;;  %v808_v9 = vsel %vm783_vm3, %v3250_v33, %v638_v46  ;;  %v992_v32 = vsel %vm962_vm7, %v990_v16, %v991_v15 }
  0xe6   : > { %2819 = vmatmul.mubr.msk.f32.gmra.mrb[14].mxu0 %vm1048_vm5, %v1034_v47 }
  0xe7   : > { %2821 = vmatprep.mubr.msk.f32.mxu0 %vm1048_vm5, %v989_v21 }
  0xe8   : > { %v738_v7 = vpop.permute.xlu1 %737  ;;  %v736_v44 = vpop.permute.xlu0 %735 }
  0xe9   : > { %v3597_v45 = vsel %vm816_vm4, %v809_v22, %v738_v7  ;;  %v3600_v48 = vsel %vm816_vm4, %v808_v9, %v736_v44  ;;  %v907_v22 = vrot.slane %v3494_v5, 7  ;;  %v910_v5 = vrot.slane %v3519_v59, 7 }
  0xea   : > { %2729 = vmatprep.mubr.msk.f32.mxu1 %vm1048_vm5, %v3600_v48  ;;  %2822 = vmatmul.mubr.msk.f32.gmra.mrb[16].mxu0 %vm1048_vm5, %v1035_v50  ;;  %v1000_v62 = vrot.slane %v3597_v45, 1  ;;  %v999_v63 = vrot.slane %v3600_v48, 1 }
  0xeb   : > { %2730 = vmatmul.mubr.msk.f32.gmra.mrb[24].mxu1 %vm1048_vm5, %v3597_v45  ;;  %2824 = vmatprep.mubr.msk.f32.mxu0 %vm1048_vm5, %v992_v32  ;;  %v908_v50 = vsel %vm881_vm6, %v906_v41, %v907_v22 }
  0xec   : > { %v644_v33 = vpop.permute.xlu1 %643  ;;  %v642_v58 = vpop.permute.xlu0 %641  ;;  %v1001_v28 = vsel %vm962_vm7, %v999_v63, %v1000_v62  ;;  %v1039_v10 = vsel %vm962_vm7, %v1000_v62, 0.0 }
  0xed   : > { %v811_v27 = vsel %vm783_vm3, %v3261_v34, %v644_v33  ;;  %v810_v11 = vsel %vm783_vm3, %v3264_v35, %v642_v58  ;;  %v998_v34 = vsel %vm962_vm7, %v996_v18, %v997_v17  ;;  %v915_v33 = vrot.slane %v3574_v0, 7 }
  0xee   : > { %2825 = vmatmul.mubr.msk.f32.gmra.mrb[18].mxu0 %vm1048_vm5, %v1036_v56  ;;  %v918_v56 = vrot.slane %v3600_v48, 7  ;;  %v919_v0 = vrot.slane %v3597_v45, 7 }
  0xef   : > { %2827 = vmatprep.mubr.msk.f32.mxu0 %vm1048_vm5, %v995_v26  ;;  %v957_v24 = vsel %vm881_vm6, 0.0, %v915_v33 }
  0xf0   : > { %v742_v12 = vpop.permute.xlu1 %741  ;;  %v740_v2 = vpop.permute.xlu0 %739  ;;  %v920_v26 = vsel %vm881_vm6, %v918_v56, %v919_v0 }
  0xf1   : > { %v3623_v3 = vsel %vm816_vm4, %v811_v27, %v742_v12  ;;  %v3626_v60 = vsel %vm816_vm4, %v810_v11, %v740_v2 }
  0xf2   : > { %2732 = vmatprep.mubr.msk.f32.mxu1 %vm1048_vm5, %v3626_v60  ;;  %2828 = vmatmul.mubr.msk.f32.gmra.mrb[20].mxu0 %vm1048_vm5, %v1037_v61  ;;  %v1003_v13 = vrot.slane %v3623_v3, 1  ;;  %v1002_v19 = vrot.slane %v3626_v60, 1  ;;  %v921_v18 = vrot.slane %v3626_v60, 7  ;;  %v922_v48 = vrot.slane %v3623_v3, 7 }
  0xf3   : > { %2733 = vmatmul.mubr.msk.f32.gmra.mrb[26].mxu1 %vm1048_vm5, %v3623_v3  ;;  %2830 = vmatprep.mubr.msk.f32.mxu0 %vm1048_vm5, %v998_v34 }
  0xf4   : > { %v648_v35 = vpop.permute.xlu1 %647  ;;  %v646_v23 = vpop.permute.xlu0 %645  ;;  %v1040_v1 = vsel %vm962_vm7, %v1003_v13, 0.0  ;;  %v959_v45 = vsel %vm881_vm6, 0.0, %v921_v18  ;;  %v923_v12 = vsel %vm881_vm6, %v921_v18, %v922_v48 }
  0xf5   : > { %v813_v29 = vsel %vm783_vm3, %v3275_v36, %v648_v35  ;;  %v812_v20 = vsel %vm783_vm3, %v3278_v37, %v646_v23  ;;  %v1004_v36 = vsel %vm962_vm7, %v1002_v19, %v1003_v13 }
  0xf6   : > { %2831 = vmatmul.mubr.msk.f32.gmra.mrb[22].mxu0 %vm1048_vm5, %v1038_v43 }
  0xf7   : > { %2833 = vmatprep.mubr.msk.f32.mxu0 %vm1048_vm5, %v1001_v28 }
  0xf8   : > { %v746_v14 = vpop.permute.xlu1 %745  ;;  %v744_v53 = vpop.permute.xlu0 %743 }
  0xf9   : > { %v3649_v54 = vsel %vm816_vm4, %v813_v29, %v746_v14  ;;  %v3652_v8 = vsel %vm816_vm4, %v812_v20, %v744_v53  ;;  %v2984_v14 = vmov 0.0  }
  0xfa   : > { %v1006_v57 = vrot.slane %v3649_v54, 1  ;;  %v1005_v4 = vrot.slane %v3652_v8, 1  ;;  %2735 = vmatprep.mubr.msk.f32.mxu1 %vm1048_vm5, %v3652_v8  ;;  %2834 = vmatmul.mubr.msk.f32.gmra.mrb[24].mxu0 %vm1048_vm5, %v1039_v10  ;;  %v924_v27 = vrot.slane %v3652_v8, 7  ;;  %v925_v11 = vrot.slane %v3649_v54, 7  ;;  %2069 = vst.msk [vmem:[%s3736_s14] sm:$0x1] %vm2068_vm8, %v2984_v14 }
  0xfb   : > { %2736 = vmatmul.mubr.msk.f32.gmra.mrb[28].mxu1 %vm1048_vm5, %v3649_v54  ;;  %2836 = vmatprep.mubr.msk.f32.mxu0 %vm1048_vm5, %v1004_v36  ;;  %2070 = vst.msk [vmem:[%s3742_s17] sm:$0x1] %vm2068_vm8, %v2984_v14 }
  0xfc   : > { %v652_v37 = vpop.permute.xlu1 %651  ;;  %v650_v25 = vpop.permute.xlu0 %649  ;;  %v1007_v40 = vsel %vm962_vm7, %v1005_v4, %v1006_v57  ;;  %v1041_v21 = vsel %vm962_vm7, %v1006_v57, 0.0  ;;  %v960_v60 = vsel %vm881_vm6, 0.0, %v924_v27  ;;  %v926_v61 = vsel %vm881_vm6, %v924_v27, %v925_v11 }
  0xfd   : > { %v815_v30 = vsel %vm783_vm3, %v3289_v38, %v652_v37  ;;  %v814_v31 = vsel %vm783_vm3, %v3292_v39, %v650_v25  ;;  %v909_v38 = vrot.slane %v3522_v55, 7  ;;  %v954_v39 = vsel %vm881_vm6, 0.0, %v906_v41  ;;  %v3767_v25 = vld [vmem:[%s3988_s4] ss:$0 sm:$0xff] }
  0xfe   : > { %2837 = vmatmul.mubr.msk.f32.gmra.mrb[26].mxu0 %vm1048_vm5, %v1040_v1  ;;  %v912_v55 = vrot.slane %v3548_v42, 7  ;;  %v916_v42 = vrot.slane %v3571_v49, 7  ;;  %v958_v49 = vsel %vm881_vm6, 0.0, %v918_v56 }
  0xff   : > { %2839 = vmatprep.mubr.msk.f32.mxu0 %vm1048_vm5, %v1007_v40  ;;  %v955_v51 = vsel %vm881_vm6, 0.0, %v909_v38  ;;  %v911_v32 = vsel %vm881_vm6, %v909_v38, %v910_v5 }
 0x100   : > { %v750_v46 = vpop.permute.xlu1 %749  ;;  %v748_v47 = vpop.permute.xlu0 %747  ;;  %v956_v59 = vsel %vm881_vm6, 0.0, %v912_v55  ;;  %v914_v58 = vsel %vm881_vm6, %v912_v55, %v913_v52  ;;  %v917_v17 = vsel %vm881_vm6, %v915_v33, %v916_v42 }
 0x101   : > { %v848_v15 = vsel %vm816_vm4, %v815_v30, %v750_v46  ;;  %v847_v16 = vsel %vm816_vm4, %v814_v31, %v748_v47 }
 0x102   : > { %v1009_v9 = vrot.slane %v848_v15, 1  ;;  %v1008_v6 = vrot.slane %v847_v16, 1  ;;  %2738 = vmatprep.mubr.msk.f32.mxu1 %vm1048_vm5, %v847_v16  ;;  %2840 = vmatmul.mubr.msk.f32.gmra.mrb[28].mxu0 %vm1048_vm5, %v1041_v21  ;;  %v927_v2 = vrot.slane %v847_v16, 7  ;;  %v928_v3 = vrot.slane %v848_v15, 7 }
 0x103   : > { %2739 = vmatmul.mubr.msk.f32.gmra.mrb[30].mxu1 %vm1048_vm5, %v848_v15 }
 0x104   : > { %2769 = vmatprep.mubr.msk.f32.mxu1 %vm1048_vm5, %v954_v39  ;;  %v1010_v7 = vsel %vm962_vm7, %v1008_v6, %v1009_v9  ;;  %v1042_v44 = vsel %vm962_vm7, %v1009_v9, 0.0  ;;  %v961_v62 = vsel %vm881_vm6, 0.0, %v927_v2  ;;  %v929_v63 = vsel %vm881_vm6, %v927_v2, %v928_v3 }
 0x105   : > { %2842 = vmatprep.mubr.msk.f32.mxu0 %vm1048_vm5, %v1010_v7 }
 0x106   : > { %2843 = vmatmul.mubr.msk.f32.gmra.mrb[30].mxu0 %vm1048_vm5, %v1042_v44 }
 0x107   : > { %2770 = vmatmul.mubr.msk.f32.vlgmr.msra.gmra.mrb[16].mxu1 %vm1048_vm5, %v908_v50 }
 0x108   : > { %2772 = vmatprep.mubr.msk.f32.mxu1 %vm1048_vm5, %v955_v51 }
 0x10b   : > { %2773 = vmatmul.mubr.msk.f32.gmra.mrb[18].mxu1 %vm1048_vm5, %v911_v32 }
 0x10c   : > { %2775 = vmatprep.mubr.msk.f32.mxu1 %vm1048_vm5, %v956_v59 }
 0x10f   : > { %2776 = vmatmul.mubr.msk.f32.gmra.mrb[20].mxu1 %vm1048_vm5, %v914_v58 }
 0x110   : > { %2778 = vmatprep.mubr.msk.f32.mxu1 %vm1048_vm5, %v957_v24 }
 0x113   : > { %2779 = vmatmul.mubr.msk.f32.gmra.mrb[22].mxu1 %vm1048_vm5, %v917_v17 }
 0x114   : > { %2781 = vmatprep.mubr.msk.f32.mxu1 %vm1048_vm5, %v958_v49 }
 0x117   : > { %2782 = vmatmul.mubr.msk.f32.gmra.mrb[24].mxu1 %vm1048_vm5, %v920_v26 }
 0x118   : > { %2784 = vmatprep.mubr.msk.f32.mxu1 %vm1048_vm5, %v959_v45 }
 0x11b   : > { %2785 = vmatmul.mubr.msk.f32.gmra.mrb[26].mxu1 %vm1048_vm5, %v923_v12 }
 0x11c   : > { %2787 = vmatprep.mubr.msk.f32.mxu1 %vm1048_vm5, %v960_v60 }
 0x11f   : > { %2788 = vmatmul.mubr.msk.f32.gmra.mrb[28].mxu1 %vm1048_vm5, %v926_v61 }
 0x120   : > { %2790 = vmatprep.mubr.msk.f32.mxu1 %vm1048_vm5, %v961_v62 }
 0x123   : > { %2791 = vmatmul.mubr.msk.f32.gmra.mrb[30].mxu1 %vm1048_vm5, %v929_v63 }
 0x15e   : > { %v2695_v34 = vpop.f32.mrb[0].mxu1 }
 0x15f   : > { %v1183_v35 = vpop.f32.mrb[1].mxu1 }
 0x166   : > { %v2698_v23 = vpop.f32.mrb[2].mxu1 }
 0x167   : > { %v1193_v43 = vpop.f32.mrb[3].mxu1 }
 0x16e   : > { %v2701_v13 = vpop.f32.mrb[4].mxu1 }
 0x16f   : > { %v1203_v19 = vpop.f32.mrb[5].mxu1 }
 0x176   : > { %v3728_v28 = vpop.f32.mrb[6].mxu1 }
 0x177   : > { %v3730_v29 = vpop.f32.mrb[7].mxu1 }
 0x17e   : > { %v3744_v20 = vpop.f32.mrb[8].mxu1 }
 0x17f   : > { %v3750_v53 = vpop.f32.mrb[9].mxu1 }
 0x186   : > { %v3752_v54 = vpop.f32.mrb[10].mxu1 }
 0x187   : > { %v3754_v8 = vpop.f32.mrb[11].mxu1 }
 0x18e   : > { %v3756_v10 = vpop.f32.mrb[12].mxu1 }
 0x18f   : > { %v3758_v57 = vpop.f32.mrb[13].mxu1 }
 0x196   : > { %v3760_v4 = vpop.f32.mrb[14].mxu1 }
 0x197   : > { %v3762_v36 = vpop.f32.mrb[15].mxu1 }
 0x19d   : > { %v2799_v37 = vpop.f32.mrb[0].mxu0 }
 0x19e   : > { %v2865_v1 = vadd.f32 %v2799_v37, %v2695_v34  ;;  %v1802_v40 = vpop.f32.mrb[1].mxu0 }
 0x19f   : > { %v2866_v41 = vadd.f32 %v1802_v40, %v1183_v35 }
 0x1a0   : > { %v2001_v30 = vadd.f32 %v2865_v1, %v3767_v25 }
 0x1a1   : > { %v2000_v31 = vadd.f32 %v2866_v41, %v3767_v25  ;;  %v2802_v46 = vpop.f32.mrb[2].mxu0 }
 0x1a2   : > { %2033 = vst.msk [vmem:[%s3773_s21 + $0x8] sm:$0xff] %vm816_vm4, %v2001_v30  ;;  %v2073_v47 = vsel %vm816_vm4, %v2001_v30, 0.0  ;;  %v2146_v15 = vmul.f32 %v2001_v30, %v2001_v30  ;;  %v2867_v16 = vadd.f32 %v2802_v46, %v2698_v23  ;;  %v1812_v21 = vpop.f32.mrb[3].mxu0 }
 0x1a3   : > { %2032 = vst.msk [vmem:[%s3773_s21] sm:$0xff] %vm816_vm4, %v2000_v31  ;;  %v2072_v22 = vsel %vm816_vm4, %v2000_v31, 0.0  ;;  %v2145_v9 = vmul.f32 %v2000_v31, %v2000_v31  ;;  %v2868_v6 = vadd.f32 %v1812_v21, %v1193_v43 }
 0x1a4   : > { %v2178_v38 = vsel %vm816_vm4, %v2146_v15, 0.0  ;;  %v2074_v39 = vadd.f32 %v2073_v47, %v2072_v22  ;;  %v2003_v7 = vadd.f32 %v2867_v16, %v3767_v25 }
 0x1a5   : > { %v2177_v44 = vsel %vm816_vm4, %v2145_v9, 0.0  ;;  %v2002_v5 = vadd.f32 %v2868_v6, %v3767_v25  ;;  %v2805_v50 = vpop.f32.mrb[4].mxu0 }
 0x1a6   : > { %v2179_v55 = vadd.f32 %v2178_v38, %v2177_v44  ;;  %2035 = vst.msk [vmem:[%s3773_s21 + $0x18] sm:$0xff] %vm816_vm4, %v2003_v7  ;;  %v2148_v51 = vmul.f32 %v2003_v7, %v2003_v7  ;;  %v2869_v52 = vadd.f32 %v2805_v50, %v2701_v13  ;;  %v1822_v32 = vpop.f32.mrb[5].mxu0  ;;  %v2077_v24 = vsel %vm816_vm4, %v2003_v7, 0.0 }
 0x1a7   : > { %2034 = vst.msk [vmem:[%s3773_s21 + $0x10] sm:$0xff] %vm816_vm4, %v2002_v5  ;;  %v2075_v33 = vsel %vm816_vm4, %v2002_v5, 0.0  ;;  %v2147_v59 = vmul.f32 %v2002_v5, %v2002_v5  ;;  %v2870_v42 = vadd.f32 %v1822_v32, %v1203_v19 }
 0x1a8   : > { %v2076_v58 = vadd.f32 %v2075_v33, %v2074_v39  ;;  %v2005_v56 = vadd.f32 %v2869_v52, %v3767_v25  ;;  %v2182_v49 = vsel %vm816_vm4, %v2148_v51, 0.0 }
 0x1a9   : > { %v2180_v0 = vsel %vm816_vm4, %v2147_v59, 0.0  ;;  %v2004_v17 = vadd.f32 %v2870_v42, %v3767_v25  ;;  %v2808_v18 = vpop.f32.mrb[6].mxu0 }
 0x1aa   : > { %v2181_v48 = vadd.f32 %v2180_v0, %v2179_v55  ;;  %2037 = vst.msk [vmem:[%s3773_s21 + $0x28] sm:$0xff] %vm816_vm4, %v2005_v56  ;;  %v2150_v26 = vmul.f32 %v2005_v56, %v2005_v56  ;;  %v2078_v27 = vadd.f32 %v2077_v24, %v2076_v58  ;;  %v1832_v45 = vpop.f32.mrb[7].mxu0  ;;  %v2871_v2 = vadd.f32 %v2808_v18, %v3728_v28 }
 0x1ab   : > { %2036 = vst.msk [vmem:[%s3773_s21 + $0x20] sm:$0xff] %vm816_vm4, %v2004_v17  ;;  %v2079_v11 = vsel %vm816_vm4, %v2004_v17, 0.0  ;;  %v2149_v12 = vmul.f32 %v2004_v17, %v2004_v17  ;;  %v2872_v60 = vadd.f32 %v1832_v45, %v3730_v29  ;;  %v2081_v62 = vsel %vm816_vm4, %v2005_v56, 0.0 }
 0x1ac   : > { %v2080_v3 = vadd.f32 %v2079_v11, %v2078_v27  ;;  %v2183_v61 = vadd.f32 %v2182_v49, %v2181_v48  ;;  %v2007_v34 = vadd.f32 %v2871_v2, %v3767_v25  ;;  %v2186_v28 = vsel %vm816_vm4, %v2150_v26, 0.0 }
 0x1ad   : > { %v2184_v63 = vsel %vm816_vm4, %v2149_v12, 0.0  ;;  %v2006_v35 = vadd.f32 %v2872_v60, %v3767_v25  ;;  %v2811_v23 = vpop.f32.mrb[8].mxu0 }
 0x1ae   : > { %v2185_v43 = vadd.f32 %v2184_v63, %v2183_v61  ;;  %v2082_v13 = vadd.f32 %v2081_v62, %v2080_v3  ;;  %v2873_v19 = vadd.f32 %v2811_v23, %v3744_v20  ;;  %v1842_v14 = vpop.f32.mrb[9].mxu0  ;;  %2039 = vst.msk [vmem:[%s3773_s21 + $0x38] sm:$0xff] %vm816_vm4, %v2007_v34  ;;  %v2152_v29 = vmul.f32 %v2007_v34, %v2007_v34 }
 0x1af   : > { %2038 = vst.msk [vmem:[%s3773_s21 + $0x30] sm:$0xff] %vm816_vm4, %v2006_v35  ;;  %v2083_v37 = vsel %vm816_vm4, %v2006_v35, 0.0  ;;  %v2151_v1 = vmul.f32 %v2006_v35, %v2006_v35  ;;  %v2874_v31 = vadd.f32 %v1842_v14, %v3750_v53  ;;  %v2085_v47 = vsel %vm816_vm4, %v2007_v34, 0.0 }
 0x1b0   : > { %v2084_v40 = vadd.f32 %v2083_v37, %v2082_v13  ;;  %v2187_v41 = vadd.f32 %v2186_v28, %v2185_v43  ;;  %v2009_v30 = vadd.f32 %v2873_v19, %v3767_v25  ;;  %v2190_v15 = vsel %vm816_vm4, %v2152_v29, 0.0 }
 0x1b1   : > { %v2188_v20 = vsel %vm816_vm4, %v2151_v1, 0.0  ;;  %v2814_v46 = vpop.f32.mrb[10].mxu0  ;;  %v2008_v21 = vadd.f32 %v2874_v31, %v3767_v25 }
 0x1b2   : > { %v2189_v16 = vadd.f32 %v2188_v20, %v2187_v41  ;;  %2041 = vst.msk [vmem:[%s3773_s21 + $0x48] sm:$0xff] %vm816_vm4, %v2009_v30  ;;  %v1852_v22 = vpop.f32.mrb[11].mxu0  ;;  %v2154_v9 = vmul.f32 %v2009_v30, %v2009_v30  ;;  %v2086_v6 = vadd.f32 %v2085_v47, %v2084_v40  ;;  %v2875_v38 = vadd.f32 %v2814_v46, %v3752_v54 }
 0x1b3   : > { %v2876_v53 = vadd.f32 %v1852_v22, %v3754_v8  ;;  %2040 = vst.msk [vmem:[%s3773_s21 + $0x40] sm:$0xff] %vm816_vm4, %v2008_v21  ;;  %v2087_v39 = vsel %vm816_vm4, %v2008_v21, 0.0  ;;  %v2153_v7 = vmul.f32 %v2008_v21, %v2008_v21  ;;  %v2089_v52 = vsel %vm816_vm4, %v2009_v30, 0.0 }
 0x1b4   : > { %v2191_v44 = vadd.f32 %v2190_v15, %v2189_v16  ;;  %v2088_v5 = vadd.f32 %v2087_v39, %v2086_v6  ;;  %v2011_v50 = vadd.f32 %v2875_v38, %v3767_v25  ;;  %v2194_v33 = vsel %vm816_vm4, %v2154_v9, 0.0 }
 0x1b5   : > { %v2010_v55 = vadd.f32 %v2876_v53, %v3767_v25  ;;  %v2817_v51 = vpop.f32.mrb[12].mxu0  ;;  %v2192_v54 = vsel %vm816_vm4, %v2153_v7, 0.0 }
 0x1b6   : > { %v2877_v32 = vadd.f32 %v2817_v51, %v3756_v10  ;;  %v1862_v8 = vpop.f32.mrb[13].mxu0  ;;  %v2193_v59 = vadd.f32 %v2192_v54, %v2191_v44  ;;  %2043 = vst.msk [vmem:[%s3773_s21 + $0x58] sm:$0xff] %vm816_vm4, %v2011_v50  ;;  %v2156_v42 = vmul.f32 %v2011_v50, %v2011_v50  ;;  %v2090_v58 = vadd.f32 %v2089_v52, %v2088_v5 }
 0x1b7   : > { %2042 = vst.msk [vmem:[%s3773_s21 + $0x50] sm:$0xff] %vm816_vm4, %v2010_v55  ;;  %v2091_v56 = vsel %vm816_vm4, %v2010_v55, 0.0  ;;  %v2155_v24 = vmul.f32 %v2010_v55, %v2010_v55  ;;  %v2878_v17 = vadd.f32 %v1862_v8, %v3758_v57  ;;  %v2093_v48 = vsel %vm816_vm4, %v2011_v50, 0.0 }
 0x1b8   : > { %v2013_v0 = vadd.f32 %v2877_v32, %v3767_v25  ;;  %v2092_v10 = vadd.f32 %v2091_v56, %v2090_v58  ;;  %v2195_v18 = vadd.f32 %v2194_v33, %v2193_v59  ;;  %v2198_v57 = vsel %vm816_vm4, %v2156_v42, 0.0 }
 0x1b9   : > { %v2820_v49 = vpop.f32.mrb[14].mxu0  ;;  %v2196_v26 = vsel %vm816_vm4, %v2155_v24, 0.0  ;;  %v2012_v27 = vadd.f32 %v2878_v17, %v3767_v25 }
 0x1ba   : > { %2045 = vst.msk [vmem:[%s3773_s21 + $0x68] sm:$0xff] %vm816_vm4, %v2013_v0  ;;  %v1872_v45 = vpop.f32.mrb[15].mxu0  ;;  %v2197_v11 = vadd.f32 %v2196_v26, %v2195_v18  ;;  %v2094_v12 = vadd.f32 %v2093_v48, %v2092_v10  ;;  %v2879_v2 = vadd.f32 %v2820_v49, %v3760_v4  ;;  %v2158_v3 = vmul.f32 %v2013_v0, %v2013_v0 }
 0x1bb   : > { %v2880_v60 = vadd.f32 %v1872_v45, %v3762_v36  ;;  %2044 = vst.msk [vmem:[%s3773_s21 + $0x60] sm:$0xff] %vm816_vm4, %v2012_v27  ;;  %v2095_v61 = vsel %vm816_vm4, %v2012_v27, 0.0  ;;  %v2157_v62 = vmul.f32 %v2012_v27, %v2012_v27  ;;  %v2097_v4 = vsel %vm816_vm4, %v2013_v0, 0.0 }
 0x1bc   : > { %v2096_v63 = vadd.f32 %v2095_v61, %v2094_v12  ;;  %v2199_v34 = vadd.f32 %v2198_v57, %v2197_v11  ;;  %v2015_v35 = vadd.f32 %v2879_v2, %v3767_v25  ;;  %v2202_v28 = vsel %vm816_vm4, %v2158_v3, 0.0 }
 0x1bd   : > { %v2014_v23 = vadd.f32 %v2880_v60, %v3767_v25  ;;  %v2823_v43 = vpop.f32.mrb[16].mxu0  ;;  %v2200_v36 = vsel %vm816_vm4, %v2157_v62, 0.0 }
 0x1be   : > { %v1882_v13 = vpop.f32.mrb[17].mxu0  ;;  %v2201_v19 = vadd.f32 %v2200_v36, %v2199_v34  ;;  %2047 = vst.msk [vmem:[%s3773_s21 + $0x78] sm:$0xff] %vm816_vm4, %v2015_v35  ;;  %v2098_v14 = vadd.f32 %v2097_v4, %v2096_v63  ;;  %v2160_v29 = vmul.f32 %v2015_v35, %v2015_v35  ;;  %v2101_v31 = vsel %vm816_vm4, %v2015_v35, 0.0 }
 0x1bf   : > { %2046 = vst.msk [vmem:[%s3773_s21 + $0x70] sm:$0xff] %vm816_vm4, %v2014_v23  ;;  %v2099_v37 = vsel %vm816_vm4, %v2014_v23, 0.0  ;;  %v2159_v1 = vmul.f32 %v2014_v23, %v2014_v23 }
 0x1c0   : > { %v2100_v40 = vadd.f32 %v2099_v37, %v2098_v14  ;;  %v2203_v41 = vadd.f32 %v2202_v28, %v2201_v19  ;;  %v2206_v16 = vsel %vm816_vm4, %v2160_v29, 0.0 }
 0x1c1   : > { %v2826_v30 = vpop.f32.mrb[18].mxu0  ;;  %v2204_v20 = vsel %vm816_vm4, %v2159_v1, 0.0 }
 0x1c2   : > { %v1892_v46 = vpop.f32.mrb[19].mxu0  ;;  %v2205_v47 = vadd.f32 %v2204_v20, %v2203_v41  ;;  %v2102_v15 = vadd.f32 %v2101_v31, %v2100_v40 }
 0x1c4   : > { %v2207_v22 = vadd.f32 %v2206_v16, %v2205_v47 }
 0x1c5   : > { %v2829_v21 = vpop.f32.mrb[20].mxu0 }
 0x1c6   : > { %v1902_v9 = vpop.f32.mrb[21].mxu0 }
 0x1c9   : > { %v2832_v6 = vpop.f32.mrb[22].mxu0 }
 0x1ca   : > { %v1912_v38 = vpop.f32.mrb[23].mxu0 }
 0x1cd   : > { %v3865_v53 = vpop.f32.mrb[24].mxu0 }
 0x1ce   : > { %v3867_v39 = vpop.f32.mrb[25].mxu0 }
 0x1d1   : > { %v3869_v7 = vpop.f32.mrb[26].mxu0 }
 0x1d2   : > { %v3871_v44 = vpop.f32.mrb[27].mxu0 }
 0x1d5   : > { %v3873_v5 = vpop.f32.mrb[28].mxu0 }
 0x1d6   : > { %v3875_v50 = vpop.f32.mrb[29].mxu0 }
 0x1d9   : > { %v3877_v55 = vpop.f32.mrb[30].mxu0 }
 0x1da   : > { %v2771_v51 = vpop.f32.mrb[16].mxu1  ;;  %v3879_v52 = vpop.f32.mrb[31].mxu0 }
 0x1db   : > { %v2881_v54 = vadd.f32 %v2823_v43, %v2771_v51  ;;  %v1571_v32 = vpop.f32.mrb[17].mxu1 }
 0x1dc   : > { %v2882_v8 = vadd.f32 %v1882_v13, %v1571_v32 }
 0x1dd   : > { %v2017_v33 = vadd.f32 %v2881_v54, %v3767_v25 }
 0x1de   : > { %v2016_v59 = vadd.f32 %v2882_v8, %v3767_v25  ;;  %v2774_v42 = vpop.f32.mrb[18].mxu1 }
 0x1df   : > { %2049 = vst.msk [vmem:[%s3773_s21 + $0x88] sm:$0xff] %vm816_vm4, %v2017_v33  ;;  %v2162_v58 = vmul.f32 %v2017_v33, %v2017_v33  ;;  %v2883_v56 = vadd.f32 %v2826_v30, %v2774_v42  ;;  %v1581_v24 = vpop.f32.mrb[19].mxu1  ;;  %v2105_v48 = vsel %vm816_vm4, %v2017_v33, 0.0 }
 0x1e0   : > { %2048 = vst.msk [vmem:[%s3773_s21 + $0x80] sm:$0xff] %vm816_vm4, %v2016_v59  ;;  %v2103_v0 = vsel %vm816_vm4, %v2016_v59, 0.0  ;;  %v2161_v17 = vmul.f32 %v2016_v59, %v2016_v59  ;;  %v2884_v10 = vadd.f32 %v1892_v46, %v1581_v24 }
 0x1e1   : > { %v2104_v18 = vadd.f32 %v2103_v0, %v2102_v15  ;;  %v2019_v49 = vadd.f32 %v2883_v56, %v3767_v25  ;;  %v2210_v11 = vsel %vm816_vm4, %v2162_v58, 0.0 }
 0x1e2   : > { %v2208_v26 = vsel %vm816_vm4, %v2161_v17, 0.0  ;;  %v2018_v27 = vadd.f32 %v2884_v10, %v3767_v25  ;;  %v2777_v45 = vpop.f32.mrb[20].mxu1 }
 0x1e3   : > { %v2209_v12 = vadd.f32 %v2208_v26, %v2207_v22  ;;  %2051 = vst.msk [vmem:[%s3773_s21 + $0x98] sm:$0xff] %vm816_vm4, %v2019_v49  ;;  %v2164_v2 = vmul.f32 %v2019_v49, %v2019_v49  ;;  %v2106_v60 = vadd.f32 %v2105_v48, %v2104_v18  ;;  %v1591_v57 = vpop.f32.mrb[21].mxu1  ;;  %v2885_v62 = vadd.f32 %v2829_v21, %v2777_v45 }
 0x1e4   : > { %2050 = vst.msk [vmem:[%s3773_s21 + $0x90] sm:$0xff] %vm816_vm4, %v2018_v27  ;;  %v2107_v3 = vsel %vm816_vm4, %v2018_v27, 0.0  ;;  %v2163_v61 = vmul.f32 %v2018_v27, %v2018_v27  ;;  %v2886_v63 = vadd.f32 %v1902_v9, %v1591_v57  ;;  %v2109_v23 = vsel %vm816_vm4, %v2019_v49, 0.0 }
 0x1e5   : > { %v2108_v34 = vadd.f32 %v2107_v3, %v2106_v60  ;;  %v2211_v35 = vadd.f32 %v2210_v11, %v2209_v12  ;;  %v2021_v4 = vadd.f32 %v2885_v62, %v3767_v25  ;;  %v2214_v37 = vsel %vm816_vm4, %v2164_v2, 0.0 }
 0x1e6   : > { %v2212_v43 = vsel %vm816_vm4, %v2163_v61, 0.0  ;;  %v2020_v36 = vadd.f32 %v2886_v63, %v3767_v25  ;;  %v2780_v13 = vpop.f32.mrb[22].mxu1 }
 0x1e7   : > { %v2213_v19 = vadd.f32 %v2212_v43, %v2211_v35  ;;  %v2110_v14 = vadd.f32 %v2109_v23, %v2108_v34  ;;  %v2887_v28 = vadd.f32 %v2832_v6, %v2780_v13  ;;  %v1601_v29 = vpop.f32.mrb[23].mxu1  ;;  %2053 = vst.msk [vmem:[%s3773_s21 + $0xa8] sm:$0xff] %vm816_vm4, %v2021_v4  ;;  %v2166_v1 = vmul.f32 %v2021_v4, %v2021_v4 }
 0x1e8   : > { %2052 = vst.msk [vmem:[%s3773_s21 + $0xa0] sm:$0xff] %vm816_vm4, %v2020_v36  ;;  %v2111_v40 = vsel %vm816_vm4, %v2020_v36, 0.0  ;;  %v2165_v41 = vmul.f32 %v2020_v36, %v2020_v36  ;;  %v2888_v46 = vadd.f32 %v1912_v38, %v1601_v29  ;;  %v2113_v16 = vsel %vm816_vm4, %v2021_v4, 0.0 }
 0x1e9   : > { %v2112_v30 = vadd.f32 %v2111_v40, %v2110_v14  ;;  %v2215_v31 = vadd.f32 %v2214_v37, %v2213_v19  ;;  %v2023_v20 = vadd.f32 %v2887_v28, %v3767_v25  ;;  %v2218_v21 = vsel %vm816_vm4, %v2166_v1, 0.0 }
 0x1ea   : > { %v2216_v47 = vsel %vm816_vm4, %v2165_v41, 0.0  ;;  %v2783_v15 = vpop.f32.mrb[24].mxu1  ;;  %v2022_v9 = vadd.f32 %v2888_v46, %v3767_v25 }
 0x1eb   : > { %v2217_v22 = vadd.f32 %v2216_v47, %v2215_v31  ;;  %2055 = vst.msk [vmem:[%s3773_s21 + $0xb8] sm:$0xff] %vm816_vm4, %v2023_v20  ;;  %v1611_v6 = vpop.f32.mrb[25].mxu1  ;;  %v2168_v51 = vmul.f32 %v2023_v20, %v2023_v20  ;;  %v2114_v54 = vadd.f32 %v2113_v16, %v2112_v30  ;;  %v2889_v32 = vadd.f32 %v3865_v53, %v2783_v15 }
 0x1ec   : > { %v2890_v38 = vadd.f32 %v3867_v39, %v1611_v6  ;;  %2054 = vst.msk [vmem:[%s3773_s21 + $0xb0] sm:$0xff] %vm816_vm4, %v2022_v9  ;;  %v2115_v8 = vsel %vm816_vm4, %v2022_v9, 0.0  ;;  %v2167_v33 = vmul.f32 %v2022_v9, %v2022_v9  ;;  %v2117_v0 = vsel %vm816_vm4, %v2023_v20, 0.0 }
 0x1ed   : > { %v2219_v59 = vadd.f32 %v2218_v21, %v2217_v22  ;;  %v2116_v42 = vadd.f32 %v2115_v8, %v2114_v54  ;;  %v2025_v58 = vadd.f32 %v2889_v32, %v3767_v25  ;;  %v2222_v10 = vsel %vm816_vm4, %v2168_v51, 0.0 }
 0x1ee   : > { %v2024_v56 = vadd.f32 %v2890_v38, %v3767_v25  ;;  %v2786_v24 = vpop.f32.mrb[26].mxu1  ;;  %v2220_v53 = vsel %vm816_vm4, %v2167_v33, 0.0 }
 0x1ef   : > { %v2891_v17 = vadd.f32 %v3869_v7, %v2786_v24  ;;  %v1621_v39 = vpop.f32.mrb[27].mxu1  ;;  %v2221_v18 = vadd.f32 %v2220_v53, %v2219_v59  ;;  %2057 = vst.msk [vmem:[%s3773_s21 + $0xc8] sm:$0xff] %vm816_vm4, %v2025_v58  ;;  %v2170_v49 = vmul.f32 %v2025_v58, %v2025_v58  ;;  %v2118_v48 = vadd.f32 %v2117_v0, %v2116_v42 }
 0x1f0   : > { %2056 = vst.msk [vmem:[%s3773_s21 + $0xc0] sm:$0xff] %vm816_vm4, %v2024_v56  ;;  %v2119_v26 = vsel %vm816_vm4, %v2024_v56, 0.0  ;;  %v2169_v27 = vmul.f32 %v2024_v56, %v2024_v56  ;;  %v2892_v11 = vadd.f32 %v3871_v44, %v1621_v39  ;;  %v2121_v60 = vsel %vm816_vm4, %v2025_v58, 0.0 }
 0x1f1   : > { %v2027_v45 = vadd.f32 %v2891_v17, %v3767_v25  ;;  %v2120_v7 = vadd.f32 %v2119_v26, %v2118_v48  ;;  %v2223_v12 = vadd.f32 %v2222_v10, %v2221_v18  ;;  %v2226_v44 = vsel %vm816_vm4, %v2170_v49, 0.0  ;;  %v2071_v26 = vld [vmem:[%s3736_s14] sm:$0x1] }
 0x1f2   : > { %v2789_v2 = vpop.f32.mrb[28].mxu1  ;;  %v2224_v57 = vsel %vm816_vm4, %v2169_v27, 0.0  ;;  %v2026_v61 = vadd.f32 %v2892_v11, %v3767_v25  ;;  %v2144_v11 = vld [vmem:[%s3742_s17] sm:$0x1] }
 0x1f3   : > { %2059 = vst.msk [vmem:[%s3773_s21 + $0xd8] sm:$0xff] %vm816_vm4, %v2027_v45  ;;  %v2172_v3 = vmul.f32 %v2027_v45, %v2027_v45  ;;  %v1631_v62 = vpop.f32.mrb[29].mxu1  ;;  %v2225_v63 = vadd.f32 %v2224_v57, %v2223_v12  ;;  %v2122_v34 = vadd.f32 %v2121_v60, %v2120_v7  ;;  %v2893_v35 = vadd.f32 %v3873_v5, %v2789_v2 }
 0x1f4   : > { %v2894_v23 = vadd.f32 %v3875_v50, %v1631_v62  ;;  %2058 = vst.msk [vmem:[%s3773_s21 + $0xd0] sm:$0xff] %vm816_vm4, %v2026_v61  ;;  %v2123_v43 = vsel %vm816_vm4, %v2026_v61, 0.0  ;;  %v2171_v4 = vmul.f32 %v2026_v61, %v2026_v61  ;;  %v2125_v5 = vsel %vm816_vm4, %v2027_v45, 0.0 }
 0x1f5   : > { %v2124_v36 = vadd.f32 %v2123_v43, %v2122_v34  ;;  %v2227_v13 = vadd.f32 %v2226_v44, %v2225_v63  ;;  %v2029_v19 = vadd.f32 %v2893_v35, %v3767_v25  ;;  %v2230_v1 = vsel %vm816_vm4, %v2172_v3, 0.0 }
 0x1f6   : > { %v2028_v14 = vadd.f32 %v2894_v23, %v3767_v25  ;;  %v2792_v28 = vpop.f32.mrb[30].mxu1  ;;  %v2228_v50 = vsel %vm816_vm4, %v2171_v4, 0.0 }
 0x1f7   : > { %v2895_v29 = vadd.f32 %v3877_v55, %v2792_v28  ;;  %v1641_v37 = vpop.f32.mrb[31].mxu1  ;;  %v2229_v40 = vadd.f32 %v2228_v50, %v2227_v13  ;;  %2061 = vst.msk [vmem:[%s3773_s21 + $0xe8] sm:$0xff] %vm816_vm4, %v2029_v19  ;;  %v2174_v41 = vmul.f32 %v2029_v19, %v2029_v19  ;;  %v2126_v30 = vadd.f32 %v2125_v5, %v2124_v36 }
 0x1f8   : > { %2060 = vst.msk [vmem:[%s3773_s21 + $0xe0] sm:$0xff] %vm816_vm4, %v2028_v14  ;;  %v2127_v31 = vsel %vm816_vm4, %v2028_v14, 0.0  ;;  %v2173_v20 = vmul.f32 %v2028_v14, %v2028_v14  ;;  %v2896_v47 = vadd.f32 %v3879_v52, %v1641_v37  ;;  %v2129_v16 = vsel %vm816_vm4, %v2029_v19, 0.0 }
 0x1f9   : > { %v2031_v46 = vadd.f32 %v2895_v29, %v3767_v25  ;;  %v2128_v55 = vadd.f32 %v2127_v31, %v2126_v30  ;;  %v2231_v15 = vadd.f32 %v2230_v1, %v2229_v40  ;;  %v2234_v51 = vsel %vm816_vm4, %v2174_v41, 0.0 }
 0x1fa   : > { %v2232_v21 = vsel %vm816_vm4, %v2173_v20, 0.0  ;;  %v2030_v22 = vadd.f32 %v2896_v47, %v3767_v25 }
 0x1fb   : > { %2063 = vst.msk [vmem:[%s3773_s21 + $0xf8] sm:$0xff] %vm816_vm4, %v2031_v46  ;;  %v2233_v9 = vadd.f32 %v2232_v21, %v2231_v15  ;;  %v2130_v6 = vadd.f32 %v2129_v16, %v2128_v55  ;;  %v2176_v54 = vmul.f32 %v2031_v46, %v2031_v46  ;;  %v2133_v33 = vsel %vm816_vm4, %v2031_v46, 0.0 }
 0x1fc   : > { %2062 = vst.msk [vmem:[%s3773_s21 + $0xf0] sm:$0xff] %vm816_vm4, %v2030_v22  ;;  %v2131_v32 = vsel %vm816_vm4, %v2030_v22, 0.0  ;;  %v2175_v52 = vmul.f32 %v2030_v22, %v2030_v22 }
 0x1fd   : > { %v2132_v38 = vadd.f32 %v2131_v32, %v2130_v6  ;;  %v2235_v8 = vadd.f32 %v2234_v51, %v2233_v9  ;;  %v2238_v58 = vsel %vm816_vm4, %v2176_v54, 0.0 }
 0x1fe   : > { %v2236_v59 = vsel %vm816_vm4, %v2175_v52, 0.0 }
 0x1ff   : > { %v2134_v42 = vadd.f32 %v2133_v33, %v2132_v38  ;;  %v2237_v25 = vadd.f32 %v2236_v59, %v2235_v8 }
 0x201   : > { %v2135_v56 = vrot.slane %v2134_v42, 4  ;;  %v2239_v24 = vadd.f32 %v2238_v58, %v2237_v25 }
 0x203   : > { %v2136_v0 = vadd.f32 %v2135_v56, %v2134_v42  ;;  %v2240_v53 = vrot.slane %v2239_v24, 4 }
 0x205   : > { %v2137_v17 = vrot.slane %v2136_v0, 2  ;;  %v2241_v39 = vadd.f32 %v2240_v53, %v2239_v24 }
 0x207   : > { %v2138_v10 = vadd.f32 %v2137_v17, %v2136_v0  ;;  %v2242_v18 = vrot.slane %v2241_v39, 2 }
 0x209   : > { %v2139_v49 = vrot.slane %v2138_v10, 1  ;;  %v2243_v48 = vadd.f32 %v2242_v18, %v2241_v39 }
 0x20b   : > { %v2140_v27 = vadd.f32 %v2139_v49, %v2138_v10  ;;  %v2244_v45 = vrot.slane %v2243_v48, 1 }
 0x20d   : > { %v2141_v7 = vadd.f32 %v2140_v27, %v2071_v26  ;;  %v2245_v12 = vadd.f32 %v2244_v45, %v2243_v48 }
 0x20f   : > { %2143 = vst.msk [vmem:[%s3736_s14] sm:$0x1] %vm2068_vm8, %v2141_v7  ;;  %v2246_v2 = vadd.f32 %v2245_v12, %v2144_v11 }
 0x211   : > { %2247 = vst.msk [vmem:[%s3742_s17] sm:$0x1] %vm2068_vm8, %v2246_v2 }
 0x212 PF: > { %s18_s26 = sadd.s32 1, %s2979_s26   ;;  %s3994_s24 = smov %s2975_s25 }
 0x213   : > { %p15_p5 = scmp.ge.s32.totalorder %s18_s26, 4   ;;  %s3995_s25 = smov %s3997_s27 }
 0x215   :  { %17 = sbr.rel (!%p15_p5) target bundleno = 2 (0x2), region = 106 }

// kernel: double_conv.4
= control target key start
LH: loop header
LB: loop body
LE: loop exit
PB: predicated region body
PF: predicated region fallthrough
CT: control target
= control target key end

     0   :  { %s3208_s30 = smov 0   ;;  %s3210_s10 = smov 0   ;;  %s4310_s0 = inlined_call_operand.vmem [shape: f32[2,16,16,8], index: 0, kind: input, shape index: {}, may-alias: {0,1,2}]   ;;  %s4311_s1 = inlined_call_operand.vmem [shape: f32[2,16,16,8], index: 1, kind: input, shape index: {}, may-alias: {0,1,2}]   ;;  %s4312_s2 = inlined_call_operand.vmem [shape: f32[2,16,16,8], index: 2, kind: input, shape index: {}, may-alias: {0,1,2}]   ;;  %s4313_s3 = inlined_call_operand.vmem [shape: f32[3,24,8], index: 3, kind: input, shape index: {}]   ;;  %s4314_s4 = inlined_call_operand.vmem [shape: f32[1,8], index: 4, kind: input, shape index: {}]   ;;  %s4315_s5 = inlined_call_operand.vmem [shape: f32[1,8], index: 5, kind: input, shape index: {}]   ;;  %s4316_s6 = inlined_call_operand.vmem [shape: f32[1,8], index: 6, kind: input, shape index: {}]   ;;  %s4317_s7 = inlined_call_operand.vmem [shape: f32[2,16,16,8], index: 7, kind: output, shape index: {0}]   ;;  %s4318_s8 = inlined_call_operand.vmem [shape: f32[2,1,1,8], index: 8, kind: output, shape index: {1}]   ;;  %s4319_s9 = inlined_call_operand.vmem [shape: f32[2,1,1,8], index: 9, kind: output, shape index: {2}]  }
   0x1   :  { %s3212_s11 = smov 0  }
   0x2 LB: > { %s39_s12 = sadd.s32 1, %s3149_s10  ;;  %p2635_p0 = scmp.ge.s32.totalorder %s3153_s11, 1  ;;  %s3153_s11 = sphi %s3212_s11, %s20_s11   ;;  %s3149_s10 = sphi %s3210_s10, %s4321_s10   ;;  %s3145_s30 = sphi %s3208_s30, %s4320_s30  }
   0x3   : > { %p41_p1 = scmp.ge.s32.totalorder %s39_s12, 2  ;;  %p403_p2 = scmp.lt.s32.totalorder %s3153_s11, 3 }
   0x5   : > { %s4323_s12 = smov (%p41_p1, %s39_s12), 0  ;;  %p404_p3 = pnand %p2635_p0, %p403_p2 }
   0x6   : > { %p493_p4 = scmp.lt.s32.totalorder (!%p404_p3), %s3145_s30, 1  ;;  %v2646_v0 = vld [vmem:[%s4313_s3 + $0x18] sm:$0xff] (!%p404_p3)  ;;  %v2647_v1 = vld [vmem:[%s4313_s3 + $0x20] sm:$0xff] (!%p404_p3)  ;;  %v1220_v4 = vld [vmem:[%s4313_s3 + $0x8] sm:$0xff] (!%p404_p3)  ;;  %s3155_s14 = smov (!%p404_p3), 16   ;;  %vm959_vm0 = vcmask (!%p404_p3), 64512  }
   0x7   : > { %407 = sbr.rel (%p404_p3) target bundleno = 536 (0x218), region = 48  ;;  %v3024_v2 = vpack.c.bf16 (!%p404_p3), %v2647_v1, %v2646_v0  ;;  %v1219_v3 = vld [vmem:[%s4313_s3] sm:$0xff] (!%p404_p3)  ;;  %v2648_v6 = vld [vmem:[%s4313_s3 + $0x28] sm:$0xff] (!%p404_p3)  ;;  %s3156_s15 = smov (!%p404_p3), 8   ;;  %v3315_v38 = vld [vmem:[%s4313_s3 + $0x10] sm:$0xff] (!%p404_p3)  ;;  %vm992_vm1 = vcmask (!%p404_p3), 130048  }
   0x8   : > { %v3240_v5 = vpack.c.bf16 (!%p404_p3), %v1220_v4, %v1219_v3  ;;  %v3251_v7 = vld [vmem:[%s4315_s5] ss:$0 sm:$0xff] (!%p404_p3)  ;;  %vm1226_vm2 = vcmask (!%p404_p3), 195584   ;;  %vm1057_vm3 = vcmask (!%p404_p3), 1040384   ;;  %vm1138_vm4 = vcmask (!%p404_p3), 1046528  }
   0x9   : > { %3025 = vmatprep.subr.bf16.mxu1 (!%p404_p3), %v3024_v2  ;;  %v3262_v8 = vld [vmem:[%s4316_s6] ss:$0 sm:$0xff] (!%p404_p3)  ;;  %vm2237_vm5 = vcmask (!%p404_p3), 57344  }
   0xa   : > { %3027 = vmatpush3.bf16.msra.mxu1 (!%p404_p3), %v3024_v2  ;;  %3029 = vmatprep.subr.bf16.mxu0 (!%p404_p3), %v3240_v5 }
   0xb   : > { %2866 = vmatprep.subr.mxu1 (!%p404_p3), %v2648_v6  ;;  %3031 = vmatpush3.bf16.msra.mxu0 (!%p404_p3), %v3240_v5 }
   0xc   : > { %2920 = vmatprep.subr.mxu0 (!%p404_p3), %v3315_v38 }
   0xe   : > { %s4325_s30 = smov (!%p493_p4, %s3145_s30), 1  ;;  %2867 = vmatpush3.msra.mxu1 %v2648_v6 }
   0xf   : > { %s3246_s23 = sshll.u32 %s4325_s30, 8  ;;  %3036 = vmatprep.subr.bf16.mxu1 %v3240_v5  ;;  %2921 = vmatpush3.msra.mxu0 %v3315_v38  ;;  %s4062_s17 = scalar_lea.vmem %s4318_s8, %s4325_s30 }
  0x10   : > { %s3257_s28 = scalar_lea.vmem %s4310_s0, %s3246_s23  ;;  %s3354_s20 = scalar_lea.vmem %s4311_s1, %s3246_s23 }
  0x11   : > { %v570_v9 = vld [vmem:[%s3257_s28 + $0x10] sm:$0xff]  ;;  %v568_v10 = vld [vmem:[%s3257_s28] sm:$0xff]  ;;  %v571_v11 = vld [vmem:[%s3257_s28 + $0x18] sm:$0xff]  ;;  %s2754_s21 = sadd.s32 240, %s3246_s23 }
  0x12   : > { %v609_v12 = vmul.f32 %v3251_v7, %v570_v9  ;;  %v607_v13 = vmul.f32 %v3251_v7, %v568_v10  ;;  %v610_v14 = vmul.f32 %v3251_v7, %v571_v11  ;;  %v569_v15 = vld [vmem:[%s3257_s28 + $0x8] sm:$0xff]  ;;  %v572_v22 = vld [vmem:[%s3257_s28 + $0x20] sm:$0xff]  ;;  %v575_v29 = vld [vmem:[%s3257_s28 + $0x38] sm:$0xff]  ;;  %s536_s25 = scalar_lea.vmem %s4312_s2, %s2754_s21 }
  0x13   : > { %v608_v16 = vmul.f32 %v3251_v7, %v569_v15  ;;  %v573_v21 = vld [vmem:[%s3257_s28 + $0x28] sm:$0xff]  ;;  %v611_v28 = vmul.f32 %v3251_v7, %v572_v22  ;;  %v574_v30 = vld [vmem:[%s3257_s28 + $0x30] sm:$0xff]  ;;  %v587_v31 = vld [vmem:[%s3257_s28 + $0x98] sm:$0xff]  ;;  %v614_v35 = vmul.f32 %v3251_v7, %v575_v29 }
  0x14   : > { %v648_v17 = vadd.f32 %v3262_v8, %v609_v12  ;;  %v3276_v18 = vadd.f32 %v3262_v8, %v607_v13  ;;  %v649_v19 = vadd.f32 %v3262_v8, %v610_v14  ;;  %v612_v27 = vmul.f32 %v3251_v7, %v573_v21  ;;  %v586_v32 = vld [vmem:[%s3257_s28 + $0x90] sm:$0xff]  ;;  %v589_v36 = vld [vmem:[%s3257_s28 + $0xa8] sm:$0xff]  ;;  %v588_v37 = vld [vmem:[%s3257_s28 + $0xa0] sm:$0xff] }
  0x15   : > { %v3280_v20 = vadd.f32 %v3262_v8, %v608_v16  ;;  %v650_v34 = vadd.f32 %v3262_v8, %v611_v28  ;;  %v626_v39 = vmul.f32 %v3251_v7, %v587_v31  ;;  %v591_v40 = vld [vmem:[%s3257_s28 + $0xb8] sm:$0xff]  ;;  %v613_v41 = vmul.f32 %v3251_v7, %v574_v30  ;;  %v590_v45 = vld [vmem:[%s3257_s28 + $0xb0] sm:$0xff]  ;;  %v593_v54 = vld [vmem:[%s3257_s28 + $0xc8] sm:$0xff] }
  0x16   : > { %v3285_v23 = vmax.f32 %v648_v17, 0.0  ;;  %v678_v24 = vmax.f32 %v3276_v18, 0.0  ;;  %v3293_v25 = vmax.f32 %v649_v19, 0.0  ;;  %v651_v33 = vadd.f32 %v3262_v8, %v612_v27  ;;  %v592_v55 = vld [vmem:[%s3257_s28 + $0xc0] sm:$0xff]  ;;  %v595_v57 = vld [vmem:[%s3257_s28 + $0xd8] sm:$0xff]  ;;  %v594_v58 = vld [vmem:[%s3257_s28 + $0xd0] sm:$0xff] }
  0x17   : > { %v679_v26 = vmax.f32 %v3280_v20, 0.0  ;;  %v625_v42 = vmul.f32 %v3251_v7, %v586_v32  ;;  %v628_v43 = vmul.f32 %v3251_v7, %v589_v36  ;;  %v627_v44 = vmul.f32 %v3251_v7, %v588_v37  ;;  %v597_v59 = vld [vmem:[%s3257_s28 + $0xe8] sm:$0xff]  ;;  %v596_v63 = vld [vmem:[%s3257_s28 + $0xe0] sm:$0xff]  ;;  %v599_v12 = vld [vmem:[%s3257_s28 + $0xf8] sm:$0xff] }
  0x18   : > { %863 = vrot.lane.b32.xlu1 %v3285_v23, %s3155_s14  ;;  %765 = vrot.lane.b32.xlu0 %v678_v24, %s3156_s15  ;;  %v3330_v46 = vmax.f32 %v651_v33, 0.0  ;;  %v3332_v47 = vmax.f32 %v650_v34, 0.0  ;;  %v653_v48 = vadd.f32 %v3262_v8, %v614_v35  ;;  %v3336_v49 = vadd.f32 %v3262_v8, %v626_v39  ;;  %v577_v61 = vld [vmem:[%s3257_s28 + $0x48] sm:$0xff]  ;;  %v710_v3 = vld [vmem:[%s3354_s20] sm:$0xff] }
  0x19   : > { %v3339_v50 = vadd.f32 %v3262_v8, %v625_v42  ;;  %v3342_v51 = vadd.f32 %v3262_v8, %v628_v43  ;;  %v3345_v52 = vadd.f32 %v3262_v8, %v627_v44  ;;  %v630_v53 = vmul.f32 %v3251_v7, %v591_v40  ;;  %v576_v6 = vld [vmem:[%s3257_s28 + $0x40] sm:$0xff]  ;;  %v598_v27 = vld [vmem:[%s3257_s28 + $0xf0] sm:$0xff]  ;;  %v711_v28 = vld [vmem:[%s3354_s20 + $0x8] sm:$0xff]  ;;  %s4068_s20 = scalar_lea.vmem %s4319_s9, %s4325_s30 }
  0x1a   : > { %v629_v56 = vmul.f32 %v3251_v7, %v590_v45  ;;  %v652_v60 = vadd.f32 %v3262_v8, %v613_v41  ;;  %v632_v1 = vmul.f32 %v3251_v7, %v593_v54  ;;  %v631_v2 = vmul.f32 %v3251_v7, %v592_v55  ;;  %v724_v33 = vld [vmem:[%s536_s25 + $0x8] sm:$0xff]  ;;  %v723_v34 = vld [vmem:[%s536_s25] sm:$0xff]  ;;  %s4099_s25 = scalar_lea.vmem %s4317_s7, %s3246_s23 }
  0x1b   : > { %v3364_v62 = vadd.f32 %v3262_v8, %v630_v53  ;;  %v3377_v4 = vmax.f32 %v653_v48, 0.0  ;;  %v634_v9 = vmul.f32 %v3251_v7, %v595_v57  ;;  %v633_v10 = vmul.f32 %v3251_v7, %v594_v58  ;;  %v579_v48 = vld [vmem:[%s3257_s28 + $0x58] sm:$0xff]  ;;  %v578_v53 = vld [vmem:[%s3257_s28 + $0x50] sm:$0xff] }
  0x1c   : > { %865 = vrot.lane.b32.xlu1 %v3293_v25, %s3155_s14  ;;  %767 = vrot.lane.b32.xlu0 %v679_v26, %s3156_s15  ;;  %v3372_v0 = vadd.f32 %v3262_v8, %v629_v56  ;;  %v636_v11 = vmul.f32 %v3251_v7, %v597_v59  ;;  %v616_v13 = vmul.f32 %v3251_v7, %v577_v61  ;;  %v3411_v29 = vmax.f32 %v652_v60, 0.0 }
  0x1d   : > { %v3389_v14 = vadd.f32 %v3262_v8, %v632_v1  ;;  %v3392_v15 = vadd.f32 %v3262_v8, %v631_v2  ;;  %v635_v16 = vmul.f32 %v3251_v7, %v596_v63  ;;  %v3396_v17 = vadd.f32 %v3262_v8, %v634_v9  ;;  %v581_v63 = vld [vmem:[%s3257_s28 + $0x68] sm:$0xff]  ;;  %v580_v1 = vld [vmem:[%s3257_s28 + $0x60] sm:$0xff] }
  0x1e   : > { %v3399_v19 = vadd.f32 %v3262_v8, %v633_v10  ;;  %v3402_v21 = vadd.f32 %v3262_v8, %v636_v11  ;;  %v712_v22 = vmul.f32 %v3251_v7, %v710_v3  ;;  %v615_v30 = vmul.f32 %v3251_v7, %v576_v6 }
  0x1f   : > { %v3415_v31 = vadd.f32 %v3262_v8, %v635_v16  ;;  %v638_v32 = vmul.f32 %v3251_v7, %v599_v12  ;;  %v637_v37 = vmul.f32 %v3251_v7, %v598_v27  ;;  %v713_v39 = vmul.f32 %v3251_v7, %v711_v28  ;;  %v583_v12 = vld [vmem:[%s3257_s28 + $0x78] sm:$0xff] }
  0x20   : > { %771 = vrot.lane.b32.xlu1 %v3293_v25, %s3156_s15  ;;  %769 = vrot.lane.b32.xlu0 %v3285_v23, %s3156_s15  ;;  %v3419_v35 = vadd.f32 %v3262_v8, %v712_v22  ;;  %v655_v40 = vadd.f32 %v3262_v8, %v616_v13  ;;  %v726_v41 = vmul.f32 %v3251_v7, %v724_v33  ;;  %v582_v13 = vld [vmem:[%s3257_s28 + $0x70] sm:$0xff]  ;;  %v585_v33 = vld [vmem:[%s3257_s28 + $0x88] sm:$0xff] }
  0x21   : > { %v3422_v36 = vadd.f32 %v3262_v8, %v638_v32  ;;  %v725_v42 = vmul.f32 %v3251_v7, %v723_v34  ;;  %v654_v43 = vadd.f32 %v3262_v8, %v615_v30  ;;  %v3435_v44 = vadd.f32 %v3262_v8, %v637_v37  ;;  %v584_v34 = vld [vmem:[%s3257_s28 + $0x80] sm:$0xff] }
  0x22   : > { %v3438_v45 = vadd.f32 %v3262_v8, %v713_v39  ;;  %v3443_v54 = vadd.f32 %v3262_v8, %v726_v41  ;;  %v3452_v56 = vmax.f32 %v655_v40, 0.0  ;;  %v618_v58 = vmul.f32 %v3251_v7, %v579_v48 }
  0x23   : > { %v3446_v55 = vadd.f32 %v3262_v8, %v725_v42  ;;  %v3454_v57 = vmax.f32 %v654_v43, 0.0  ;;  %v617_v59 = vmul.f32 %v3251_v7, %v578_v53  ;;  %v620_v6 = vmul.f32 %v3251_v7, %v581_v63  ;;  %v2713_v42 = vld [vmem:[%s4313_s3 + $0x30] sm:$0xff]  ;;  %v2714_v43 = vld [vmem:[%s4313_s3 + $0x38] sm:$0xff] }
  0x24   : > { %869 = vrot.lane.b32.xlu1 %v3330_v46, %s3155_s14  ;;  %867 = vrot.lane.b32.xlu0 %v3332_v47, %s3155_s14  ;;  %v657_v60 = vadd.f32 %v3262_v8, %v618_v58  ;;  %v619_v9 = vmul.f32 %v3251_v7, %v580_v1  ;;  %v622_v27 = vmul.f32 %v3251_v7, %v583_v12  ;;  %v717_v1 = vmax.f32 %v3438_v45, 0.0 }
  0x25   : > { %v656_v61 = vadd.f32 %v3262_v8, %v617_v59  ;;  %v659_v10 = vadd.f32 %v3262_v8, %v620_v6  ;;  %v621_v28 = vmul.f32 %v3251_v7, %v582_v13  ;;  %v624_v40 = vmul.f32 %v3251_v7, %v585_v33 }
  0x26   : > { %v3470_v2 = vmax.f32 %v657_v60, 0.0  ;;  %v658_v11 = vadd.f32 %v3262_v8, %v619_v9  ;;  %v661_v30 = vadd.f32 %v3262_v8, %v622_v27  ;;  %v623_v41 = vmul.f32 %v3251_v7, %v584_v34 }
  0x27   : > { %v3472_v3 = vmax.f32 %v656_v61, 0.0  ;;  %v3488_v16 = vmax.f32 %v659_v10, 0.0  ;;  %v660_v32 = vadd.f32 %v3262_v8, %v621_v28  ;;  %v3518_v48 = vpack.c.bf16 %v2714_v43, %v2713_v42 }
  0x28   : > { %775 = vrot.lane.b32.xlu1 %v3330_v46, %s3156_s15  ;;  %773 = vrot.lane.b32.xlu0 %v3332_v47, %s3156_s15  ;;  %v3490_v22 = vmax.f32 %v658_v11, 0.0  ;;  %v3506_v37 = vmax.f32 %v661_v30, 0.0  ;;  %v663_v7 = vadd.f32 %v3262_v8, %v624_v40  ;;  %v662_v53 = vadd.f32 %v3262_v8, %v623_v41 }
  0x29   : > { %v3508_v39 = vmax.f32 %v660_v32, 0.0  ;;  %3033 = vmatprep.subr.bf16.mxu0 %v3518_v48  ;;  %v3544_v8 = vmax.f32 %v3336_v49, 0.0  ;;  %v3547_v60 = vmax.f32 %v3339_v50, 0.0  ;;  %v3558_v61 = vmax.f32 %v3342_v51, 0.0 }
  0x2a   : > { %v3531_v58 = vmax.f32 %v663_v7, 0.0  ;;  %v3533_v59 = vmax.f32 %v662_v53, 0.0  ;;  %v3561_v49 = vmax.f32 %v3345_v52, 0.0  ;;  %v3572_v50 = vmax.f32 %v3364_v62, 0.0  ;;  %v2715_v7 = vld [vmem:[%s4313_s3 + $0x40] sm:$0xff] }
  0x2b   : > { %v3575_v51 = vmax.f32 %v3372_v0, 0.0  ;;  %v3586_v52 = vmax.f32 %v3389_v14, 0.0  ;;  %v3589_v62 = vmax.f32 %v3392_v15, 0.0  ;;  %v3600_v0 = vmax.f32 %v3396_v17, 0.0 }
  0x2c   : > { %873 = vrot.lane.b32.xlu1 %v3377_v4, %s3155_s14  ;;  %871 = vrot.lane.b32.xlu0 %v3411_v29, %s3155_s14  ;;  %v3603_v14 = vmax.f32 %v3399_v19, 0.0  ;;  %v3614_v15 = vmax.f32 %v3402_v21, 0.0  ;;  %v3617_v17 = vmax.f32 %v3415_v31, 0.0  ;;  %v716_v19 = vmax.f32 %v3419_v35, 0.0 }
  0x2d   : > { %v709_v21 = vmax.f32 %v3422_v36, 0.0  ;;  %v708_v31 = vmax.f32 %v3435_v44, 0.0  ;;  %v722_v10 = vmul.f32 0.0, %v717_v1  ;;  %v730_v11 = vmax.f32 %v3443_v54, 0.0 }
  0x2e   : > { %v721_v63 = vmul.f32 0.0, %v716_v19  ;;  %v729_v36 = vmax.f32 %v3446_v55, 0.0 }
  0x2f   : > { %v732_v32 = vmul.f32 0.0, %v730_v11 }
  0x30   : > { %779 = vrot.lane.b32.xlu1 %v3377_v4, %s3156_s15  ;;  %777 = vrot.lane.b32.xlu0 %v3411_v29, %s3156_s15  ;;  %v731_v54 = vmul.f32 0.0, %v729_v36 }
  0x34   : > { %877 = vrot.lane.b32.xlu1 %v3452_v56, %s3155_s14  ;;  %875 = vrot.lane.b32.xlu0 %v3454_v57, %s3155_s14 }
  0x38   : > { %783 = vrot.lane.b32.xlu1 %v3452_v56, %s3156_s15  ;;  %781 = vrot.lane.b32.xlu0 %v3454_v57, %s3156_s15 }
  0x3c   : > { %881 = vrot.lane.b32.xlu1 %v3470_v2, %s3155_s14  ;;  %879 = vrot.lane.b32.xlu0 %v3472_v3, %s3155_s14 }
  0x40   : > { %787 = vrot.lane.b32.xlu1 %v3470_v2, %s3156_s15  ;;  %785 = vrot.lane.b32.xlu0 %v3472_v3, %s3156_s15 }
  0x44   : > { %885 = vrot.lane.b32.xlu1 %v3488_v16, %s3155_s14  ;;  %883 = vrot.lane.b32.xlu0 %v3490_v22, %s3155_s14 }
  0x48   : > { %791 = vrot.lane.b32.xlu1 %v3488_v16, %s3156_s15  ;;  %789 = vrot.lane.b32.xlu0 %v3490_v22, %s3156_s15 }
  0x4c   : > { %889 = vrot.lane.b32.xlu1 %v3506_v37, %s3155_s14  ;;  %887 = vrot.lane.b32.xlu0 %v3508_v39, %s3155_s14 }
  0x50   : > { %795 = vrot.lane.b32.xlu1 %v3506_v37, %s3156_s15  ;;  %793 = vrot.lane.b32.xlu0 %v3508_v39, %s3156_s15 }
  0x54   : > { %893 = vrot.lane.b32.xlu1 %v3531_v58, %s3155_s14  ;;  %891 = vrot.lane.b32.xlu0 %v3533_v59, %s3155_s14 }
  0x58   : > { %799 = vrot.lane.b32.xlu1 %v3531_v58, %s3156_s15  ;;  %797 = vrot.lane.b32.xlu0 %v3533_v59, %s3156_s15 }
  0x5c   : > { %897 = vrot.lane.b32.xlu1 %v3544_v8, %s3155_s14  ;;  %895 = vrot.lane.b32.xlu0 %v3547_v60, %s3155_s14 }
  0x60   : > { %803 = vrot.lane.b32.xlu1 %v3544_v8, %s3156_s15  ;;  %801 = vrot.lane.b32.xlu0 %v3547_v60, %s3156_s15 }
  0x64   : > { %901 = vrot.lane.b32.xlu1 %v3558_v61, %s3155_s14  ;;  %899 = vrot.lane.b32.xlu0 %v3561_v49, %s3155_s14 }
  0x68   : > { %807 = vrot.lane.b32.xlu1 %v3558_v61, %s3156_s15  ;;  %805 = vrot.lane.b32.xlu0 %v3561_v49, %s3156_s15 }
  0x6c   : > { %905 = vrot.lane.b32.xlu1 %v3572_v50, %s3155_s14  ;;  %903 = vrot.lane.b32.xlu0 %v3575_v51, %s3155_s14 }
  0x70   : > { %811 = vrot.lane.b32.xlu1 %v3572_v50, %s3156_s15  ;;  %809 = vrot.lane.b32.xlu0 %v3575_v51, %s3156_s15 }
  0x74   : > { %909 = vrot.lane.b32.xlu1 %v3586_v52, %s3155_s14  ;;  %907 = vrot.lane.b32.xlu0 %v3589_v62, %s3155_s14 }
  0x78   : > { %815 = vrot.lane.b32.xlu1 %v3586_v52, %s3156_s15  ;;  %813 = vrot.lane.b32.xlu0 %v3589_v62, %s3156_s15 }
  0x7c   : > { %913 = vrot.lane.b32.xlu1 %v3600_v0, %s3155_s14  ;;  %911 = vrot.lane.b32.xlu0 %v3603_v14, %s3155_s14 }
  0x80   : > { %819 = vrot.lane.b32.xlu1 %v3600_v0, %s3156_s15  ;;  %817 = vrot.lane.b32.xlu0 %v3603_v14, %s3156_s15 }
  0x84   : > { %917 = vrot.lane.b32.xlu1 %v3614_v15, %s3155_s14  ;;  %915 = vrot.lane.b32.xlu0 %v3617_v17, %s3155_s14 }
  0x88   : > { %823 = vrot.lane.b32.xlu1 %v3614_v15, %s3156_s15  ;;  %821 = vrot.lane.b32.xlu0 %v3617_v17, %s3156_s15 }
  0x8a   : > { %v864_v35 = vpop.permute.xlu1 %863  ;;  %v766_v6 = vpop.permute.xlu0 %765 }
  0x8b   : > { %v960_v9 = vsel %vm959_vm0, %v721_v63, %v766_v6 }
  0x8c   : > { %921 = vrot.lane.b32.xlu1 %v709_v21, %s3155_s14  ;;  %919 = vrot.lane.b32.xlu0 %v708_v31, %s3155_s14  ;;  %v993_v45 = vsel %vm992_vm1, %v960_v9, %v864_v35 }
  0x8d   : > { %2868 = vmatprep.mubr.msk.f32.mxu1 %vm1226_vm2, %v993_v45  ;;  %v1058_v44 = vrot.slane %v993_v45, 7  ;;  %v1139_v34 = vrot.slane %v993_v45, 1 }
  0x8e   : > { %v866_v12 = vpop.permute.xlu1 %865  ;;  %v768_v13 = vpop.permute.xlu0 %767 }
  0x8f   : > { %v961_v27 = vsel %vm959_vm0, %v722_v10, %v768_v13  ;;  %v1122_v28 = vsel %vm1057_vm3, 0.0, %v1058_v44 }
  0x90   : > { %827 = vrot.lane.b32.xlu1 %v709_v21, %s3156_s15  ;;  %825 = vrot.lane.b32.xlu0 %v708_v31, %s3156_s15  ;;  %v3643_v30 = vsel %vm992_vm1, %v961_v27, %v866_v12 }
  0x91   : > { %2922 = vmatprep.mubr.msk.f32.mxu0 %vm1226_vm2, %v1122_v28  ;;  %v1059_v55 = vrot.slane %v3643_v30, 7  ;;  %v1140_v33 = vrot.slane %v3643_v30, 1  ;;  %2869 = vmatmul.mubr.msk.f32.vlgmr.msra.gmra.mrb[0].mxu1 %vm1226_vm2, %v3643_v30 }
  0x92   : > { %v772_v40 = vpop.permute.xlu1 %771  ;;  %v770_v41 = vpop.permute.xlu0 %769  ;;  %3038 = vmatpush3.bf16.msra.mxu1 %v3240_v5 }
  0x93   : > { %v1060_v42 = vsel %vm1057_vm3, %v1058_v44, %v1059_v55  ;;  %3037 = vmatprep.subr.mxu1 %v3315_v38  ;;  %v3658_v43 = vsel %vm1138_vm4, %v1139_v34, %v1140_v33  ;;  %v963_v5 = vsel %vm959_vm0, %v679_v26, %v772_v40  ;;  %v962_v53 = vsel %vm959_vm0, %v678_v24, %v770_v41 }
  0x94   : > { %925 = vrot.lane.b32.xlu1 %v732_v32, %s3155_s14  ;;  %923 = vrot.lane.b32.xlu0 %v731_v54, %s3155_s14 }
  0x95   : > { %2923 = vmatmul.mubr.msk.f32.vlgmr.msra.gmra.mrb[0].mxu0 %vm1226_vm2, %v1060_v42 }
  0x96   : > { %v870_v19 = vpop.permute.xlu1 %869  ;;  %v868_v63 = vpop.permute.xlu0 %867  ;;  %3035 = vmatpush3.bf16.msra.mxu0 %v3518_v48  ;;  %3039 = vmatpush3.msra.mxu1 %v3315_v38 }
  0x97   : > { %v3673_v1 = vsel %vm992_vm1, %v963_v5, %v870_v19  ;;  %v3676_v21 = vsel %vm992_vm1, %v962_v53, %v868_v63  ;;  %2974 = vmatprep.subr.mxu0 %v2715_v7 }
  0x98   : > { %v1062_v20 = vrot.slane %v3673_v1, 7  ;;  %v1061_v26 = vrot.slane %v3676_v21, 7  ;;  %2871 = vmatprep.mubr.msk.f32.mxu1 %vm1226_vm2, %v3676_v21 }
  0x99   : > { %2872 = vmatmul.mubr.msk.f32.gmra.mrb[2].mxu1 %vm1226_vm2, %v3673_v1 }
  0x9a   : > { %v776_v18 = vpop.permute.xlu1 %775  ;;  %v774_v24 = vpop.permute.xlu0 %773  ;;  %v1123_v38 = vsel %vm1057_vm3, 0.0, %v1061_v26  ;;  %v1063_v48 = vsel %vm1057_vm3, %v1061_v26, %v1062_v20  ;;  %2975 = vmatpush3.msra.mxu0 %v2715_v7 }
  0x9b   : > { %2925 = vmatprep.mubr.msk.f32.mxu0 %vm1226_vm2, %v1123_v38  ;;  %v965_v31 = vsel %vm959_vm0, %v3293_v25, %v776_v18  ;;  %v964_v35 = vsel %vm959_vm0, %v3285_v23, %v774_v24 }
  0x9c   : > { %2926 = vmatmul.mubr.msk.f32.gmra.mrb[2].mxu0 %vm1226_vm2, %v1063_v48 }
  0x9e   : > { %v874_v6 = vpop.permute.xlu1 %873  ;;  %v872_v9 = vpop.permute.xlu0 %871 }
  0x9f   : > { %v3693_v10 = vsel %vm992_vm1, %v965_v31, %v874_v6  ;;  %v3696_v45 = vsel %vm992_vm1, %v964_v35, %v872_v9 }
  0xa0   : > { %v1065_v11 = vrot.slane %v3693_v10, 7  ;;  %v1064_v36 = vrot.slane %v3696_v45, 7  ;;  %2874 = vmatprep.mubr.msk.f32.mxu1 %vm1226_vm2, %v3696_v45 }
  0xa1   : > { %2875 = vmatmul.mubr.msk.f32.gmra.mrb[4].mxu1 %vm1226_vm2, %v3693_v10 }
  0xa2   : > { %v780_v25 = vpop.permute.xlu1 %779  ;;  %v778_v23 = vpop.permute.xlu0 %777  ;;  %v1124_v44 = vsel %vm1057_vm3, 0.0, %v1064_v36  ;;  %v1066_v12 = vsel %vm1057_vm3, %v1064_v36, %v1065_v11 }
  0xa3   : > { %2928 = vmatprep.mubr.msk.f32.mxu0 %vm1226_vm2, %v1124_v44  ;;  %v967_v13 = vsel %vm959_vm0, %v3330_v46, %v780_v25  ;;  %v966_v27 = vsel %vm959_vm0, %v3332_v47, %v778_v23 }
  0xa4   : > { %2929 = vmatmul.mubr.msk.f32.gmra.mrb[4].mxu0 %vm1226_vm2, %v1066_v12 }
  0xa6   : > { %v878_v28 = vpop.permute.xlu1 %877  ;;  %v876_v32 = vpop.permute.xlu0 %875 }
  0xa7   : > { %v3713_v54 = vsel %vm992_vm1, %v967_v13, %v878_v28  ;;  %v3716_v55 = vsel %vm992_vm1, %v966_v27, %v876_v32 }
  0xa8   : > { %v1068_v34 = vrot.slane %v3713_v54, 7  ;;  %v1067_v40 = vrot.slane %v3716_v55, 7  ;;  %2877 = vmatprep.mubr.msk.f32.mxu1 %vm1226_vm2, %v3716_v55 }
  0xa9   : > { %2878 = vmatmul.mubr.msk.f32.gmra.mrb[6].mxu1 %vm1226_vm2, %v3713_v54 }
  0xaa   : > { %v784_v46 = vpop.permute.xlu1 %783  ;;  %v782_v47 = vpop.permute.xlu0 %781  ;;  %v1125_v41 = vsel %vm1057_vm3, 0.0, %v1067_v40  ;;  %v1069_v42 = vsel %vm1057_vm3, %v1067_v40, %v1068_v34 }
  0xab   : > { %2931 = vmatprep.mubr.msk.f32.mxu0 %vm1226_vm2, %v1125_v41  ;;  %v969_v7 = vsel %vm959_vm0, %v3377_v4, %v784_v46  ;;  %v968_v5 = vsel %vm959_vm0, %v3411_v29, %v782_v47 }
  0xac   : > { %2932 = vmatmul.mubr.msk.f32.gmra.mrb[6].mxu0 %vm1226_vm2, %v1069_v42 }
  0xae   : > { %v882_v53 = vpop.permute.xlu1 %881  ;;  %v880_v19 = vpop.permute.xlu0 %879 }
  0xaf   : > { %v3733_v63 = vsel %vm992_vm1, %v969_v7, %v882_v53  ;;  %v3736_v20 = vsel %vm992_vm1, %v968_v5, %v880_v19 }
  0xb0   : > { %v1071_v26 = vrot.slane %v3733_v63, 7  ;;  %v1070_v18 = vrot.slane %v3736_v20, 7  ;;  %2880 = vmatprep.mubr.msk.f32.mxu1 %vm1226_vm2, %v3736_v20 }
  0xb1   : > { %2881 = vmatmul.mubr.msk.f32.gmra.mrb[8].mxu1 %vm1226_vm2, %v3733_v63 }
  0xb2   : > { %v788_v4 = vpop.permute.xlu1 %787  ;;  %v786_v29 = vpop.permute.xlu0 %785  ;;  %v1126_v24 = vsel %vm1057_vm3, 0.0, %v1070_v18  ;;  %v1072_v38 = vsel %vm1057_vm3, %v1070_v18, %v1071_v26 }
  0xb3   : > { %2934 = vmatprep.mubr.msk.f32.mxu0 %vm1226_vm2, %v1126_v24  ;;  %v971_v48 = vsel %vm959_vm0, %v3452_v56, %v788_v4  ;;  %v970_v31 = vsel %vm959_vm0, %v3454_v57, %v786_v29 }
  0xb4   : > { %2935 = vmatmul.mubr.msk.f32.gmra.mrb[8].mxu0 %vm1226_vm2, %v1072_v38  ;;  %v1143_v38 = vrot.slane %v3673_v1, 1 }
  0xb6   : > { %v886_v35 = vpop.permute.xlu1 %885  ;;  %v884_v6 = vpop.permute.xlu0 %883 }
  0xb7   : > { %v3753_v9 = vsel %vm992_vm1, %v971_v48, %v886_v35  ;;  %v3756_v11 = vsel %vm992_vm1, %v970_v31, %v884_v6  ;;  %v1142_v48 = vrot.slane %v3676_v21, 1 }
  0xb8   : > { %v1074_v36 = vrot.slane %v3753_v9, 7  ;;  %v1073_v25 = vrot.slane %v3756_v11, 7  ;;  %2883 = vmatprep.mubr.msk.f32.mxu1 %vm1226_vm2, %v3756_v11 }
  0xb9   : > { %2884 = vmatmul.mubr.msk.f32.gmra.mrb[10].mxu1 %vm1226_vm2, %v3753_v9 }
  0xba   : > { %v792_v56 = vpop.permute.xlu1 %791  ;;  %v790_v57 = vpop.permute.xlu0 %789  ;;  %v1127_v23 = vsel %vm1057_vm3, 0.0, %v1073_v25  ;;  %v1075_v44 = vsel %vm1057_vm3, %v1073_v25, %v1074_v36  ;;  %v1203_v25 = vsel %vm1138_vm4, %v1140_v33, 0.0  ;;  %v1204_v33 = vsel %vm1138_vm4, %v1143_v38, 0.0 }
  0xbb   : > { %2937 = vmatprep.mubr.msk.f32.mxu0 %vm1226_vm2, %v1127_v23  ;;  %v973_v12 = vsel %vm959_vm0, %v3470_v2, %v792_v56  ;;  %v972_v13 = vsel %vm959_vm0, %v3472_v3, %v790_v57  ;;  %v1145_v56 = vrot.slane %v3696_v45, 1  ;;  %v1148_v45 = vrot.slane %v3716_v55, 1 }
  0xbc   : > { %2938 = vmatmul.mubr.msk.f32.gmra.mrb[10].mxu0 %vm1226_vm2, %v1075_v44 }
  0xbe   : > { %v890_v27 = vpop.permute.xlu1 %889  ;;  %v888_v28 = vpop.permute.xlu0 %887 }
  0xbf   : > { %v3773_v32 = vsel %vm992_vm1, %v973_v12, %v890_v27  ;;  %v3776_v34 = vsel %vm992_vm1, %v972_v13, %v888_v28  ;;  %v1152_v28 = vrot.slane %v3733_v63, 1  ;;  %v1155_v63 = vrot.slane %v3753_v9, 1 }
  0xc0   : > { %v1077_v40 = vrot.slane %v3773_v32, 7  ;;  %v1076_v46 = vrot.slane %v3776_v34, 7  ;;  %2886 = vmatprep.mubr.msk.f32.mxu1 %vm1226_vm2, %v3776_v34 }
  0xc1   : > { %2887 = vmatmul.mubr.msk.f32.gmra.mrb[12].mxu1 %vm1226_vm2, %v3773_v32 }
  0xc2   : > { %v796_v2 = vpop.permute.xlu1 %795  ;;  %v794_v3 = vpop.permute.xlu0 %793  ;;  %v1128_v47 = vsel %vm1057_vm3, 0.0, %v1076_v46  ;;  %v1078_v41 = vsel %vm1057_vm3, %v1076_v46, %v1077_v40  ;;  %v1151_v40 = vrot.slane %v3736_v20, 1  ;;  %v1154_v20 = vrot.slane %v3756_v11, 1 }
  0xc3   : > { %2940 = vmatprep.mubr.msk.f32.mxu0 %vm1226_vm2, %v1128_v47  ;;  %v975_v42 = vsel %vm959_vm0, %v3488_v16, %v796_v2  ;;  %v974_v7 = vsel %vm959_vm0, %v3490_v22, %v794_v3  ;;  %v1207_v11 = vsel %vm1138_vm4, %v1152_v28, 0.0 }
  0xc4   : > { %2941 = vmatmul.mubr.msk.f32.gmra.mrb[12].mxu0 %vm1226_vm2, %v1078_v41  ;;  %v1153_v3 = vsel %vm1138_vm4, %v1151_v40, %v1152_v28 }
  0xc6   : > { %v894_v5 = vpop.permute.xlu1 %893  ;;  %v892_v53 = vpop.permute.xlu0 %891 }
  0xc7   : > { %v3793_v19 = vsel %vm992_vm1, %v975_v42, %v894_v5  ;;  %v3796_v26 = vsel %vm992_vm1, %v974_v7, %v892_v53  ;;  %v1158_v53 = vrot.slane %v3773_v32, 1 }
  0xc8   : > { %v1080_v18 = vrot.slane %v3793_v19, 7  ;;  %v1079_v4 = vrot.slane %v3796_v26, 7  ;;  %2889 = vmatprep.mubr.msk.f32.mxu1 %vm1226_vm2, %v3796_v26  ;;  %v1161_v32 = vrot.slane %v3793_v19, 1 }
  0xc9   : > { %2890 = vmatmul.mubr.msk.f32.gmra.mrb[14].mxu1 %vm1226_vm2, %v3793_v19 }
  0xca   : > { %v800_v16 = vpop.permute.xlu1 %799  ;;  %v798_v22 = vpop.permute.xlu0 %797  ;;  %v1129_v29 = vsel %vm1057_vm3, 0.0, %v1079_v4  ;;  %v1081_v24 = vsel %vm1057_vm3, %v1079_v4, %v1080_v18  ;;  %v1157_v18 = vrot.slane %v3776_v34, 1  ;;  %v1160_v34 = vrot.slane %v3796_v26, 1 }
  0xcb   : > { %2943 = vmatprep.mubr.msk.f32.mxu0 %vm1226_vm2, %v1129_v29  ;;  %v977_v31 = vsel %vm959_vm0, %v3506_v37, %v800_v16  ;;  %v976_v35 = vsel %vm959_vm0, %v3508_v39, %v798_v22  ;;  %v1144_v37 = vsel %vm1138_vm4, %v1142_v48, %v1143_v38  ;;  %v1208_v16 = vsel %vm1138_vm4, %v1155_v63, 0.0 }
  0xcc   : > { %2944 = vmatmul.mubr.msk.f32.gmra.mrb[14].mxu0 %vm1226_vm2, %v1081_v24  ;;  %v1159_v22 = vsel %vm1138_vm4, %v1157_v18, %v1158_v53  ;;  %v1209_v26 = vsel %vm1138_vm4, %v1158_v53, 0.0 }
  0xcd   : > { %2976 = vmatprep.mubr.msk.f32.mxu0 %vm1226_vm2, %v3658_v43  ;;  %v1146_v43 = vrot.slane %v3693_v10, 1  ;;  %v1149_v10 = vrot.slane %v3713_v54, 1 }
  0xce   : > { %v898_v6 = vpop.permute.xlu1 %897  ;;  %v896_v36 = vpop.permute.xlu0 %895 }
  0xcf   : > { %v3820_v1 = vsel %vm992_vm1, %v977_v31, %v898_v6  ;;  %v3823_v21 = vsel %vm992_vm1, %v976_v35, %v896_v36  ;;  %v1147_v57 = vsel %vm1138_vm4, %v1145_v56, %v1146_v43  ;;  %v1205_v55 = vsel %vm1138_vm4, %v1146_v43, 0.0 }
  0xd0   : > { %2892 = vmatprep.mubr.msk.f32.mxu1 %vm1226_vm2, %v3823_v21  ;;  %2977 = vmatmul.mubr.msk.f32.vlgmr.msra.gmra.mrb[0].mxu0 %vm1226_vm2, %v1203_v25  ;;  %v1206_v2 = vsel %vm1138_vm4, %v1149_v10, 0.0  ;;  %v1164_v35 = vrot.slane %v3820_v1, 1  ;;  %v1163_v6 = vrot.slane %v3823_v21, 1  ;;  %v1210_v25 = vsel %vm1138_vm4, %v1161_v32, 0.0 }
  0xd1   : > { %2893 = vmatmul.mubr.msk.f32.gmra.mrb[16].mxu1 %vm1226_vm2, %v3820_v1  ;;  %2979 = vmatprep.mubr.msk.f32.mxu0 %vm1226_vm2, %v1144_v37 }
  0xd2   : > { %v804_v39 = vpop.permute.xlu1 %803  ;;  %v802_v30 = vpop.permute.xlu0 %801  ;;  %v1165_v37 = vsel %vm1138_vm4, %v1163_v6, %v1164_v35  ;;  %v1082_v6 = vrot.slane %v3823_v21, 7 }
  0xd3   : > { %v979_v23 = vsel %vm959_vm0, %v3531_v58, %v804_v39  ;;  %v978_v44 = vsel %vm959_vm0, %v3533_v59, %v802_v30  ;;  %v1150_v58 = vsel %vm1138_vm4, %v1148_v45, %v1149_v10 }
  0xd4   : > { %2980 = vmatmul.mubr.msk.f32.gmra.mrb[2].mxu0 %vm1226_vm2, %v1204_v33 }
  0xd5   : > { %2982 = vmatprep.mubr.msk.f32.mxu0 %vm1226_vm2, %v1147_v57 }
  0xd6   : > { %v902_v12 = vpop.permute.xlu1 %901  ;;  %v900_v13 = vpop.permute.xlu0 %899 }
  0xd7   : > { %v3845_v27 = vsel %vm992_vm1, %v979_v23, %v902_v12  ;;  %v3848_v54 = vsel %vm992_vm1, %v978_v44, %v900_v13  ;;  %v1211_v23 = vsel %vm1138_vm4, %v1164_v35, 0.0 }
  0xd8   : > { %2895 = vmatprep.mubr.msk.f32.mxu1 %vm1226_vm2, %v3848_v54  ;;  %2983 = vmatmul.mubr.msk.f32.gmra.mrb[4].mxu0 %vm1226_vm2, %v1205_v55  ;;  %v1167_v43 = vrot.slane %v3845_v27, 1  ;;  %v1166_v56 = vrot.slane %v3848_v54, 1 }
  0xd9   : > { %2896 = vmatmul.mubr.msk.f32.gmra.mrb[18].mxu1 %vm1226_vm2, %v3845_v27  ;;  %2985 = vmatprep.mubr.msk.f32.mxu0 %vm1226_vm2, %v1150_v58 }
  0xda   : > { %v808_v59 = vpop.permute.xlu1 %807  ;;  %v806_v46 = vpop.permute.xlu0 %805  ;;  %v1212_v55 = vsel %vm1138_vm4, %v1167_v43, 0.0 }
  0xdb   : > { %v981_v47 = vsel %vm959_vm0, %v3544_v8, %v808_v59  ;;  %v980_v41 = vsel %vm959_vm0, %v3547_v60, %v806_v46  ;;  %v1156_v8 = vsel %vm1138_vm4, %v1154_v20, %v1155_v63 }
  0xdc   : > { %2986 = vmatmul.mubr.msk.f32.gmra.mrb[6].mxu0 %vm1226_vm2, %v1206_v2 }
  0xdd   : > { %2988 = vmatprep.mubr.msk.f32.mxu0 %vm1226_vm2, %v1153_v3 }
  0xde   : > { %v906_v42 = vpop.permute.xlu1 %905  ;;  %v904_v7 = vpop.permute.xlu0 %903 }
  0xdf   : > { %v3871_v5 = vsel %vm992_vm1, %v981_v47, %v906_v42  ;;  %v3874_v9 = vsel %vm992_vm1, %v980_v41, %v904_v7 }
  0xe0   : > { %2898 = vmatprep.mubr.msk.f32.mxu1 %vm1226_vm2, %v3874_v9  ;;  %2989 = vmatmul.mubr.msk.f32.gmra.mrb[8].mxu0 %vm1226_vm2, %v1207_v11  ;;  %v1170_v44 = vrot.slane %v3871_v5, 1  ;;  %v1169_v12 = vrot.slane %v3874_v9, 1 }
  0xe1   : > { %2899 = vmatmul.mubr.msk.f32.gmra.mrb[20].mxu1 %vm1226_vm2, %v3871_v5  ;;  %2991 = vmatprep.mubr.msk.f32.mxu0 %vm1226_vm2, %v1156_v8 }
  0xe2   : > { %v812_v60 = vpop.permute.xlu1 %811  ;;  %v810_v4 = vpop.permute.xlu0 %809  ;;  %v1171_v58 = vsel %vm1138_vm4, %v1169_v12, %v1170_v44  ;;  %v1213_v47 = vsel %vm1138_vm4, %v1170_v44, 0.0  ;;  %v1089_v12 = vrot.slane %v3871_v5, 7 }
  0xe3   : > { %v983_v29 = vsel %vm959_vm0, %v3558_v61, %v812_v60  ;;  %v982_v24 = vsel %vm959_vm0, %v3561_v49, %v810_v4  ;;  %v1162_v61 = vsel %vm1138_vm4, %v1160_v34, %v1161_v32 }
  0xe4   : > { %2992 = vmatmul.mubr.msk.f32.gmra.mrb[10].mxu0 %vm1226_vm2, %v1208_v16 }
  0xe5   : > { %2994 = vmatprep.mubr.msk.f32.mxu0 %vm1226_vm2, %v1159_v22 }
  0xe6   : > { %v910_v38 = vpop.permute.xlu1 %909  ;;  %v908_v48 = vpop.permute.xlu0 %907 }
  0xe7   : > { %v3897_v31 = vsel %vm992_vm1, %v983_v29, %v910_v38  ;;  %v3900_v19 = vsel %vm992_vm1, %v982_v24, %v908_v48 }
  0xe8   : > { %2901 = vmatprep.mubr.msk.f32.mxu1 %vm1226_vm2, %v3900_v19  ;;  %2995 = vmatmul.mubr.msk.f32.gmra.mrb[12].mxu0 %vm1226_vm2, %v1209_v26  ;;  %v1173_v28 = vrot.slane %v3897_v31, 1  ;;  %v1172_v40 = vrot.slane %v3900_v19, 1 }
  0xe9   : > { %2902 = vmatmul.mubr.msk.f32.gmra.mrb[22].mxu1 %vm1226_vm2, %v3897_v31  ;;  %2997 = vmatprep.mubr.msk.f32.mxu0 %vm1226_vm2, %v1162_v61 }
  0xea   : > { %v816_v49 = vpop.permute.xlu1 %815  ;;  %v814_v36 = vpop.permute.xlu0 %813  ;;  %v1214_v11 = vsel %vm1138_vm4, %v1173_v28, 0.0 }
  0xeb   : > { %v985_v39 = vsel %vm959_vm0, %v3572_v50, %v816_v49  ;;  %v984_v30 = vsel %vm959_vm0, %v3575_v51, %v814_v36  ;;  %v1168_v50 = vsel %vm1138_vm4, %v1166_v56, %v1167_v43 }
  0xec   : > { %2998 = vmatmul.mubr.msk.f32.gmra.mrb[14].mxu0 %vm1226_vm2, %v1210_v25 }
  0xed   : > { %3000 = vmatprep.mubr.msk.f32.mxu0 %vm1226_vm2, %v1165_v37 }
  0xee   : > { %v914_v33 = vpop.permute.xlu1 %913  ;;  %v912_v10 = vpop.permute.xlu0 %911 }
  0xef   : > { %v3923_v45 = vsel %vm992_vm1, %v985_v39, %v914_v33  ;;  %v3926_v57 = vsel %vm992_vm1, %v984_v30, %v912_v10  ;;  %v1083_v39 = vrot.slane %v3820_v1, 7  ;;  %v1086_v1 = vrot.slane %v3845_v27, 7 }
  0xf0   : > { %2904 = vmatprep.mubr.msk.f32.mxu1 %vm1226_vm2, %v3926_v57  ;;  %3001 = vmatmul.mubr.msk.f32.gmra.mrb[16].mxu0 %vm1226_vm2, %v1211_v23  ;;  %v1176_v41 = vrot.slane %v3923_v45, 1  ;;  %v1175_v42 = vrot.slane %v3926_v57, 1 }
  0xf1   : > { %2905 = vmatmul.mubr.msk.f32.gmra.mrb[24].mxu1 %vm1226_vm2, %v3923_v45  ;;  %3003 = vmatprep.mubr.msk.f32.mxu0 %vm1226_vm2, %v1168_v50  ;;  %v1084_v23 = vsel %vm1057_vm3, %v1082_v6, %v1083_v39 }
  0xf2   : > { %v820_v51 = vpop.permute.xlu1 %819  ;;  %v818_v13 = vpop.permute.xlu0 %817  ;;  %v1177_v8 = vsel %vm1138_vm4, %v1175_v42, %v1176_v41  ;;  %v1215_v29 = vsel %vm1138_vm4, %v1176_v41, 0.0 }
  0xf3   : > { %v987_v59 = vsel %vm959_vm0, %v3586_v52, %v820_v51  ;;  %v986_v46 = vsel %vm959_vm0, %v3589_v62, %v818_v13  ;;  %v1174_v52 = vsel %vm1138_vm4, %v1172_v40, %v1173_v28  ;;  %v1091_v51 = vrot.slane %v3900_v19, 7 }
  0xf4   : > { %3004 = vmatmul.mubr.msk.f32.gmra.mrb[18].mxu0 %vm1226_vm2, %v1212_v55  ;;  %v1094_v55 = vrot.slane %v3926_v57, 7  ;;  %v1095_v19 = vrot.slane %v3923_v45, 7 }
  0xf5   : > { %3006 = vmatprep.mubr.msk.f32.mxu0 %vm1226_vm2, %v1171_v58  ;;  %v1133_v5 = vsel %vm1057_vm3, 0.0, %v1091_v51 }
  0xf6   : > { %v918_v2 = vpop.permute.xlu1 %917  ;;  %v916_v63 = vpop.permute.xlu0 %915  ;;  %v1096_v58 = vsel %vm1057_vm3, %v1094_v55, %v1095_v19 }
  0xf7   : > { %v3949_v20 = vsel %vm992_vm1, %v987_v59, %v918_v2  ;;  %v3952_v3 = vsel %vm992_vm1, %v986_v46, %v916_v63 }
  0xf8   : > { %2907 = vmatprep.mubr.msk.f32.mxu1 %vm1226_vm2, %v3952_v3  ;;  %3007 = vmatmul.mubr.msk.f32.gmra.mrb[20].mxu0 %vm1226_vm2, %v1213_v47  ;;  %v1179_v53 = vrot.slane %v3949_v20, 1  ;;  %v1178_v18 = vrot.slane %v3952_v3, 1  ;;  %v1097_v40 = vrot.slane %v3952_v3, 7  ;;  %v1098_v57 = vrot.slane %v3949_v20, 7 }
  0xf9   : > { %2908 = vmatmul.mubr.msk.f32.gmra.mrb[26].mxu1 %vm1226_vm2, %v3949_v20  ;;  %3009 = vmatprep.mubr.msk.f32.mxu0 %vm1226_vm2, %v1174_v52 }
  0xfa   : > { %v824_v62 = vpop.permute.xlu1 %823  ;;  %v822_v7 = vpop.permute.xlu0 %821  ;;  %v1216_v26 = vsel %vm1138_vm4, %v1179_v53, 0.0  ;;  %v1135_v45 = vsel %vm1057_vm3, 0.0, %v1097_v40  ;;  %v1099_v2 = vsel %vm1057_vm3, %v1097_v40, %v1098_v57 }
  0xfb   : > { %v989_v60 = vsel %vm959_vm0, %v3600_v0, %v824_v62  ;;  %v988_v4 = vsel %vm959_vm0, %v3603_v14, %v822_v7  ;;  %v1180_v0 = vsel %vm1138_vm4, %v1178_v18, %v1179_v53 }
  0xfc   : > { %3010 = vmatmul.mubr.msk.f32.gmra.mrb[22].mxu0 %vm1226_vm2, %v1214_v11 }
  0xfd   : > { %3012 = vmatprep.mubr.msk.f32.mxu0 %vm1226_vm2, %v1177_v8 }
  0xfe   : > { %v922_v16 = vpop.permute.xlu1 %921  ;;  %v920_v32 = vpop.permute.xlu0 %919 }
  0xff   : > { %v3975_v34 = vsel %vm992_vm1, %v989_v60, %v922_v16  ;;  %v3978_v22 = vsel %vm992_vm1, %v988_v4, %v920_v32  ;;  %v3157_v16 = vmov 0.0  }
 0x100   : > { %v1182_v24 = vrot.slane %v3975_v34, 1  ;;  %v1181_v38 = vrot.slane %v3978_v22, 1  ;;  %2910 = vmatprep.mubr.msk.f32.mxu1 %vm1226_vm2, %v3978_v22  ;;  %3013 = vmatmul.mubr.msk.f32.gmra.mrb[24].mxu0 %vm1226_vm2, %v1215_v29  ;;  %v1100_v59 = vrot.slane %v3978_v22, 7  ;;  %v1101_v46 = vrot.slane %v3975_v34, 7  ;;  %2238 = vst.msk [vmem:[%s4062_s17] sm:$0x1] %vm2237_vm5, %v3157_v16 }
 0x101   : > { %2911 = vmatmul.mubr.msk.f32.gmra.mrb[28].mxu1 %vm1226_vm2, %v3975_v34  ;;  %3015 = vmatprep.mubr.msk.f32.mxu0 %vm1226_vm2, %v1180_v0  ;;  %2239 = vst.msk [vmem:[%s4068_s20] sm:$0x1] %vm2237_vm5, %v3157_v16 }
 0x102   : > { %v828_v14 = vpop.permute.xlu1 %827  ;;  %v826_v48 = vpop.permute.xlu0 %825  ;;  %v1183_v35 = vsel %vm1138_vm4, %v1181_v38, %v1182_v24  ;;  %v1217_v37 = vsel %vm1138_vm4, %v1182_v24, 0.0  ;;  %v1136_v3 = vsel %vm1057_vm3, 0.0, %v1100_v59  ;;  %v1102_v47 = vsel %vm1057_vm3, %v1100_v59, %v1101_v46 }
 0x103   : > { %v991_v61 = vsel %vm959_vm0, %v3614_v15, %v828_v14  ;;  %v990_v49 = vsel %vm959_vm0, %v3617_v17, %v826_v48  ;;  %v1085_v15 = vrot.slane %v3848_v54, 7  ;;  %v1130_v17 = vsel %vm1057_vm3, 0.0, %v1082_v6  ;;  %v4093_v48 = vld [vmem:[%s4314_s4] ss:$0 sm:$0xff] }
 0x104   : > { %3016 = vmatmul.mubr.msk.f32.gmra.mrb[26].mxu0 %vm1226_vm2, %v1216_v26  ;;  %v1088_v54 = vrot.slane %v3874_v9, 7  ;;  %v1092_v9 = vrot.slane %v3897_v31, 7  ;;  %v1134_v31 = vsel %vm1057_vm3, 0.0, %v1094_v55 }
 0x105   : > { %3018 = vmatprep.mubr.msk.f32.mxu0 %vm1226_vm2, %v1183_v35  ;;  %v1131_v44 = vsel %vm1057_vm3, 0.0, %v1085_v15  ;;  %v1087_v50 = vsel %vm1057_vm3, %v1085_v15, %v1086_v1 }
 0x106   : > { %v926_v36 = vpop.permute.xlu1 %925  ;;  %v924_v25 = vpop.permute.xlu0 %923  ;;  %v1132_v27 = vsel %vm1057_vm3, 0.0, %v1088_v54  ;;  %v1090_v13 = vsel %vm1057_vm3, %v1088_v54, %v1089_v12  ;;  %v1093_v28 = vsel %vm1057_vm3, %v1091_v51, %v1092_v9 }
 0x107   : > { %v1024_v43 = vsel %vm992_vm1, %v991_v61, %v926_v36  ;;  %v1023_v56 = vsel %vm992_vm1, %v990_v49, %v924_v25 }
 0x108   : > { %v1185_v30 = vrot.slane %v1024_v43, 1  ;;  %v1184_v21 = vrot.slane %v1023_v56, 1  ;;  %2913 = vmatprep.mubr.msk.f32.mxu1 %vm1226_vm2, %v1023_v56  ;;  %3019 = vmatmul.mubr.msk.f32.gmra.mrb[28].mxu0 %vm1226_vm2, %v1217_v37  ;;  %v1103_v63 = vrot.slane %v1023_v56, 7  ;;  %v1104_v20 = vrot.slane %v1024_v43, 7 }
 0x109   : > { %2914 = vmatmul.mubr.msk.f32.gmra.mrb[30].mxu1 %vm1226_vm2, %v1024_v43 }
 0x10a   : > { %2946 = vmatprep.mubr.msk.f32.mxu1 %vm1226_vm2, %v1130_v17  ;;  %v1186_v33 = vsel %vm1138_vm4, %v1184_v21, %v1185_v30  ;;  %v1218_v10 = vsel %vm1138_vm4, %v1185_v30, 0.0  ;;  %v1137_v41 = vsel %vm1057_vm3, 0.0, %v1103_v63  ;;  %v1105_v42 = vsel %vm1057_vm3, %v1103_v63, %v1104_v20 }
 0x10b   : > { %3021 = vmatprep.mubr.msk.f32.mxu0 %vm1226_vm2, %v1186_v33 }
 0x10c   : > { %3022 = vmatmul.mubr.msk.f32.gmra.mrb[30].mxu0 %vm1226_vm2, %v1218_v10 }
 0x10d   : > { %2947 = vmatmul.mubr.msk.f32.vlgmr.msra.gmra.mrb[16].mxu1 %vm1226_vm2, %v1084_v23 }
 0x10e   : > { %2949 = vmatprep.mubr.msk.f32.mxu1 %vm1226_vm2, %v1131_v44 }
 0x111   : > { %2950 = vmatmul.mubr.msk.f32.gmra.mrb[18].mxu1 %vm1226_vm2, %v1087_v50 }
 0x112   : > { %2952 = vmatprep.mubr.msk.f32.mxu1 %vm1226_vm2, %v1132_v27 }
 0x115   : > { %2953 = vmatmul.mubr.msk.f32.gmra.mrb[20].mxu1 %vm1226_vm2, %v1090_v13 }
 0x116   : > { %2955 = vmatprep.mubr.msk.f32.mxu1 %vm1226_vm2, %v1133_v5 }
 0x119   : > { %2956 = vmatmul.mubr.msk.f32.gmra.mrb[22].mxu1 %vm1226_vm2, %v1093_v28 }
 0x11a   : > { %2958 = vmatprep.mubr.msk.f32.mxu1 %vm1226_vm2, %v1134_v31 }
 0x11d   : > { %2959 = vmatmul.mubr.msk.f32.gmra.mrb[24].mxu1 %vm1226_vm2, %v1096_v58 }
 0x11e   : > { %2961 = vmatprep.mubr.msk.f32.mxu1 %vm1226_vm2, %v1135_v45 }
 0x121   : > { %2962 = vmatmul.mubr.msk.f32.gmra.mrb[26].mxu1 %vm1226_vm2, %v1099_v2 }
 0x122   : > { %2964 = vmatprep.mubr.msk.f32.mxu1 %vm1226_vm2, %v1136_v3 }
 0x125   : > { %2965 = vmatmul.mubr.msk.f32.gmra.mrb[28].mxu1 %vm1226_vm2, %v1102_v47 }
 0x126   : > { %2967 = vmatprep.mubr.msk.f32.mxu1 %vm1226_vm2, %v1137_v41 }
 0x129   : > { %2968 = vmatmul.mubr.msk.f32.gmra.mrb[30].mxu1 %vm1226_vm2, %v1105_v42 }
 0x164   : > { %v2870_v52 = vpop.f32.mrb[0].mxu1 }
 0x165   : > { %v1357_v62 = vpop.f32.mrb[1].mxu1 }
 0x16c   : > { %v2873_v7 = vpop.f32.mrb[2].mxu1 }
 0x16d   : > { %v1367_v11 = vpop.f32.mrb[3].mxu1 }
 0x174   : > { %v2876_v53 = vpop.f32.mrb[4].mxu1 }
 0x175   : > { %v1377_v18 = vpop.f32.mrb[5].mxu1 }
 0x17c   : > { %v4054_v8 = vpop.f32.mrb[6].mxu1 }
 0x17d   : > { %v4056_v60 = vpop.f32.mrb[7].mxu1 }
 0x184   : > { %v4070_v4 = vpop.f32.mrb[8].mxu1 }
 0x185   : > { %v4076_v32 = vpop.f32.mrb[9].mxu1 }
 0x18c   : > { %v4078_v34 = vpop.f32.mrb[10].mxu1 }
 0x18d   : > { %v4080_v22 = vpop.f32.mrb[11].mxu1 }
 0x194   : > { %v4082_v29 = vpop.f32.mrb[12].mxu1 }
 0x195   : > { %v4084_v24 = vpop.f32.mrb[13].mxu1 }
 0x19c   : > { %v4086_v38 = vpop.f32.mrb[14].mxu1 }
 0x19d   : > { %v4088_v0 = vpop.f32.mrb[15].mxu1 }
 0x1a3   : > { %v2978_v14 = vpop.f32.mrb[0].mxu0 }
 0x1a4   : > { %v3040_v26 = vadd.f32 %v2978_v14, %v2870_v52  ;;  %v1971_v35 = vpop.f32.mrb[1].mxu0 }
 0x1a5   : > { %v3041_v6 = vadd.f32 %v1971_v35, %v1357_v62 }
 0x1a6   : > { %v2170_v61 = vadd.f32 %v3040_v26, %v4093_v48 }
 0x1a7   : > { %v2169_v49 = vadd.f32 %v3041_v6, %v4093_v48  ;;  %v2981_v36 = vpop.f32.mrb[2].mxu0 }
 0x1a8   : > { %2202 = vst.msk [vmem:[%s4099_s25 + $0x8] sm:$0xff] %vm959_vm0, %v2170_v61  ;;  %v2242_v25 = vsel %vm959_vm0, %v2170_v61, 0.0  ;;  %v2315_v43 = vmul.f32 %v2170_v61, %v2170_v61  ;;  %v3042_v56 = vadd.f32 %v2981_v36, %v2873_v7  ;;  %v1981_v37 = vpop.f32.mrb[3].mxu0 }
 0x1a9   : > { %2201 = vst.msk [vmem:[%s4099_s25] sm:$0xff] %vm959_vm0, %v2169_v49  ;;  %v2241_v39 = vsel %vm959_vm0, %v2169_v49, 0.0  ;;  %v2314_v30 = vmul.f32 %v2169_v49, %v2169_v49  ;;  %v3043_v21 = vadd.f32 %v1981_v37, %v1367_v11 }
 0x1aa   : > { %v2347_v15 = vsel %vm959_vm0, %v2315_v43, 0.0  ;;  %v2243_v17 = vadd.f32 %v2242_v25, %v2241_v39  ;;  %v2172_v33 = vadd.f32 %v3042_v56, %v4093_v48 }
 0x1ab   : > { %v2346_v10 = vsel %vm959_vm0, %v2314_v30, 0.0  ;;  %v2171_v1 = vadd.f32 %v3043_v21, %v4093_v48  ;;  %v2984_v23 = vpop.f32.mrb[4].mxu0 }
 0x1ac   : > { %v2348_v54 = vadd.f32 %v2347_v15, %v2346_v10  ;;  %2204 = vst.msk [vmem:[%s4099_s25 + $0x18] sm:$0xff] %vm959_vm0, %v2172_v33  ;;  %v2317_v44 = vmul.f32 %v2172_v33, %v2172_v33  ;;  %v3044_v12 = vadd.f32 %v2984_v23, %v2876_v53  ;;  %v1991_v50 = vpop.f32.mrb[5].mxu0  ;;  %v2246_v5 = vsel %vm959_vm0, %v2172_v33, 0.0 }
 0x1ad   : > { %2203 = vst.msk [vmem:[%s4099_s25 + $0x10] sm:$0xff] %vm959_vm0, %v2171_v1  ;;  %v2244_v51 = vsel %vm959_vm0, %v2171_v1, 0.0  ;;  %v2316_v27 = vmul.f32 %v2171_v1, %v2171_v1  ;;  %v3045_v9 = vadd.f32 %v1991_v50, %v1377_v18 }
 0x1ae   : > { %v2245_v13 = vadd.f32 %v2244_v51, %v2243_v17  ;;  %v2174_v55 = vadd.f32 %v3044_v12, %v4093_v48  ;;  %v2351_v31 = vsel %vm959_vm0, %v2317_v44, 0.0 }
 0x1af   : > { %v2349_v19 = vsel %vm959_vm0, %v2316_v27, 0.0  ;;  %v2173_v28 = vadd.f32 %v3045_v9, %v4093_v48  ;;  %v2987_v40 = vpop.f32.mrb[6].mxu0 }
 0x1b0   : > { %v2350_v57 = vadd.f32 %v2349_v19, %v2348_v54  ;;  %2206 = vst.msk [vmem:[%s4099_s25 + $0x28] sm:$0xff] %vm959_vm0, %v2174_v55  ;;  %v2319_v58 = vmul.f32 %v2174_v55, %v2174_v55  ;;  %v2247_v59 = vadd.f32 %v2246_v5, %v2245_v13  ;;  %v2001_v45 = vpop.f32.mrb[7].mxu0  ;;  %v3046_v63 = vadd.f32 %v2987_v40, %v4054_v8 }
 0x1b1   : > { %2205 = vst.msk [vmem:[%s4099_s25 + $0x20] sm:$0xff] %vm959_vm0, %v2173_v28  ;;  %v2248_v46 = vsel %vm959_vm0, %v2173_v28, 0.0  ;;  %v2318_v2 = vmul.f32 %v2173_v28, %v2173_v28  ;;  %v3047_v3 = vadd.f32 %v2001_v45, %v4056_v60  ;;  %v2250_v41 = vsel %vm959_vm0, %v2174_v55, 0.0 }
 0x1b2   : > { %v2249_v20 = vadd.f32 %v2248_v46, %v2247_v59  ;;  %v2352_v47 = vadd.f32 %v2351_v31, %v2350_v57  ;;  %v2176_v52 = vadd.f32 %v3046_v63, %v4093_v48  ;;  %v2355_v8 = vsel %vm959_vm0, %v2319_v58, 0.0 }
 0x1b3   : > { %v2353_v42 = vsel %vm959_vm0, %v2318_v2, 0.0  ;;  %v2175_v62 = vadd.f32 %v3047_v3, %v4093_v48  ;;  %v2990_v7 = vpop.f32.mrb[8].mxu0 }
 0x1b4   : > { %v2354_v11 = vadd.f32 %v2353_v42, %v2352_v47  ;;  %v2251_v53 = vadd.f32 %v2250_v41, %v2249_v20  ;;  %v3048_v18 = vadd.f32 %v2990_v7, %v4070_v4  ;;  %v2011_v16 = vpop.f32.mrb[9].mxu0  ;;  %2208 = vst.msk [vmem:[%s4099_s25 + $0x38] sm:$0xff] %vm959_vm0, %v2176_v52  ;;  %v2321_v60 = vmul.f32 %v2176_v52, %v2176_v52 }
 0x1b5   : > { %2207 = vst.msk [vmem:[%s4099_s25 + $0x30] sm:$0xff] %vm959_vm0, %v2175_v62  ;;  %v2252_v14 = vsel %vm959_vm0, %v2175_v62, 0.0  ;;  %v2320_v26 = vmul.f32 %v2175_v62, %v2175_v62  ;;  %v3049_v49 = vadd.f32 %v2011_v16, %v4076_v32  ;;  %v2254_v25 = vsel %vm959_vm0, %v2176_v52, 0.0 }
 0x1b6   : > { %v2253_v35 = vadd.f32 %v2252_v14, %v2251_v53  ;;  %v2356_v6 = vadd.f32 %v2355_v8, %v2354_v11  ;;  %v2178_v61 = vadd.f32 %v3048_v18, %v4093_v48  ;;  %v2359_v43 = vsel %vm959_vm0, %v2321_v60, 0.0 }
 0x1b7   : > { %v2357_v4 = vsel %vm959_vm0, %v2320_v26, 0.0  ;;  %v2993_v36 = vpop.f32.mrb[10].mxu0  ;;  %v2177_v37 = vadd.f32 %v3049_v49, %v4093_v48 }
 0x1b8   : > { %v2358_v56 = vadd.f32 %v2357_v4, %v2356_v6  ;;  %2210 = vst.msk [vmem:[%s4099_s25 + $0x48] sm:$0xff] %vm959_vm0, %v2178_v61  ;;  %v2021_v39 = vpop.f32.mrb[11].mxu0  ;;  %v2323_v30 = vmul.f32 %v2178_v61, %v2178_v61  ;;  %v2255_v21 = vadd.f32 %v2254_v25, %v2253_v35  ;;  %v3050_v15 = vadd.f32 %v2993_v36, %v4078_v34 }
 0x1b9   : > { %v3051_v32 = vadd.f32 %v2021_v39, %v4080_v22  ;;  %2209 = vst.msk [vmem:[%s4099_s25 + $0x40] sm:$0xff] %vm959_vm0, %v2177_v37  ;;  %v2256_v17 = vsel %vm959_vm0, %v2177_v37, 0.0  ;;  %v2322_v33 = vmul.f32 %v2177_v37, %v2177_v37  ;;  %v2258_v12 = vsel %vm959_vm0, %v2178_v61, 0.0 }
 0x1ba   : > { %v2360_v10 = vadd.f32 %v2359_v43, %v2358_v56  ;;  %v2257_v1 = vadd.f32 %v2256_v17, %v2255_v21  ;;  %v2180_v23 = vadd.f32 %v3050_v15, %v4093_v48  ;;  %v2363_v51 = vsel %vm959_vm0, %v2323_v30, 0.0 }
 0x1bb   : > { %v2179_v54 = vadd.f32 %v3051_v32, %v4093_v48  ;;  %v2996_v44 = vpop.f32.mrb[12].mxu0  ;;  %v2361_v34 = vsel %vm959_vm0, %v2322_v33, 0.0 }
 0x1bc   : > { %v3052_v50 = vadd.f32 %v2996_v44, %v4082_v29  ;;  %v2031_v22 = vpop.f32.mrb[13].mxu0  ;;  %v2362_v27 = vadd.f32 %v2361_v34, %v2360_v10  ;;  %2212 = vst.msk [vmem:[%s4099_s25 + $0x58] sm:$0xff] %vm959_vm0, %v2180_v23  ;;  %v2325_v9 = vmul.f32 %v2180_v23, %v2180_v23  ;;  %v2259_v13 = vadd.f32 %v2258_v12, %v2257_v1 }
 0x1bd   : > { %2211 = vst.msk [vmem:[%s4099_s25 + $0x50] sm:$0xff] %vm959_vm0, %v2179_v54  ;;  %v2260_v55 = vsel %vm959_vm0, %v2179_v54, 0.0  ;;  %v2324_v5 = vmul.f32 %v2179_v54, %v2179_v54  ;;  %v3053_v28 = vadd.f32 %v2031_v22, %v4084_v24  ;;  %v2262_v57 = vsel %vm959_vm0, %v2180_v23, 0.0 }
 0x1be   : > { %v2182_v19 = vadd.f32 %v3052_v50, %v4093_v48  ;;  %v2261_v29 = vadd.f32 %v2260_v55, %v2259_v13  ;;  %v2364_v40 = vadd.f32 %v2363_v51, %v2362_v27  ;;  %v2367_v24 = vsel %vm959_vm0, %v2325_v9, 0.0 }
 0x1bf   : > { %v2999_v31 = vpop.f32.mrb[14].mxu0  ;;  %v2365_v58 = vsel %vm959_vm0, %v2324_v5, 0.0  ;;  %v2181_v59 = vadd.f32 %v3053_v28, %v4093_v48 }
 0x1c0   : > { %2214 = vst.msk [vmem:[%s4099_s25 + $0x68] sm:$0xff] %vm959_vm0, %v2182_v19  ;;  %v2041_v45 = vpop.f32.mrb[15].mxu0  ;;  %v2366_v46 = vadd.f32 %v2365_v58, %v2364_v40  ;;  %v2263_v2 = vadd.f32 %v2262_v57, %v2261_v29  ;;  %v3054_v63 = vadd.f32 %v2999_v31, %v4086_v38  ;;  %v2327_v20 = vmul.f32 %v2182_v19, %v2182_v19 }
 0x1c1   : > { %v3055_v3 = vadd.f32 %v2041_v45, %v4088_v0  ;;  %2213 = vst.msk [vmem:[%s4099_s25 + $0x60] sm:$0xff] %vm959_vm0, %v2181_v59  ;;  %v2264_v47 = vsel %vm959_vm0, %v2181_v59, 0.0  ;;  %v2326_v41 = vmul.f32 %v2181_v59, %v2181_v59  ;;  %v2266_v38 = vsel %vm959_vm0, %v2182_v19, 0.0 }
 0x1c2   : > { %v2265_v42 = vadd.f32 %v2264_v47, %v2263_v2  ;;  %v2368_v52 = vadd.f32 %v2367_v24, %v2366_v46  ;;  %v2184_v62 = vadd.f32 %v3054_v63, %v4093_v48  ;;  %v2371_v8 = vsel %vm959_vm0, %v2327_v20, 0.0 }
 0x1c3   : > { %v2183_v7 = vadd.f32 %v3055_v3, %v4093_v48  ;;  %v3002_v11 = vpop.f32.mrb[16].mxu0  ;;  %v2369_v0 = vsel %vm959_vm0, %v2326_v41, 0.0 }
 0x1c4   : > { %v2051_v53 = vpop.f32.mrb[17].mxu0  ;;  %v2370_v18 = vadd.f32 %v2369_v0, %v2368_v52  ;;  %2216 = vst.msk [vmem:[%s4099_s25 + $0x78] sm:$0xff] %vm959_vm0, %v2184_v62  ;;  %v2267_v16 = vadd.f32 %v2266_v38, %v2265_v42  ;;  %v2329_v60 = vmul.f32 %v2184_v62, %v2184_v62  ;;  %v2270_v49 = vsel %vm959_vm0, %v2184_v62, 0.0 }
 0x1c5   : > { %2215 = vst.msk [vmem:[%s4099_s25 + $0x70] sm:$0xff] %vm959_vm0, %v2183_v7  ;;  %v2268_v14 = vsel %vm959_vm0, %v2183_v7, 0.0  ;;  %v2328_v26 = vmul.f32 %v2183_v7, %v2183_v7 }
 0x1c6   : > { %v2269_v35 = vadd.f32 %v2268_v14, %v2267_v16  ;;  %v2372_v6 = vadd.f32 %v2371_v8, %v2370_v18  ;;  %v2375_v56 = vsel %vm959_vm0, %v2329_v60, 0.0 }
 0x1c7   : > { %v3005_v61 = vpop.f32.mrb[18].mxu0  ;;  %v2373_v4 = vsel %vm959_vm0, %v2328_v26, 0.0 }
 0x1c8   : > { %v2061_v36 = vpop.f32.mrb[19].mxu0  ;;  %v2374_v25 = vadd.f32 %v2373_v4, %v2372_v6  ;;  %v2271_v43 = vadd.f32 %v2270_v49, %v2269_v35 }
 0x1ca   : > { %v2376_v39 = vadd.f32 %v2375_v56, %v2374_v25 }
 0x1cb   : > { %v3008_v37 = vpop.f32.mrb[20].mxu0 }
 0x1cc   : > { %v2071_v30 = vpop.f32.mrb[21].mxu0 }
 0x1cf   : > { %v3011_v21 = vpop.f32.mrb[22].mxu0 }
 0x1d0   : > { %v2081_v15 = vpop.f32.mrb[23].mxu0 }
 0x1d3   : > { %v4191_v32 = vpop.f32.mrb[24].mxu0 }
 0x1d4   : > { %v4193_v17 = vpop.f32.mrb[25].mxu0 }
 0x1d7   : > { %v4195_v33 = vpop.f32.mrb[26].mxu0 }
 0x1d8   : > { %v4197_v10 = vpop.f32.mrb[27].mxu0 }
 0x1db   : > { %v4199_v1 = vpop.f32.mrb[28].mxu0 }
 0x1dc   : > { %v4201_v23 = vpop.f32.mrb[29].mxu0 }
 0x1df   : > { %v4203_v54 = vpop.f32.mrb[30].mxu0 }
 0x1e0   : > { %v2948_v44 = vpop.f32.mrb[16].mxu1  ;;  %v4205_v12 = vpop.f32.mrb[31].mxu0 }
 0x1e1   : > { %v3056_v34 = vadd.f32 %v3002_v11, %v2948_v44  ;;  %v1742_v50 = vpop.f32.mrb[17].mxu1 }
 0x1e2   : > { %v3057_v22 = vadd.f32 %v2051_v53, %v1742_v50 }
 0x1e3   : > { %v2186_v51 = vadd.f32 %v3056_v34, %v4093_v48 }
 0x1e4   : > { %v2185_v27 = vadd.f32 %v3057_v22, %v4093_v48  ;;  %v2951_v9 = vpop.f32.mrb[18].mxu1 }
 0x1e5   : > { %2218 = vst.msk [vmem:[%s4099_s25 + $0x88] sm:$0xff] %vm959_vm0, %v2186_v51  ;;  %v2331_v13 = vmul.f32 %v2186_v51, %v2186_v51  ;;  %v3058_v55 = vadd.f32 %v3005_v61, %v2951_v9  ;;  %v1752_v5 = vpop.f32.mrb[19].mxu1  ;;  %v2274_v57 = vsel %vm959_vm0, %v2186_v51, 0.0 }
 0x1e6   : > { %2217 = vst.msk [vmem:[%s4099_s25 + $0x80] sm:$0xff] %vm959_vm0, %v2185_v27  ;;  %v2272_v19 = vsel %vm959_vm0, %v2185_v27, 0.0  ;;  %v2330_v28 = vmul.f32 %v2185_v27, %v2185_v27  ;;  %v3059_v29 = vadd.f32 %v2061_v36, %v1752_v5 }
 0x1e7   : > { %v2273_v40 = vadd.f32 %v2272_v19, %v2271_v43  ;;  %v2188_v31 = vadd.f32 %v3058_v55, %v4093_v48  ;;  %v2379_v46 = vsel %vm959_vm0, %v2331_v13, 0.0 }
 0x1e8   : > { %v2377_v58 = vsel %vm959_vm0, %v2330_v28, 0.0  ;;  %v2187_v59 = vadd.f32 %v3059_v29, %v4093_v48  ;;  %v2954_v45 = vpop.f32.mrb[20].mxu1 }
 0x1e9   : > { %v2378_v2 = vadd.f32 %v2377_v58, %v2376_v39  ;;  %2220 = vst.msk [vmem:[%s4099_s25 + $0x98] sm:$0xff] %vm959_vm0, %v2188_v31  ;;  %v2333_v63 = vmul.f32 %v2188_v31, %v2188_v31  ;;  %v2275_v3 = vadd.f32 %v2274_v57, %v2273_v40  ;;  %v1762_v24 = vpop.f32.mrb[21].mxu1  ;;  %v3060_v41 = vadd.f32 %v3008_v37, %v2954_v45 }
 0x1ea   : > { %2219 = vst.msk [vmem:[%s4099_s25 + $0x90] sm:$0xff] %vm959_vm0, %v2187_v59  ;;  %v2276_v20 = vsel %vm959_vm0, %v2187_v59, 0.0  ;;  %v2332_v47 = vmul.f32 %v2187_v59, %v2187_v59  ;;  %v3061_v42 = vadd.f32 %v2071_v30, %v1762_v24  ;;  %v2278_v7 = vsel %vm959_vm0, %v2188_v31, 0.0 }
 0x1eb   : > { %v2277_v52 = vadd.f32 %v2276_v20, %v2275_v3  ;;  %v2380_v62 = vadd.f32 %v2379_v46, %v2378_v2  ;;  %v2190_v38 = vadd.f32 %v3060_v41, %v4093_v48  ;;  %v2383_v14 = vsel %vm959_vm0, %v2333_v63, 0.0 }
 0x1ec   : > { %v2381_v11 = vsel %vm959_vm0, %v2332_v47, 0.0  ;;  %v2189_v0 = vadd.f32 %v3061_v42, %v4093_v48  ;;  %v2957_v53 = vpop.f32.mrb[22].mxu1 }
 0x1ed   : > { %v2382_v18 = vadd.f32 %v2381_v11, %v2380_v62  ;;  %v2279_v16 = vadd.f32 %v2278_v7, %v2277_v52  ;;  %v3062_v8 = vadd.f32 %v3011_v21, %v2957_v53  ;;  %v1772_v60 = vpop.f32.mrb[23].mxu1  ;;  %2222 = vst.msk [vmem:[%s4099_s25 + $0xa8] sm:$0xff] %vm959_vm0, %v2190_v38  ;;  %v2335_v26 = vmul.f32 %v2190_v38, %v2190_v38 }
 0x1ee   : > { %2221 = vst.msk [vmem:[%s4099_s25 + $0xa0] sm:$0xff] %vm959_vm0, %v2189_v0  ;;  %v2280_v35 = vsel %vm959_vm0, %v2189_v0, 0.0  ;;  %v2334_v6 = vmul.f32 %v2189_v0, %v2189_v0  ;;  %v3063_v36 = vadd.f32 %v2081_v15, %v1772_v60  ;;  %v2282_v56 = vsel %vm959_vm0, %v2190_v38, 0.0 }
 0x1ef   : > { %v2281_v61 = vadd.f32 %v2280_v35, %v2279_v16  ;;  %v2384_v49 = vadd.f32 %v2383_v14, %v2382_v18  ;;  %v2192_v4 = vadd.f32 %v3062_v8, %v4093_v48  ;;  %v2387_v37 = vsel %vm959_vm0, %v2335_v26, 0.0 }
 0x1f0   : > { %v2385_v25 = vsel %vm959_vm0, %v2334_v6, 0.0  ;;  %v2960_v43 = vpop.f32.mrb[24].mxu1  ;;  %v2191_v30 = vadd.f32 %v3063_v36, %v4093_v48 }
 0x1f1   : > { %v2386_v39 = vadd.f32 %v2385_v25, %v2384_v49  ;;  %2224 = vst.msk [vmem:[%s4099_s25 + $0xb8] sm:$0xff] %vm959_vm0, %v2192_v4  ;;  %v1782_v21 = vpop.f32.mrb[25].mxu1  ;;  %v2337_v44 = vmul.f32 %v2192_v4, %v2192_v4  ;;  %v2283_v34 = vadd.f32 %v2282_v56, %v2281_v61  ;;  %v3064_v50 = vadd.f32 %v4191_v32, %v2960_v43 }
 0x1f2   : > { %v3065_v15 = vadd.f32 %v4193_v17, %v1782_v21  ;;  %2223 = vst.msk [vmem:[%s4099_s25 + $0xb0] sm:$0xff] %vm959_vm0, %v2191_v30  ;;  %v2284_v22 = vsel %vm959_vm0, %v2191_v30, 0.0  ;;  %v2336_v51 = vmul.f32 %v2191_v30, %v2191_v30  ;;  %v2286_v19 = vsel %vm959_vm0, %v2192_v4, 0.0 }
 0x1f3   : > { %v2388_v27 = vadd.f32 %v2387_v37, %v2386_v39  ;;  %v2285_v9 = vadd.f32 %v2284_v22, %v2283_v34  ;;  %v2194_v13 = vadd.f32 %v3064_v50, %v4093_v48  ;;  %v2391_v29 = vsel %vm959_vm0, %v2337_v44, 0.0 }
 0x1f4   : > { %v2193_v55 = vadd.f32 %v3065_v15, %v4093_v48  ;;  %v2963_v5 = vpop.f32.mrb[26].mxu1  ;;  %v2389_v32 = vsel %vm959_vm0, %v2336_v51, 0.0 }
 0x1f5   : > { %v3066_v28 = vadd.f32 %v4195_v33, %v2963_v5  ;;  %v1792_v17 = vpop.f32.mrb[27].mxu1  ;;  %v2390_v40 = vadd.f32 %v2389_v32, %v2388_v27  ;;  %2226 = vst.msk [vmem:[%s4099_s25 + $0xc8] sm:$0xff] %vm959_vm0, %v2194_v13  ;;  %v2339_v31 = vmul.f32 %v2194_v13, %v2194_v13  ;;  %v2287_v57 = vadd.f32 %v2286_v19, %v2285_v9 }
 0x1f6   : > { %2225 = vst.msk [vmem:[%s4099_s25 + $0xc0] sm:$0xff] %vm959_vm0, %v2193_v55  ;;  %v2288_v58 = vsel %vm959_vm0, %v2193_v55, 0.0  ;;  %v2338_v59 = vmul.f32 %v2193_v55, %v2193_v55  ;;  %v3067_v46 = vadd.f32 %v4197_v10, %v1792_v17  ;;  %v2290_v3 = vsel %vm959_vm0, %v2194_v13, 0.0 }
 0x1f7   : > { %v2196_v45 = vadd.f32 %v3066_v28, %v4093_v48  ;;  %v2289_v33 = vadd.f32 %v2288_v58, %v2287_v57  ;;  %v2392_v2 = vadd.f32 %v2391_v29, %v2390_v40  ;;  %v2395_v10 = vsel %vm959_vm0, %v2339_v31, 0.0  ;;  %v2240_v58 = vld [vmem:[%s4062_s17] sm:$0x1] }
 0x1f8   : > { %v2966_v63 = vpop.f32.mrb[28].mxu1  ;;  %v2393_v24 = vsel %vm959_vm0, %v2338_v59, 0.0  ;;  %v2195_v47 = vadd.f32 %v3067_v46, %v4093_v48  ;;  %v2313_v46 = vld [vmem:[%s4068_s20] sm:$0x1] }
 0x1f9   : > { %2228 = vst.msk [vmem:[%s4099_s25 + $0xd8] sm:$0xff] %vm959_vm0, %v2196_v45  ;;  %v2341_v20 = vmul.f32 %v2196_v45, %v2196_v45  ;;  %v1802_v41 = vpop.f32.mrb[29].mxu1  ;;  %v2394_v42 = vadd.f32 %v2393_v24, %v2392_v2  ;;  %v2291_v52 = vadd.f32 %v2290_v3, %v2289_v33  ;;  %v3068_v62 = vadd.f32 %v4199_v1, %v2966_v63 }
 0x1fa   : > { %v3069_v7 = vadd.f32 %v4201_v23, %v1802_v41  ;;  %2227 = vst.msk [vmem:[%s4099_s25 + $0xd0] sm:$0xff] %vm959_vm0, %v2195_v47  ;;  %v2292_v11 = vsel %vm959_vm0, %v2195_v47, 0.0  ;;  %v2340_v38 = vmul.f32 %v2195_v47, %v2195_v47  ;;  %v2294_v1 = vsel %vm959_vm0, %v2196_v45, 0.0 }
 0x1fb   : > { %v2293_v0 = vadd.f32 %v2292_v11, %v2291_v52  ;;  %v2396_v53 = vadd.f32 %v2395_v10, %v2394_v42  ;;  %v2198_v18 = vadd.f32 %v3068_v62, %v4093_v48  ;;  %v2399_v26 = vsel %vm959_vm0, %v2341_v20, 0.0 }
 0x1fc   : > { %v2197_v16 = vadd.f32 %v3069_v7, %v4093_v48  ;;  %v2969_v8 = vpop.f32.mrb[30].mxu1  ;;  %v2397_v23 = vsel %vm959_vm0, %v2340_v38, 0.0 }
 0x1fd   : > { %v3070_v60 = vadd.f32 %v4203_v54, %v2969_v8  ;;  %v1812_v14 = vpop.f32.mrb[31].mxu1  ;;  %v2398_v35 = vadd.f32 %v2397_v23, %v2396_v53  ;;  %2230 = vst.msk [vmem:[%s4099_s25 + $0xe8] sm:$0xff] %vm959_vm0, %v2198_v18  ;;  %v2343_v6 = vmul.f32 %v2198_v18, %v2198_v18  ;;  %v2295_v61 = vadd.f32 %v2294_v1, %v2293_v0 }
 0x1fe   : > { %2229 = vst.msk [vmem:[%s4099_s25 + $0xe0] sm:$0xff] %vm959_vm0, %v2197_v16  ;;  %v2296_v49 = vsel %vm959_vm0, %v2197_v16, 0.0  ;;  %v2342_v4 = vmul.f32 %v2197_v16, %v2197_v16  ;;  %v3071_v25 = vadd.f32 %v4205_v12, %v1812_v14  ;;  %v2298_v56 = vsel %vm959_vm0, %v2198_v18, 0.0 }
 0x1ff   : > { %v2200_v36 = vadd.f32 %v3070_v60, %v4093_v48  ;;  %v2297_v54 = vadd.f32 %v2296_v49, %v2295_v61  ;;  %v2400_v43 = vadd.f32 %v2399_v26, %v2398_v35  ;;  %v2403_v44 = vsel %vm959_vm0, %v2343_v6, 0.0 }
 0x200   : > { %v2401_v37 = vsel %vm959_vm0, %v2342_v4, 0.0  ;;  %v2199_v39 = vadd.f32 %v3071_v25, %v4093_v48 }
 0x201   : > { %2232 = vst.msk [vmem:[%s4099_s25 + $0xf8] sm:$0xff] %vm959_vm0, %v2200_v36  ;;  %v2402_v30 = vadd.f32 %v2401_v37, %v2400_v43  ;;  %v2299_v21 = vadd.f32 %v2298_v56, %v2297_v54  ;;  %v2345_v34 = vmul.f32 %v2200_v36, %v2200_v36  ;;  %v2302_v51 = vsel %vm959_vm0, %v2200_v36, 0.0 }
 0x202   : > { %2231 = vst.msk [vmem:[%s4099_s25 + $0xf0] sm:$0xff] %vm959_vm0, %v2199_v39  ;;  %v2300_v50 = vsel %vm959_vm0, %v2199_v39, 0.0  ;;  %v2344_v12 = vmul.f32 %v2199_v39, %v2199_v39 }
 0x203   : > { %v2301_v15 = vadd.f32 %v2300_v50, %v2299_v21  ;;  %v2404_v22 = vadd.f32 %v2403_v44, %v2402_v30  ;;  %v2407_v13 = vsel %vm959_vm0, %v2345_v34, 0.0 }
 0x204   : > { %v2405_v27 = vsel %vm959_vm0, %v2344_v12, 0.0 }
 0x205   : > { %v2303_v9 = vadd.f32 %v2302_v51, %v2301_v15  ;;  %v2406_v48 = vadd.f32 %v2405_v27, %v2404_v22 }
 0x207   : > { %v2304_v55 = vrot.slane %v2303_v9, 4  ;;  %v2408_v5 = vadd.f32 %v2407_v13, %v2406_v48 }
 0x209   : > { %v2305_v19 = vadd.f32 %v2304_v55, %v2303_v9  ;;  %v2409_v32 = vrot.slane %v2408_v5, 4 }
 0x20b   : > { %v2306_v28 = vrot.slane %v2305_v19, 2  ;;  %v2410_v17 = vadd.f32 %v2409_v32, %v2408_v5 }
 0x20d   : > { %v2307_v29 = vadd.f32 %v2306_v28, %v2305_v19  ;;  %v2411_v40 = vrot.slane %v2410_v17, 2 }
 0x20f   : > { %v2308_v31 = vrot.slane %v2307_v29, 1  ;;  %v2412_v57 = vadd.f32 %v2411_v40, %v2410_v17 }
 0x211   : > { %v2309_v59 = vadd.f32 %v2308_v31, %v2307_v29  ;;  %v2413_v45 = vrot.slane %v2412_v57, 1 }
 0x213   : > { %v2310_v33 = vadd.f32 %v2309_v59, %v2240_v58  ;;  %v2414_v2 = vadd.f32 %v2413_v45, %v2412_v57 }
 0x215   : > { %2312 = vst.msk [vmem:[%s4062_s17] sm:$0x1] %vm2237_vm5, %v2310_v33  ;;  %v2415_v63 = vadd.f32 %v2414_v2, %v2313_v46 }
 0x217   : > { %2416 = vst.msk [vmem:[%s4068_s20] sm:$0x1] %vm2237_vm5, %v2415_v63 }
 0x218 PF: > { %s20_s11 = sadd.s32 1, %s3153_s11   ;;  %s4320_s30 = smov %s3149_s10 }
 0x219   : > { %p17_p5 = scmp.ge.s32.totalorder %s20_s11, 4   ;;  %s4321_s10 = smov %s4323_s12 }
 0x21b   :  { %19 = sbr.rel (!%p17_p5) target bundleno = 2 (0x2), region = 114 }

</bundles_post_ra>
